<compile_context>
chip_gen: v7x
topology: tpu7x:2x2x1
jax: 0.10.0
libtpu: 0.0.40
codegen_flags: <defaults>
</compile_context>

<pallas_src>
import math

import jax
import jax.numpy as jnp
import numpy as np
from jax import lax
from jax.experimental import pallas as pl
from jax.experimental.pallas import tpu as pltpu


# ----------------------------------------------------------------------------
# Fused Pallas kernel: whole encoder stack (all layers) in one call
# ----------------------------------------------------------------------------
def fused_rnn_encoder_kernel(
    src_ref,      # (S*N, E)   VMEM
    h0_ref,       # (L, N, E)  VMEM
    c0_ref,       # (L, N, H)  VMEM
    w_ih_t_ref,   # (E, 4H)    VMEM  (pre-transposed, shared by all layers)
    w_hh_t_ref,   # (H, 4H)    VMEM  (pre-transposed, single lane-dense operand)
    b_ref,        # (1, 4H)    VMEM  (b_ih + b_hh folded)
    w1_ref,       # (E, F)     VMEM
    b1_ref,       # (1, F)     VMEM
    w2_ref,       # (F, E)     VMEM
    b2_ref,       # (1, E)     VMEM
    eps_ref,      # (1, 1)     SMEM  (exp(eps) precomputed on host)
    out_ref,      # (S*N, E)   VMEM
    hN_ref,       # (L, N, E)  VMEM
    cN_ref,       # (L, N, H)  VMEM
):
    SN, E = src_ref.shape
    L, N, H = c0_ref.shape
    S = SN // N
    eps_exp = eps_ref[0, 0]

    # Shared (per-stack) weights, loaded once.
    w_ih_t = w_ih_t_ref[...]       # (E, 4H)
    w_hh_t = w_hh_t_ref[...]       # (H, 4H)  lane-dense recurrent operand
    b = b_ref[...]                 # (1, 4H)
    w1 = w1_ref[...]
    b1 = b1_ref[...]
    w2 = w2_ref[...]
    b2 = b2_ref[...]

    src = src_ref[...]                              # (S*N, E)
    src3 = src.reshape(S, N, E)                     # tile-aligned per-step reads

    # Hoisted input projection for layer 0 (whole-sequence input is available
    # upfront): one big MXU call instead of S small ones on the leading wave.
    xg0 = (jnp.dot(src, w_ih_t, preferred_element_type=jnp.float32) + b)
    xg0 = xg0.reshape(S, N, 4 * H)                  # (S, N, 4H), index by [t]

    # Per-layer recurrent state, kept in vregs across the whole unroll.
    h = [h0_ref[l] for l in range(L)]               # each (N, E)
    c = [c0_ref[l] for l in range(L)]               # each (N, H)
    # layer_in[l][t]: input token for layer l at time t (filled by layer l-1).
    layer_in = [[None] * S for _ in range(L)]
    out_list = [None] * S                           # final-layer outputs per t

    def step(l, t):
        if l == 0:
            x_in = src3[t]                                        # (N, E)
            gates = xg0[t] + jnp.dot(h[0], w_hh_t,
                                     preferred_element_type=jnp.float32)
        else:
            x_in = layer_in[l][t]                                 # (N, E)
            gates = (jnp.dot(x_in, w_ih_t, preferred_element_type=jnp.float32)
                     + b
                     + jnp.dot(h[l], w_hh_t, preferred_element_type=jnp.float32))
        # 2 EUP launches on the chain: one wide sigmoid + tanh of the g slice.
        sig = jax.nn.sigmoid(gates)                               # (N, 4H)
        g_g = jnp.tanh(gates[:, 2 * H:3 * H])
        i_g = sig[:, 0 * H:1 * H]
        f_g = sig[:, 1 * H:2 * H]
        o_g = sig[:, 3 * H:4 * H]
        c[l] = f_g * c[l] + i_g * g_g
        h[l] = o_g * jnp.tanh(c[l])

        # Residual + feed-forward (DoubleSwish) + BasicNorm, all per-token.
        x = h[l] + x_in                                           # residual 1
        hdn = jnp.dot(x, w1, preferred_element_type=jnp.float32) + b1
        hdn = hdn * jax.nn.sigmoid(hdn - 1.0)                     # DoubleSwish
        y = x + jnp.dot(hdn, w2, preferred_element_type=jnp.float32) + b2
        y = y * lax.rsqrt(jnp.mean(y * y, axis=-1, keepdims=True) + eps_exp)
        if l + 1 < L:
            layer_in[l + 1][t] = y                                # feeds next layer
        else:
            out_list[t] = y

    # Wavefront over (layer, time): L independent dependency chains in flight.
    for wf in range(S + L - 1):
        for l in range(L):
            t = wf - l
            if 0 <= t < S:
                step(l, t)

    # Single full-block store of the final output (no per-step masked stores).
    out_ref[...] = jnp.concatenate(out_list, axis=0)              # (S*N, E)
    for l in range(L):
        hN_ref[l] = h[l]
        cN_ref[l] = c[l]


# ----------------------------------------------------------------------------
# Host-side parameter prep (pre-transpose, fold bias/eps; NO per-layer copies)
# ----------------------------------------------------------------------------
def prepare_params(layer_params):
    return {
        "w_ih_t": layer_params["w_ih"].T,        # (E, 4H)
        "w_hh_t": layer_params["w_hh"].T,        # (H, 4H)  single lane-dense operand
        "b":      layer_params["b"],             # (1, 4H)
        "w1":     layer_params["w1"],            # (E, F)
        "b1":     layer_params["b1"],            # (1, F)
        "w2":     layer_params["w2"],            # (F, E)
        "b2":     layer_params["b2"],            # (1, E)
        "eps_exp": jnp.exp(layer_params["eps"]),  # (1, 1), exp folded on host
    }


# ----------------------------------------------------------------------------
# Wrapper: one pallas_call for the whole encoder stack
# ----------------------------------------------------------------------------
def rnn_encoder_forward(src, h, c, params):
    S, N, E = src.shape
    L, _, H = c.shape
    assert E == H, "noproj variant: d_model must equal rnn_hidden_size"
    F = params["w1"].shape[-1]

    vmem = pl.BlockSpec(memory_space=pltpu.MemorySpace.VMEM)
    smem = pl.BlockSpec(memory_space=pltpu.MemorySpace.SMEM)

    flops = (2 * S * N * E * 4 * H                  # layer-0 hoisted input projection
             + 2 * S * N * E * 4 * H * (L - 1)      # per-step input proj, layers >= 1
             + 2 * S * N * H * 4 * H * L            # fused recurrent gate matmuls
             + 4 * S * N * E * F * L)               # feed-forward (two matmuls)
    transcendentals = L * S * N * (6 * H + F + 1)
    bytes_accessed = 4 * (
        2 * S * N * E + 2 * L * N * (E + H)
        + E * 4 * H + H * 4 * H + 4 * H + 2 * E * F + F + E
    )

    out2, hN, cN = pl.pallas_call(
        fused_rnn_encoder_kernel,
        out_shape=(
            jax.ShapeDtypeStruct((S * N, E), jnp.float32),
            jax.ShapeDtypeStruct((L, N, E), jnp.float32),
            jax.ShapeDtypeStruct((L, N, H), jnp.float32),
        ),
        in_specs=[vmem] * 10 + [smem],
        out_specs=(vmem, vmem, vmem),
        compiler_params=pltpu.CompilerParams(
            vmem_limit_bytes=32 * 1024 * 1024,      # explicit scoped-VMEM budget
        ),
        cost_estimate=pl.CostEstimate(
            flops=flops,
            transcendentals=transcendentals,
            bytes_accessed=bytes_accessed,
        ),
    )(
        src.reshape(S * N, E), h, c,
        params["w_ih_t"], params["w_hh_t"], params["b"],
        params["w1"], params["b1"], params["w2"], params["b2"],
        params["eps_exp"],
    )
    return out2.reshape(S, N, E), hN, cN


# ----------------------------------------------------------------------------
# Pure-JAX reference (for numerical check)
# ----------------------------------------------------------------------------
def ref_layer(src, h0, c0, p):
    H = c0.shape[-1]

    def step(carry, x):
        h, c = carry
        gates = x @ p["w_ih"].T + h @ p["w_hh"].T + p["b"][0]
        i_g = jax.nn.sigmoid(gates[:, 0 * H:1 * H])
        f_g = jax.nn.sigmoid(gates[:, 1 * H:2 * H])
        g_g = jnp.tanh(gates[:, 2 * H:3 * H])
        o_g = jax.nn.sigmoid(gates[:, 3 * H:4 * H])
        c2 = f_g * c + i_g * g_g
        h2 = o_g * jnp.tanh(c2)
        return (h2, c2), h2

    (hN, cN), ys = lax.scan(step, (h0, c0), src)
    x = ys + src
    hdn = x @ p["w1"] + p["b1"][0]
    hdn = hdn * jax.nn.sigmoid(hdn - 1.0)
    y = x + (hdn @ p["w2"] + p["b2"][0])
    y = y * lax.rsqrt(jnp.mean(y * y, axis=-1, keepdims=True) + jnp.exp(p["eps"][0, 0]))
    return y, hN, cN


def ref_encoder(src, h, c, p, num_layers):
    out = src
    hs, cs = [], []
    for i in range(num_layers):
        out, nh, nc = ref_layer(out, h[i], c[i], p)
        hs.append(nh)
        cs.append(nc)
    return out, jnp.stack(hs, 0), jnp.stack(cs, 0)


# ----------------------------------------------------------------------------
# Main
# ----------------------------------------------------------------------------
if __name__ == "__main__":
    S, N = 8, 2                 # sequence length, batch
    d_model = 32                # E
    rnn_hidden_size = 32        # H (== d_model, "noproj")
    dim_feedforward = 64        # F
    num_layers = 2

    key = jax.random.PRNGKey(0)
    ks = jax.random.split(key, 10)

    scale = 0.1
    # One set of layer weights, shared by all layers (mirrors copy.deepcopy init).
    layer_params = {
        "w_ih": scale * jax.random.normal(ks[0], (4 * rnn_hidden_size, d_model), jnp.float32),
        "w_hh": scale * jax.random.normal(ks[1], (4 * rnn_hidden_size, rnn_hidden_size), jnp.float32),
        "b":    scale * jax.random.normal(ks[2], (1, 4 * rnn_hidden_size), jnp.float32),
        "w1":   scale * jax.random.normal(ks[3], (d_model, dim_feedforward), jnp.float32),
        "b1":   scale * jax.random.normal(ks[4], (1, dim_feedforward), jnp.float32),
        "w2":   scale * jax.random.normal(ks[5], (dim_feedforward, d_model), jnp.float32),
        "b2":   scale * jax.random.normal(ks[6], (1, d_model), jnp.float32),
        "eps":  jnp.full((1, 1), math.log(0.25), jnp.float32),   # BasicNorm eps (log-space)
    }

    src = jax.random.normal(ks[7], (S, N, d_model), jnp.float32)
    h0 = jax.random.normal(ks[8], (num_layers, N, d_model), jnp.float32)
    c0 = jax.random.normal(ks[9], (num_layers, N, rnn_hidden_size), jnp.float32)

    params = prepare_params(layer_params)

    out, new_h, new_c = rnn_encoder_forward(src, h0, c0, params)
    out = jax.block_until_ready(out)
    new_h = jax.block_until_ready(new_h)
    new_c = jax.block_until_ready(new_c)

    # numerical check vs. pure-JAX reference
    ref_out, ref_h, ref_c = ref_encoder(src, h0, c0, layer_params, num_layers)
    np.testing.assert_allclose(np.asarray(out), np.asarray(ref_out), rtol=1e-5, atol=1e-5)
    np.testing.assert_allclose(np.asarray(new_h), np.asarray(ref_h), rtol=1e-5, atol=1e-5)
    np.testing.assert_allclose(np.asarray(new_c), np.asarray(ref_c), rtol=1e-5, atol=1e-5)

    assert out.shape == (S, N, d_model)
    assert new_h.shape == (num_layers, N, d_model)
    assert new_c.shape == (num_layers, N, rnn_hidden_size)

    print("KERNEL_OK")
</pallas_src>

<mosaic_0001>
module attributes {stable_mosaic.version = 11 : i64} {
  func.func @fused_rnn_encoder_kernel(%arg0: memref<16x32xf32, #tpu.memory_space<vmem>>, %arg1: memref<2x2x32xf32, #tpu.memory_space<vmem>>, %arg2: memref<2x2x32xf32, #tpu.memory_space<vmem>>, %arg3: memref<32x128xf32, #tpu.memory_space<vmem>>, %arg4: memref<32x128xf32, #tpu.memory_space<vmem>>, %arg5: memref<1x128xf32, #tpu.memory_space<vmem>>, %arg6: memref<32x64xf32, #tpu.memory_space<vmem>>, %arg7: memref<1x64xf32, #tpu.memory_space<vmem>>, %arg8: memref<64x32xf32, #tpu.memory_space<vmem>>, %arg9: memref<1x32xf32, #tpu.memory_space<vmem>>, %arg10: memref<1x1xf32, #tpu.memory_space<smem>>, %arg11: memref<16x32xf32, #tpu.memory_space<vmem>>, %arg12: memref<2x2x32xf32, #tpu.memory_space<vmem>>, %arg13: memref<2x2x32xf32, #tpu.memory_space<vmem>>) attributes {dimension_semantics = [], scalar_prefetch = 0 : i64, scratch_operands = 0 : i64, tpu.core_type = #tpu.core_type<tc>} {
    %c0 = arith.constant 0 : index
    %c0_0 = arith.constant 0 : index
    %0 = memref.load %arg10[%c0, %c0_0] : memref<1x1xf32, #tpu.memory_space<smem>>
    %c0_1 = arith.constant 0 : index
    %c0_2 = arith.constant 0 : index
    %1 = vector.load %arg3[%c0_1, %c0_2] : memref<32x128xf32, #tpu.memory_space<vmem>>, vector<32x128xf32>
    %c0_3 = arith.constant 0 : index
    %c0_4 = arith.constant 0 : index
    %2 = vector.load %arg4[%c0_3, %c0_4] : memref<32x128xf32, #tpu.memory_space<vmem>>, vector<32x128xf32>
    %c0_5 = arith.constant 0 : index
    %c0_6 = arith.constant 0 : index
    %3 = vector.load %arg5[%c0_5, %c0_6] : memref<1x128xf32, #tpu.memory_space<vmem>>, vector<1x128xf32>
    %c0_7 = arith.constant 0 : index
    %c0_8 = arith.constant 0 : index
    %4 = vector.load %arg6[%c0_7, %c0_8] : memref<32x64xf32, #tpu.memory_space<vmem>>, vector<32x64xf32>
    %c0_9 = arith.constant 0 : index
    %c0_10 = arith.constant 0 : index
    %5 = vector.load %arg7[%c0_9, %c0_10] : memref<1x64xf32, #tpu.memory_space<vmem>>, vector<1x64xf32>
    %c0_11 = arith.constant 0 : index
    %c0_12 = arith.constant 0 : index
    %6 = vector.load %arg8[%c0_11, %c0_12] : memref<64x32xf32, #tpu.memory_space<vmem>>, vector<64x32xf32>
    %c0_13 = arith.constant 0 : index
    %c0_14 = arith.constant 0 : index
    %7 = vector.load %arg9[%c0_13, %c0_14] : memref<1x32xf32, #tpu.memory_space<vmem>>, vector<1x32xf32>
    %c0_15 = arith.constant 0 : index
    %c0_16 = arith.constant 0 : index
    %8 = vector.load %arg0[%c0_15, %c0_16] : memref<16x32xf32, #tpu.memory_space<vmem>>, vector<16x32xf32>
    %9 = vector.shape_cast %8 : vector<16x32xf32> to vector<8x2x32xf32>
    %cst = arith.constant dense<0.000000e+00> : vector<16x128xf32>
    %10 = tpu.matmul %8, %1, %cst {dimension_numbers = #tpu.dot_dimension_numbers<[1], [0], [0], [1], [0, 0, 1, 1], [], []>} : vector<16x32xf32>, vector<32x128xf32>, vector<16x128xf32> -> vector<16x128xf32>
    %11 = vector.broadcast %3 : vector<1x128xf32> to vector<16x128xf32>
    %12 = arith.addf %10, %11 : vector<16x128xf32>
    %13 = vector.shape_cast %12 : vector<16x128xf32> to vector<8x2x128xf32>
    %c0_17 = arith.constant 0 : index
    %c0_18 = arith.constant 0 : index
    %c0_19 = arith.constant 0 : index
    %14 = vector.load %arg1[%c0_17, %c0_18, %c0_19] : memref<2x2x32xf32, #tpu.memory_space<vmem>>, vector<1x2x32xf32>
    %15 = vector.shape_cast %14 : vector<1x2x32xf32> to vector<2x32xf32>
    %c1 = arith.constant 1 : index
    %c0_20 = arith.constant 0 : index
    %c0_21 = arith.constant 0 : index
    %16 = vector.load %arg1[%c1, %c0_20, %c0_21] : memref<2x2x32xf32, #tpu.memory_space<vmem>>, vector<1x2x32xf32>
    %17 = vector.shape_cast %16 : vector<1x2x32xf32> to vector<2x32xf32>
    %c0_22 = arith.constant 0 : index
    %c0_23 = arith.constant 0 : index
    %c0_24 = arith.constant 0 : index
    %18 = vector.load %arg2[%c0_22, %c0_23, %c0_24] : memref<2x2x32xf32, #tpu.memory_space<vmem>>, vector<1x2x32xf32>
    %19 = vector.shape_cast %18 : vector<1x2x32xf32> to vector<2x32xf32>
    %c1_25 = arith.constant 1 : index
    %c0_26 = arith.constant 0 : index
    %c0_27 = arith.constant 0 : index
    %20 = vector.load %arg2[%c1_25, %c0_26, %c0_27] : memref<2x2x32xf32, #tpu.memory_space<vmem>>, vector<1x2x32xf32>
    %21 = vector.shape_cast %20 : vector<1x2x32xf32> to vector<2x32xf32>
    %22 = vector.extract_strided_slice %9 {offsets = [0, 0, 0], sizes = [1, 2, 32], strides = [1, 1, 1]} : vector<8x2x32xf32> to vector<1x2x32xf32>
    %23 = vector.shape_cast %22 : vector<1x2x32xf32> to vector<2x32xf32>
    %24 = vector.extract_strided_slice %13 {offsets = [0, 0, 0], sizes = [1, 2, 128], strides = [1, 1, 1]} : vector<8x2x128xf32> to vector<1x2x128xf32>
    %25 = vector.shape_cast %24 : vector<1x2x128xf32> to vector<2x128xf32>
    %cst_28 = arith.constant dense<0.000000e+00> : vector<2x128xf32>
    %26 = tpu.matmul %15, %2, %cst_28 {dimension_numbers = #tpu.dot_dimension_numbers<[1], [0], [0], [1], [0, 0, 1, 1], [], []>} : vector<2x32xf32>, vector<32x128xf32>, vector<2x128xf32> -> vector<2x128xf32>
    %27 = arith.addf %25, %26 : vector<2x128xf32>
    %28 = arith.negf %27 : vector<2x128xf32>
    %29 = math.exp %28 : vector<2x128xf32>
    %cst_29 = arith.constant 1.000000e+00 : f32
    %30 = vector.broadcast %cst_29 : f32 to vector<2x128xf32>
    %31 = arith.addf %30, %29 : vector<2x128xf32>
    %32 = arith.divf %30, %31 : vector<2x128xf32>
    %33 = vector.extract_strided_slice %27 {offsets = [0, 64], sizes = [2, 32], strides = [1, 1]} : vector<2x128xf32> to vector<2x32xf32>
    %34 = math.tanh %33 : vector<2x32xf32>
    %35 = vector.extract_strided_slice %32 {offsets = [0, 0], sizes = [2, 32], strides = [1, 1]} : vector<2x128xf32> to vector<2x32xf32>
    %36 = vector.extract_strided_slice %32 {offsets = [0, 32], sizes = [2, 32], strides = [1, 1]} : vector<2x128xf32> to vector<2x32xf32>
    %37 = vector.extract_strided_slice %32 {offsets = [0, 96], sizes = [2, 32], strides = [1, 1]} : vector<2x128xf32> to vector<2x32xf32>
    %38 = arith.mulf %36, %19 : vector<2x32xf32>
    %39 = arith.mulf %35, %34 : vector<2x32xf32>
    %40 = arith.addf %38, %39 : vector<2x32xf32>
    %41 = math.tanh %40 : vector<2x32xf32>
    %42 = arith.mulf %37, %41 : vector<2x32xf32>
    %43 = arith.addf %42, %23 : vector<2x32xf32>
    %cst_30 = arith.constant dense<0.000000e+00> : vector<2x64xf32>
    %44 = tpu.matmul %43, %4, %cst_30 {dimension_numbers = #tpu.dot_dimension_numbers<[1], [0], [0], [1], [0, 0, 1, 1], [], []>} : vector<2x32xf32>, vector<32x64xf32>, vector<2x64xf32> -> vector<2x64xf32>
    %45 = vector.broadcast %5 : vector<1x64xf32> to vector<2x64xf32>
    %46 = arith.addf %44, %45 : vector<2x64xf32>
    %cst_31 = arith.constant 1.000000e+00 : f32
    %47 = vector.broadcast %cst_31 : f32 to vector<2x64xf32>
    %48 = arith.subf %46, %47 : vector<2x64xf32>
    %49 = arith.negf %48 : vector<2x64xf32>
    %50 = math.exp %49 : vector<2x64xf32>
    %cst_32 = arith.constant 1.000000e+00 : f32
    %51 = vector.broadcast %cst_32 : f32 to vector<2x64xf32>
    %52 = arith.addf %51, %50 : vector<2x64xf32>
    %53 = arith.divf %51, %52 : vector<2x64xf32>
    %54 = arith.mulf %46, %53 : vector<2x64xf32>
    %cst_33 = arith.constant dense<0.000000e+00> : vector<2x32xf32>
    %55 = tpu.matmul %54, %6, %cst_33 {dimension_numbers = #tpu.dot_dimension_numbers<[1], [0], [0], [1], [0, 0, 1, 1], [], []>} : vector<2x64xf32>, vector<64x32xf32>, vector<2x32xf32> -> vector<2x32xf32>
    %56 = arith.addf %43, %55 : vector<2x32xf32>
    %57 = vector.broadcast %7 : vector<1x32xf32> to vector<2x32xf32>
    %58 = arith.addf %56, %57 : vector<2x32xf32>
    %59 = arith.mulf %58, %58 : vector<2x32xf32>
    %cst_34 = arith.constant dense<0.000000e+00> : vector<2xf32>
    %60 = vector.multi_reduction <add>, %59, %cst_34 [1] : vector<2x32xf32> to vector<2xf32>
    %61 = vector.shape_cast %60 : vector<2xf32> to vector<2x1xf32>
    %cst_35 = arith.constant 3.200000e+01 : f32
    %62 = vector.broadcast %cst_35 : f32 to vector<2x1xf32>
    %63 = arith.divf %61, %62 : vector<2x1xf32>
    %64 = vector.broadcast %0 : f32 to vector<2x1xf32>
    %65 = arith.addf %63, %64 : vector<2x1xf32>
    %66 = math.rsqrt %65 : vector<2x1xf32>
    %67 = vector.broadcast %66 : vector<2x1xf32> to vector<2x32xf32>
    %68 = arith.mulf %58, %67 : vector<2x32xf32>
    %69 = vector.extract_strided_slice %9 {offsets = [1, 0, 0], sizes = [1, 2, 32], strides = [1, 1, 1]} : vector<8x2x32xf32> to vector<1x2x32xf32>
    %70 = vector.shape_cast %69 : vector<1x2x32xf32> to vector<2x32xf32>
    %71 = vector.extract_strided_slice %13 {offsets = [1, 0, 0], sizes = [1, 2, 128], strides = [1, 1, 1]} : vector<8x2x128xf32> to vector<1x2x128xf32>
    %72 = vector.shape_cast %71 : vector<1x2x128xf32> to vector<2x128xf32>
    %cst_36 = arith.constant dense<0.000000e+00> : vector<2x128xf32>
    %73 = tpu.matmul %42, %2, %cst_36 {dimension_numbers = #tpu.dot_dimension_numbers<[1], [0], [0], [1], [0, 0, 1, 1], [], []>} : vector<2x32xf32>, vector<32x128xf32>, vector<2x128xf32> -> vector<2x128xf32>
    %74 = arith.addf %72, %73 : vector<2x128xf32>
    %75 = arith.negf %74 : vector<2x128xf32>
    %76 = math.exp %75 : vector<2x128xf32>
    %cst_37 = arith.constant 1.000000e+00 : f32
    %77 = vector.broadcast %cst_37 : f32 to vector<2x128xf32>
    %78 = arith.addf %77, %76 : vector<2x128xf32>
    %79 = arith.divf %77, %78 : vector<2x128xf32>
    %80 = vector.extract_strided_slice %74 {offsets = [0, 64], sizes = [2, 32], strides = [1, 1]} : vector<2x128xf32> to vector<2x32xf32>
    %81 = math.tanh %80 : vector<2x32xf32>
    %82 = vector.extract_strided_slice %79 {offsets = [0, 0], sizes = [2, 32], strides = [1, 1]} : vector<2x128xf32> to vector<2x32xf32>
    %83 = vector.extract_strided_slice %79 {offsets = [0, 32], sizes = [2, 32], strides = [1, 1]} : vector<2x128xf32> to vector<2x32xf32>
    %84 = vector.extract_strided_slice %79 {offsets = [0, 96], sizes = [2, 32], strides = [1, 1]} : vector<2x128xf32> to vector<2x32xf32>
    %85 = arith.mulf %83, %40 : vector<2x32xf32>
    %86 = arith.mulf %82, %81 : vector<2x32xf32>
    %87 = arith.addf %85, %86 : vector<2x32xf32>
    %88 = math.tanh %87 : vector<2x32xf32>
    %89 = arith.mulf %84, %88 : vector<2x32xf32>
    %90 = arith.addf %89, %70 : vector<2x32xf32>
    %cst_38 = arith.constant dense<0.000000e+00> : vector<2x64xf32>
    %91 = tpu.matmul %90, %4, %cst_38 {dimension_numbers = #tpu.dot_dimension_numbers<[1], [0], [0], [1], [0, 0, 1, 1], [], []>} : vector<2x32xf32>, vector<32x64xf32>, vector<2x64xf32> -> vector<2x64xf32>
    %92 = vector.broadcast %5 : vector<1x64xf32> to vector<2x64xf32>
    %93 = arith.addf %91, %92 : vector<2x64xf32>
    %cst_39 = arith.constant 1.000000e+00 : f32
    %94 = vector.broadcast %cst_39 : f32 to vector<2x64xf32>
    %95 = arith.subf %93, %94 : vector<2x64xf32>
    %96 = arith.negf %95 : vector<2x64xf32>
    %97 = math.exp %96 : vector<2x64xf32>
    %cst_40 = arith.constant 1.000000e+00 : f32
    %98 = vector.broadcast %cst_40 : f32 to vector<2x64xf32>
    %99 = arith.addf %98, %97 : vector<2x64xf32>
    %100 = arith.divf %98, %99 : vector<2x64xf32>
    %101 = arith.mulf %93, %100 : vector<2x64xf32>
    %cst_41 = arith.constant dense<0.000000e+00> : vector<2x32xf32>
    %102 = tpu.matmul %101, %6, %cst_41 {dimension_numbers = #tpu.dot_dimension_numbers<[1], [0], [0], [1], [0, 0, 1, 1], [], []>} : vector<2x64xf32>, vector<64x32xf32>, vector<2x32xf32> -> vector<2x32xf32>
    %103 = arith.addf %90, %102 : vector<2x32xf32>
    %104 = vector.broadcast %7 : vector<1x32xf32> to vector<2x32xf32>
    %105 = arith.addf %103, %104 : vector<2x32xf32>
    %106 = arith.mulf %105, %105 : vector<2x32xf32>
    %cst_42 = arith.constant dense<0.000000e+00> : vector<2xf32>
    %107 = vector.multi_reduction <add>, %106, %cst_42 [1] : vector<2x32xf32> to vector<2xf32>
    %108 = vector.shape_cast %107 : vector<2xf32> to vector<2x1xf32>
    %cst_43 = arith.constant 3.200000e+01 : f32
    %109 = vector.broadcast %cst_43 : f32 to vector<2x1xf32>
    %110 = arith.divf %108, %109 : vector<2x1xf32>
    %111 = vector.broadcast %0 : f32 to vector<2x1xf32>
    %112 = arith.addf %110, %111 : vector<2x1xf32>
    %113 = math.rsqrt %112 : vector<2x1xf32>
    %114 = vector.broadcast %113 : vector<2x1xf32> to vector<2x32xf32>
    %115 = arith.mulf %105, %114 : vector<2x32xf32>
    %cst_44 = arith.constant dense<0.000000e+00> : vector<2x128xf32>
    %116 = tpu.matmul %68, %1, %cst_44 {dimension_numbers = #tpu.dot_dimension_numbers<[1], [0], [0], [1], [0, 0, 1, 1], [], []>} : vector<2x32xf32>, vector<32x128xf32>, vector<2x128xf32> -> vector<2x128xf32>
    %117 = vector.broadcast %3 : vector<1x128xf32> to vector<2x128xf32>
    %118 = arith.addf %116, %117 : vector<2x128xf32>
    %cst_45 = arith.constant dense<0.000000e+00> : vector<2x128xf32>
    %119 = tpu.matmul %17, %2, %cst_45 {dimension_numbers = #tpu.dot_dimension_numbers<[1], [0], [0], [1], [0, 0, 1, 1], [], []>} : vector<2x32xf32>, vector<32x128xf32>, vector<2x128xf32> -> vector<2x128xf32>
    %120 = arith.addf %118, %119 : vector<2x128xf32>
    %121 = arith.negf %120 : vector<2x128xf32>
    %122 = math.exp %121 : vector<2x128xf32>
    %cst_46 = arith.constant 1.000000e+00 : f32
    %123 = vector.broadcast %cst_46 : f32 to vector<2x128xf32>
    %124 = arith.addf %123, %122 : vector<2x128xf32>
    %125 = arith.divf %123, %124 : vector<2x128xf32>
    %126 = vector.extract_strided_slice %120 {offsets = [0, 64], sizes = [2, 32], strides = [1, 1]} : vector<2x128xf32> to vector<2x32xf32>
    %127 = math.tanh %126 : vector<2x32xf32>
    %128 = vector.extract_strided_slice %125 {offsets = [0, 0], sizes = [2, 32], strides = [1, 1]} : vector<2x128xf32> to vector<2x32xf32>
    %129 = vector.extract_strided_slice %125 {offsets = [0, 32], sizes = [2, 32], strides = [1, 1]} : vector<2x128xf32> to vector<2x32xf32>
    %130 = vector.extract_strided_slice %125 {offsets = [0, 96], sizes = [2, 32], strides = [1, 1]} : vector<2x128xf32> to vector<2x32xf32>
    %131 = arith.mulf %129, %21 : vector<2x32xf32>
    %132 = arith.mulf %128, %127 : vector<2x32xf32>
    %133 = arith.addf %131, %132 : vector<2x32xf32>
    %134 = math.tanh %133 : vector<2x32xf32>
    %135 = arith.mulf %130, %134 : vector<2x32xf32>
    %136 = arith.addf %135, %68 : vector<2x32xf32>
    %cst_47 = arith.constant dense<0.000000e+00> : vector<2x64xf32>
    %137 = tpu.matmul %136, %4, %cst_47 {dimension_numbers = #tpu.dot_dimension_numbers<[1], [0], [0], [1], [0, 0, 1, 1], [], []>} : vector<2x32xf32>, vector<32x64xf32>, vector<2x64xf32> -> vector<2x64xf32>
    %138 = vector.broadcast %5 : vector<1x64xf32> to vector<2x64xf32>
    %139 = arith.addf %137, %138 : vector<2x64xf32>
    %cst_48 = arith.constant 1.000000e+00 : f32
    %140 = vector.broadcast %cst_48 : f32 to vector<2x64xf32>
    %141 = arith.subf %139, %140 : vector<2x64xf32>
    %142 = arith.negf %141 : vector<2x64xf32>
    %143 = math.exp %142 : vector<2x64xf32>
    %cst_49 = arith.constant 1.000000e+00 : f32
    %144 = vector.broadcast %cst_49 : f32 to vector<2x64xf32>
    %145 = arith.addf %144, %143 : vector<2x64xf32>
    %146 = arith.divf %144, %145 : vector<2x64xf32>
    %147 = arith.mulf %139, %146 : vector<2x64xf32>
    %cst_50 = arith.constant dense<0.000000e+00> : vector<2x32xf32>
    %148 = tpu.matmul %147, %6, %cst_50 {dimension_numbers = #tpu.dot_dimension_numbers<[1], [0], [0], [1], [0, 0, 1, 1], [], []>} : vector<2x64xf32>, vector<64x32xf32>, vector<2x32xf32> -> vector<2x32xf32>
    %149 = arith.addf %136, %148 : vector<2x32xf32>
    %150 = vector.broadcast %7 : vector<1x32xf32> to vector<2x32xf32>
    %151 = arith.addf %149, %150 : vector<2x32xf32>
    %152 = arith.mulf %151, %151 : vector<2x32xf32>
    %cst_51 = arith.constant dense<0.000000e+00> : vector<2xf32>
    %153 = vector.multi_reduction <add>, %152, %cst_51 [1] : vector<2x32xf32> to vector<2xf32>
    %154 = vector.shape_cast %153 : vector<2xf32> to vector<2x1xf32>
    %cst_52 = arith.constant 3.200000e+01 : f32
    %155 = vector.broadcast %cst_52 : f32 to vector<2x1xf32>
    %156 = arith.divf %154, %155 : vector<2x1xf32>
    %157 = vector.broadcast %0 : f32 to vector<2x1xf32>
    %158 = arith.addf %156, %157 : vector<2x1xf32>
    %159 = math.rsqrt %158 : vector<2x1xf32>
    %160 = vector.broadcast %159 : vector<2x1xf32> to vector<2x32xf32>
    %161 = arith.mulf %151, %160 : vector<2x32xf32>
    %162 = vector.extract_strided_slice %9 {offsets = [2, 0, 0], sizes = [1, 2, 32], strides = [1, 1, 1]} : vector<8x2x32xf32> to vector<1x2x32xf32>
    %163 = vector.shape_cast %162 : vector<1x2x32xf32> to vector<2x32xf32>
    %164 = vector.extract_strided_slice %13 {offsets = [2, 0, 0], sizes = [1, 2, 128], strides = [1, 1, 1]} : vector<8x2x128xf32> to vector<1x2x128xf32>
    %165 = vector.shape_cast %164 : vector<1x2x128xf32> to vector<2x128xf32>
    %cst_53 = arith.constant dense<0.000000e+00> : vector<2x128xf32>
    %166 = tpu.matmul %89, %2, %cst_53 {dimension_numbers = #tpu.dot_dimension_numbers<[1], [0], [0], [1], [0, 0, 1, 1], [], []>} : vector<2x32xf32>, vector<32x128xf32>, vector<2x128xf32> -> vector<2x128xf32>
    %167 = arith.addf %165, %166 : vector<2x128xf32>
    %168 = arith.negf %167 : vector<2x128xf32>
    %169 = math.exp %168 : vector<2x128xf32>
    %cst_54 = arith.constant 1.000000e+00 : f32
    %170 = vector.broadcast %cst_54 : f32 to vector<2x128xf32>
    %171 = arith.addf %170, %169 : vector<2x128xf32>
    %172 = arith.divf %170, %171 : vector<2x128xf32>
    %173 = vector.extract_strided_slice %167 {offsets = [0, 64], sizes = [2, 32], strides = [1, 1]} : vector<2x128xf32> to vector<2x32xf32>
    %174 = math.tanh %173 : vector<2x32xf32>
    %175 = vector.extract_strided_slice %172 {offsets = [0, 0], sizes = [2, 32], strides = [1, 1]} : vector<2x128xf32> to vector<2x32xf32>
    %176 = vector.extract_strided_slice %172 {offsets = [0, 32], sizes = [2, 32], strides = [1, 1]} : vector<2x128xf32> to vector<2x32xf32>
    %177 = vector.extract_strided_slice %172 {offsets = [0, 96], sizes = [2, 32], strides = [1, 1]} : vector<2x128xf32> to vector<2x32xf32>
    %178 = arith.mulf %176, %87 : vector<2x32xf32>
    %179 = arith.mulf %175, %174 : vector<2x32xf32>
    %180 = arith.addf %178, %179 : vector<2x32xf32>
    %181 = math.tanh %180 : vector<2x32xf32>
    %182 = arith.mulf %177, %181 : vector<2x32xf32>
    %183 = arith.addf %182, %163 : vector<2x32xf32>
    %cst_55 = arith.constant dense<0.000000e+00> : vector<2x64xf32>
    %184 = tpu.matmul %183, %4, %cst_55 {dimension_numbers = #tpu.dot_dimension_numbers<[1], [0], [0], [1], [0, 0, 1, 1], [], []>} : vector<2x32xf32>, vector<32x64xf32>, vector<2x64xf32> -> vector<2x64xf32>
    %185 = vector.broadcast %5 : vector<1x64xf32> to vector<2x64xf32>
    %186 = arith.addf %184, %185 : vector<2x64xf32>
    %cst_56 = arith.constant 1.000000e+00 : f32
    %187 = vector.broadcast %cst_56 : f32 to vector<2x64xf32>
    %188 = arith.subf %186, %187 : vector<2x64xf32>
    %189 = arith.negf %188 : vector<2x64xf32>
    %190 = math.exp %189 : vector<2x64xf32>
    %cst_57 = arith.constant 1.000000e+00 : f32
    %191 = vector.broadcast %cst_57 : f32 to vector<2x64xf32>
    %192 = arith.addf %191, %190 : vector<2x64xf32>
    %193 = arith.divf %191, %192 : vector<2x64xf32>
    %194 = arith.mulf %186, %193 : vector<2x64xf32>
    %cst_58 = arith.constant dense<0.000000e+00> : vector<2x32xf32>
    %195 = tpu.matmul %194, %6, %cst_58 {dimension_numbers = #tpu.dot_dimension_numbers<[1], [0], [0], [1], [0, 0, 1, 1], [], []>} : vector<2x64xf32>, vector<64x32xf32>, vector<2x32xf32> -> vector<2x32xf32>
    %196 = arith.addf %183, %195 : vector<2x32xf32>
    %197 = vector.broadcast %7 : vector<1x32xf32> to vector<2x32xf32>
    %198 = arith.addf %196, %197 : vector<2x32xf32>
    %199 = arith.mulf %198, %198 : vector<2x32xf32>
    %cst_59 = arith.constant dense<0.000000e+00> : vector<2xf32>
    %200 = vector.multi_reduction <add>, %199, %cst_59 [1] : vector<2x32xf32> to vector<2xf32>
    %201 = vector.shape_cast %200 : vector<2xf32> to vector<2x1xf32>
    %cst_60 = arith.constant 3.200000e+01 : f32
    %202 = vector.broadcast %cst_60 : f32 to vector<2x1xf32>
    %203 = arith.divf %201, %202 : vector<2x1xf32>
    %204 = vector.broadcast %0 : f32 to vector<2x1xf32>
    %205 = arith.addf %203, %204 : vector<2x1xf32>
    %206 = math.rsqrt %205 : vector<2x1xf32>
    %207 = vector.broadcast %206 : vector<2x1xf32> to vector<2x32xf32>
    %208 = arith.mulf %198, %207 : vector<2x32xf32>
    %cst_61 = arith.constant dense<0.000000e+00> : vector<2x128xf32>
    %209 = tpu.matmul %115, %1, %cst_61 {dimension_numbers = #tpu.dot_dimension_numbers<[1], [0], [0], [1], [0, 0, 1, 1], [], []>} : vector<2x32xf32>, vector<32x128xf32>, vector<2x128xf32> -> vector<2x128xf32>
    %210 = vector.broadcast %3 : vector<1x128xf32> to vector<2x128xf32>
    %211 = arith.addf %209, %210 : vector<2x128xf32>
    %cst_62 = arith.constant dense<0.000000e+00> : vector<2x128xf32>
    %212 = tpu.matmul %135, %2, %cst_62 {dimension_numbers = #tpu.dot_dimension_numbers<[1], [0], [0], [1], [0, 0, 1, 1], [], []>} : vector<2x32xf32>, vector<32x128xf32>, vector<2x128xf32> -> vector<2x128xf32>
    %213 = arith.addf %211, %212 : vector<2x128xf32>
    %214 = arith.negf %213 : vector<2x128xf32>
    %215 = math.exp %214 : vector<2x128xf32>
    %cst_63 = arith.constant 1.000000e+00 : f32
    %216 = vector.broadcast %cst_63 : f32 to vector<2x128xf32>
    %217 = arith.addf %216, %215 : vector<2x128xf32>
    %218 = arith.divf %216, %217 : vector<2x128xf32>
    %219 = vector.extract_strided_slice %213 {offsets = [0, 64], sizes = [2, 32], strides = [1, 1]} : vector<2x128xf32> to vector<2x32xf32>
    %220 = math.tanh %219 : vector<2x32xf32>
    %221 = vector.extract_strided_slice %218 {offsets = [0, 0], sizes = [2, 32], strides = [1, 1]} : vector<2x128xf32> to vector<2x32xf32>
    %222 = vector.extract_strided_slice %218 {offsets = [0, 32], sizes = [2, 32], strides = [1, 1]} : vector<2x128xf32> to vector<2x32xf32>
    %223 = vector.extract_strided_slice %218 {offsets = [0, 96], sizes = [2, 32], strides = [1, 1]} : vector<2x128xf32> to vector<2x32xf32>
    %224 = arith.mulf %222, %133 : vector<2x32xf32>
    %225 = arith.mulf %221, %220 : vector<2x32xf32>
    %226 = arith.addf %224, %225 : vector<2x32xf32>
    %227 = math.tanh %226 : vector<2x32xf32>
    %228 = arith.mulf %223, %227 : vector<2x32xf32>
    %229 = arith.addf %228, %115 : vector<2x32xf32>
    %cst_64 = arith.constant dense<0.000000e+00> : vector<2x64xf32>
    %230 = tpu.matmul %229, %4, %cst_64 {dimension_numbers = #tpu.dot_dimension_numbers<[1], [0], [0], [1], [0, 0, 1, 1], [], []>} : vector<2x32xf32>, vector<32x64xf32>, vector<2x64xf32> -> vector<2x64xf32>
    %231 = vector.broadcast %5 : vector<1x64xf32> to vector<2x64xf32>
    %232 = arith.addf %230, %231 : vector<2x64xf32>
    %cst_65 = arith.constant 1.000000e+00 : f32
    %233 = vector.broadcast %cst_65 : f32 to vector<2x64xf32>
    %234 = arith.subf %232, %233 : vector<2x64xf32>
    %235 = arith.negf %234 : vector<2x64xf32>
    %236 = math.exp %235 : vector<2x64xf32>
    %cst_66 = arith.constant 1.000000e+00 : f32
    %237 = vector.broadcast %cst_66 : f32 to vector<2x64xf32>
    %238 = arith.addf %237, %236 : vector<2x64xf32>
    %239 = arith.divf %237, %238 : vector<2x64xf32>
    %240 = arith.mulf %232, %239 : vector<2x64xf32>
    %cst_67 = arith.constant dense<0.000000e+00> : vector<2x32xf32>
    %241 = tpu.matmul %240, %6, %cst_67 {dimension_numbers = #tpu.dot_dimension_numbers<[1], [0], [0], [1], [0, 0, 1, 1], [], []>} : vector<2x64xf32>, vector<64x32xf32>, vector<2x32xf32> -> vector<2x32xf32>
    %242 = arith.addf %229, %241 : vector<2x32xf32>
    %243 = vector.broadcast %7 : vector<1x32xf32> to vector<2x32xf32>
    %244 = arith.addf %242, %243 : vector<2x32xf32>
    %245 = arith.mulf %244, %244 : vector<2x32xf32>
    %cst_68 = arith.constant dense<0.000000e+00> : vector<2xf32>
    %246 = vector.multi_reduction <add>, %245, %cst_68 [1] : vector<2x32xf32> to vector<2xf32>
    %247 = vector.shape_cast %246 : vector<2xf32> to vector<2x1xf32>
    %cst_69 = arith.constant 3.200000e+01 : f32
    %248 = vector.broadcast %cst_69 : f32 to vector<2x1xf32>
    %249 = arith.divf %247, %248 : vector<2x1xf32>
    %250 = vector.broadcast %0 : f32 to vector<2x1xf32>
    %251 = arith.addf %249, %250 : vector<2x1xf32>
    %252 = math.rsqrt %251 : vector<2x1xf32>
    %253 = vector.broadcast %252 : vector<2x1xf32> to vector<2x32xf32>
    %254 = arith.mulf %244, %253 : vector<2x32xf32>
    %255 = vector.extract_strided_slice %9 {offsets = [3, 0, 0], sizes = [1, 2, 32], strides = [1, 1, 1]} : vector<8x2x32xf32> to vector<1x2x32xf32>
    %256 = vector.shape_cast %255 : vector<1x2x32xf32> to vector<2x32xf32>
    %257 = vector.extract_strided_slice %13 {offsets = [3, 0, 0], sizes = [1, 2, 128], strides = [1, 1, 1]} : vector<8x2x128xf32> to vector<1x2x128xf32>
    %258 = vector.shape_cast %257 : vector<1x2x128xf32> to vector<2x128xf32>
    %cst_70 = arith.constant dense<0.000000e+00> : vector<2x128xf32>
    %259 = tpu.matmul %182, %2, %cst_70 {dimension_numbers = #tpu.dot_dimension_numbers<[1], [0], [0], [1], [0, 0, 1, 1], [], []>} : vector<2x32xf32>, vector<32x128xf32>, vector<2x128xf32> -> vector<2x128xf32>
    %260 = arith.addf %258, %259 : vector<2x128xf32>
    %261 = arith.negf %260 : vector<2x128xf32>
    %262 = math.exp %261 : vector<2x128xf32>
    %cst_71 = arith.constant 1.000000e+00 : f32
    %263 = vector.broadcast %cst_71 : f32 to vector<2x128xf32>
    %264 = arith.addf %263, %262 : vector<2x128xf32>
    %265 = arith.divf %263, %264 : vector<2x128xf32>
    %266 = vector.extract_strided_slice %260 {offsets = [0, 64], sizes = [2, 32], strides = [1, 1]} : vector<2x128xf32> to vector<2x32xf32>
    %267 = math.tanh %266 : vector<2x32xf32>
    %268 = vector.extract_strided_slice %265 {offsets = [0, 0], sizes = [2, 32], strides = [1, 1]} : vector<2x128xf32> to vector<2x32xf32>
    %269 = vector.extract_strided_slice %265 {offsets = [0, 32], sizes = [2, 32], strides = [1, 1]} : vector<2x128xf32> to vector<2x32xf32>
    %270 = vector.extract_strided_slice %265 {offsets = [0, 96], sizes = [2, 32], strides = [1, 1]} : vector<2x128xf32> to vector<2x32xf32>
    %271 = arith.mulf %269, %180 : vector<2x32xf32>
    %272 = arith.mulf %268, %267 : vector<2x32xf32>
    %273 = arith.addf %271, %272 : vector<2x32xf32>
    %274 = math.tanh %273 : vector<2x32xf32>
    %275 = arith.mulf %270, %274 : vector<2x32xf32>
    %276 = arith.addf %275, %256 : vector<2x32xf32>
    %cst_72 = arith.constant dense<0.000000e+00> : vector<2x64xf32>
    %277 = tpu.matmul %276, %4, %cst_72 {dimension_numbers = #tpu.dot_dimension_numbers<[1], [0], [0], [1], [0, 0, 1, 1], [], []>} : vector<2x32xf32>, vector<32x64xf32>, vector<2x64xf32> -> vector<2x64xf32>
    %278 = vector.broadcast %5 : vector<1x64xf32> to vector<2x64xf32>
    %279 = arith.addf %277, %278 : vector<2x64xf32>
    %cst_73 = arith.constant 1.000000e+00 : f32
    %280 = vector.broadcast %cst_73 : f32 to vector<2x64xf32>
    %281 = arith.subf %279, %280 : vector<2x64xf32>
    %282 = arith.negf %281 : vector<2x64xf32>
    %283 = math.exp %282 : vector<2x64xf32>
    %cst_74 = arith.constant 1.000000e+00 : f32
    %284 = vector.broadcast %cst_74 : f32 to vector<2x64xf32>
    %285 = arith.addf %284, %283 : vector<2x64xf32>
    %286 = arith.divf %284, %285 : vector<2x64xf32>
    %287 = arith.mulf %279, %286 : vector<2x64xf32>
    %cst_75 = arith.constant dense<0.000000e+00> : vector<2x32xf32>
    %288 = tpu.matmul %287, %6, %cst_75 {dimension_numbers = #tpu.dot_dimension_numbers<[1], [0], [0], [1], [0, 0, 1, 1], [], []>} : vector<2x64xf32>, vector<64x32xf32>, vector<2x32xf32> -> vector<2x32xf32>
    %289 = arith.addf %276, %288 : vector<2x32xf32>
    %290 = vector.broadcast %7 : vector<1x32xf32> to vector<2x32xf32>
    %291 = arith.addf %289, %290 : vector<2x32xf32>
    %292 = arith.mulf %291, %291 : vector<2x32xf32>
    %cst_76 = arith.constant dense<0.000000e+00> : vector<2xf32>
    %293 = vector.multi_reduction <add>, %292, %cst_76 [1] : vector<2x32xf32> to vector<2xf32>
    %294 = vector.shape_cast %293 : vector<2xf32> to vector<2x1xf32>
    %cst_77 = arith.constant 3.200000e+01 : f32
    %295 = vector.broadcast %cst_77 : f32 to vector<2x1xf32>
    %296 = arith.divf %294, %295 : vector<2x1xf32>
    %297 = vector.broadcast %0 : f32 to vector<2x1xf32>
    %298 = arith.addf %296, %297 : vector<2x1xf32>
    %299 = math.rsqrt %298 : vector<2x1xf32>
    %300 = vector.broadcast %299 : vector<2x1xf32> to vector<2x32xf32>
    %301 = arith.mulf %291, %300 : vector<2x32xf32>
    %cst_78 = arith.constant dense<0.000000e+00> : vector<2x128xf32>
    %302 = tpu.matmul %208, %1, %cst_78 {dimension_numbers = #tpu.dot_dimension_numbers<[1], [0], [0], [1], [0, 0, 1, 1], [], []>} : vector<2x32xf32>, vector<32x128xf32>, vector<2x128xf32> -> vector<2x128xf32>
    %303 = vector.broadcast %3 : vector<1x128xf32> to vector<2x128xf32>
    %304 = arith.addf %302, %303 : vector<2x128xf32>
    %cst_79 = arith.constant dense<0.000000e+00> : vector<2x128xf32>
    %305 = tpu.matmul %228, %2, %cst_79 {dimension_numbers = #tpu.dot_dimension_numbers<[1], [0], [0], [1], [0, 0, 1, 1], [], []>} : vector<2x32xf32>, vector<32x128xf32>, vector<2x128xf32> -> vector<2x128xf32>
    %306 = arith.addf %304, %305 : vector<2x128xf32>
    %307 = arith.negf %306 : vector<2x128xf32>
    %308 = math.exp %307 : vector<2x128xf32>
    %cst_80 = arith.constant 1.000000e+00 : f32
    %309 = vector.broadcast %cst_80 : f32 to vector<2x128xf32>
    %310 = arith.addf %309, %308 : vector<2x128xf32>
    %311 = arith.divf %309, %310 : vector<2x128xf32>
    %312 = vector.extract_strided_slice %306 {offsets = [0, 64], sizes = [2, 32], strides = [1, 1]} : vector<2x128xf32> to vector<2x32xf32>
    %313 = math.tanh %312 : vector<2x32xf32>
    %314 = vector.extract_strided_slice %311 {offsets = [0, 0], sizes = [2, 32], strides = [1, 1]} : vector<2x128xf32> to vector<2x32xf32>
    %315 = vector.extract_strided_slice %311 {offsets = [0, 32], sizes = [2, 32], strides = [1, 1]} : vector<2x128xf32> to vector<2x32xf32>
    %316 = vector.extract_strided_slice %311 {offsets = [0, 96], sizes = [2, 32], strides = [1, 1]} : vector<2x128xf32> to vector<2x32xf32>
    %317 = arith.mulf %315, %226 : vector<2x32xf32>
    %318 = arith.mulf %314, %313 : vector<2x32xf32>
    %319 = arith.addf %317, %318 : vector<2x32xf32>
    %320 = math.tanh %319 : vector<2x32xf32>
    %321 = arith.mulf %316, %320 : vector<2x32xf32>
    %322 = arith.addf %321, %208 : vector<2x32xf32>
    %cst_81 = arith.constant dense<0.000000e+00> : vector<2x64xf32>
    %323 = tpu.matmul %322, %4, %cst_81 {dimension_numbers = #tpu.dot_dimension_numbers<[1], [0], [0], [1], [0, 0, 1, 1], [], []>} : vector<2x32xf32>, vector<32x64xf32>, vector<2x64xf32> -> vector<2x64xf32>
    %324 = vector.broadcast %5 : vector<1x64xf32> to vector<2x64xf32>
    %325 = arith.addf %323, %324 : vector<2x64xf32>
    %cst_82 = arith.constant 1.000000e+00 : f32
    %326 = vector.broadcast %cst_82 : f32 to vector<2x64xf32>
    %327 = arith.subf %325, %326 : vector<2x64xf32>
    %328 = arith.negf %327 : vector<2x64xf32>
    %329 = math.exp %328 : vector<2x64xf32>
    %cst_83 = arith.constant 1.000000e+00 : f32
    %330 = vector.broadcast %cst_83 : f32 to vector<2x64xf32>
    %331 = arith.addf %330, %329 : vector<2x64xf32>
    %332 = arith.divf %330, %331 : vector<2x64xf32>
    %333 = arith.mulf %325, %332 : vector<2x64xf32>
    %cst_84 = arith.constant dense<0.000000e+00> : vector<2x32xf32>
    %334 = tpu.matmul %333, %6, %cst_84 {dimension_numbers = #tpu.dot_dimension_numbers<[1], [0], [0], [1], [0, 0, 1, 1], [], []>} : vector<2x64xf32>, vector<64x32xf32>, vector<2x32xf32> -> vector<2x32xf32>
    %335 = arith.addf %322, %334 : vector<2x32xf32>
    %336 = vector.broadcast %7 : vector<1x32xf32> to vector<2x32xf32>
    %337 = arith.addf %335, %336 : vector<2x32xf32>
    %338 = arith.mulf %337, %337 : vector<2x32xf32>
    %cst_85 = arith.constant dense<0.000000e+00> : vector<2xf32>
    %339 = vector.multi_reduction <add>, %338, %cst_85 [1] : vector<2x32xf32> to vector<2xf32>
    %340 = vector.shape_cast %339 : vector<2xf32> to vector<2x1xf32>
    %cst_86 = arith.constant 3.200000e+01 : f32
    %341 = vector.broadcast %cst_86 : f32 to vector<2x1xf32>
    %342 = arith.divf %340, %341 : vector<2x1xf32>
    %343 = vector.broadcast %0 : f32 to vector<2x1xf32>
    %344 = arith.addf %342, %343 : vector<2x1xf32>
    %345 = math.rsqrt %344 : vector<2x1xf32>
    %346 = vector.broadcast %345 : vector<2x1xf32> to vector<2x32xf32>
    %347 = arith.mulf %337, %346 : vector<2x32xf32>
    %348 = vector.extract_strided_slice %9 {offsets = [4, 0, 0], sizes = [1, 2, 32], strides = [1, 1, 1]} : vector<8x2x32xf32> to vector<1x2x32xf32>
    %349 = vector.shape_cast %348 : vector<1x2x32xf32> to vector<2x32xf32>
    %350 = vector.extract_strided_slice %13 {offsets = [4, 0, 0], sizes = [1, 2, 128], strides = [1, 1, 1]} : vector<8x2x128xf32> to vector<1x2x128xf32>
    %351 = vector.shape_cast %350 : vector<1x2x128xf32> to vector<2x128xf32>
    %cst_87 = arith.constant dense<0.000000e+00> : vector<2x128xf32>
    %352 = tpu.matmul %275, %2, %cst_87 {dimension_numbers = #tpu.dot_dimension_numbers<[1], [0], [0], [1], [0, 0, 1, 1], [], []>} : vector<2x32xf32>, vector<32x128xf32>, vector<2x128xf32> -> vector<2x128xf32>
    %353 = arith.addf %351, %352 : vector<2x128xf32>
    %354 = arith.negf %353 : vector<2x128xf32>
    %355 = math.exp %354 : vector<2x128xf32>
    %cst_88 = arith.constant 1.000000e+00 : f32
    %356 = vector.broadcast %cst_88 : f32 to vector<2x128xf32>
    %357 = arith.addf %356, %355 : vector<2x128xf32>
    %358 = arith.divf %356, %357 : vector<2x128xf32>
    %359 = vector.extract_strided_slice %353 {offsets = [0, 64], sizes = [2, 32], strides = [1, 1]} : vector<2x128xf32> to vector<2x32xf32>
    %360 = math.tanh %359 : vector<2x32xf32>
    %361 = vector.extract_strided_slice %358 {offsets = [0, 0], sizes = [2, 32], strides = [1, 1]} : vector<2x128xf32> to vector<2x32xf32>
    %362 = vector.extract_strided_slice %358 {offsets = [0, 32], sizes = [2, 32], strides = [1, 1]} : vector<2x128xf32> to vector<2x32xf32>
    %363 = vector.extract_strided_slice %358 {offsets = [0, 96], sizes = [2, 32], strides = [1, 1]} : vector<2x128xf32> to vector<2x32xf32>
    %364 = arith.mulf %362, %273 : vector<2x32xf32>
    %365 = arith.mulf %361, %360 : vector<2x32xf32>
    %366 = arith.addf %364, %365 : vector<2x32xf32>
    %367 = math.tanh %366 : vector<2x32xf32>
    %368 = arith.mulf %363, %367 : vector<2x32xf32>
    %369 = arith.addf %368, %349 : vector<2x32xf32>
    %cst_89 = arith.constant dense<0.000000e+00> : vector<2x64xf32>
    %370 = tpu.matmul %369, %4, %cst_89 {dimension_numbers = #tpu.dot_dimension_numbers<[1], [0], [0], [1], [0, 0, 1, 1], [], []>} : vector<2x32xf32>, vector<32x64xf32>, vector<2x64xf32> -> vector<2x64xf32>
    %371 = vector.broadcast %5 : vector<1x64xf32> to vector<2x64xf32>
    %372 = arith.addf %370, %371 : vector<2x64xf32>
    %cst_90 = arith.constant 1.000000e+00 : f32
    %373 = vector.broadcast %cst_90 : f32 to vector<2x64xf32>
    %374 = arith.subf %372, %373 : vector<2x64xf32>
    %375 = arith.negf %374 : vector<2x64xf32>
    %376 = math.exp %375 : vector<2x64xf32>
    %cst_91 = arith.constant 1.000000e+00 : f32
    %377 = vector.broadcast %cst_91 : f32 to vector<2x64xf32>
    %378 = arith.addf %377, %376 : vector<2x64xf32>
    %379 = arith.divf %377, %378 : vector<2x64xf32>
    %380 = arith.mulf %372, %379 : vector<2x64xf32>
    %cst_92 = arith.constant dense<0.000000e+00> : vector<2x32xf32>
    %381 = tpu.matmul %380, %6, %cst_92 {dimension_numbers = #tpu.dot_dimension_numbers<[1], [0], [0], [1], [0, 0, 1, 1], [], []>} : vector<2x64xf32>, vector<64x32xf32>, vector<2x32xf32> -> vector<2x32xf32>
    %382 = arith.addf %369, %381 : vector<2x32xf32>
    %383 = vector.broadcast %7 : vector<1x32xf32> to vector<2x32xf32>
    %384 = arith.addf %382, %383 : vector<2x32xf32>
    %385 = arith.mulf %384, %384 : vector<2x32xf32>
    %cst_93 = arith.constant dense<0.000000e+00> : vector<2xf32>
    %386 = vector.multi_reduction <add>, %385, %cst_93 [1] : vector<2x32xf32> to vector<2xf32>
    %387 = vector.shape_cast %386 : vector<2xf32> to vector<2x1xf32>
    %cst_94 = arith.constant 3.200000e+01 : f32
    %388 = vector.broadcast %cst_94 : f32 to vector<2x1xf32>
    %389 = arith.divf %387, %388 : vector<2x1xf32>
    %390 = vector.broadcast %0 : f32 to vector<2x1xf32>
    %391 = arith.addf %389, %390 : vector<2x1xf32>
    %392 = math.rsqrt %391 : vector<2x1xf32>
    %393 = vector.broadcast %392 : vector<2x1xf32> to vector<2x32xf32>
    %394 = arith.mulf %384, %393 : vector<2x32xf32>
    %cst_95 = arith.constant dense<0.000000e+00> : vector<2x128xf32>
    %395 = tpu.matmul %301, %1, %cst_95 {dimension_numbers = #tpu.dot_dimension_numbers<[1], [0], [0], [1], [0, 0, 1, 1], [], []>} : vector<2x32xf32>, vector<32x128xf32>, vector<2x128xf32> -> vector<2x128xf32>
    %396 = vector.broadcast %3 : vector<1x128xf32> to vector<2x128xf32>
    %397 = arith.addf %395, %396 : vector<2x128xf32>
    %cst_96 = arith.constant dense<0.000000e+00> : vector<2x128xf32>
    %398 = tpu.matmul %321, %2, %cst_96 {dimension_numbers = #tpu.dot_dimension_numbers<[1], [0], [0], [1], [0, 0, 1, 1], [], []>} : vector<2x32xf32>, vector<32x128xf32>, vector<2x128xf32> -> vector<2x128xf32>
    %399 = arith.addf %397, %398 : vector<2x128xf32>
    %400 = arith.negf %399 : vector<2x128xf32>
    %401 = math.exp %400 : vector<2x128xf32>
    %cst_97 = arith.constant 1.000000e+00 : f32
    %402 = vector.broadcast %cst_97 : f32 to vector<2x128xf32>
    %403 = arith.addf %402, %401 : vector<2x128xf32>
    %404 = arith.divf %402, %403 : vector<2x128xf32>
    %405 = vector.extract_strided_slice %399 {offsets = [0, 64], sizes = [2, 32], strides = [1, 1]} : vector<2x128xf32> to vector<2x32xf32>
    %406 = math.tanh %405 : vector<2x32xf32>
    %407 = vector.extract_strided_slice %404 {offsets = [0, 0], sizes = [2, 32], strides = [1, 1]} : vector<2x128xf32> to vector<2x32xf32>
    %408 = vector.extract_strided_slice %404 {offsets = [0, 32], sizes = [2, 32], strides = [1, 1]} : vector<2x128xf32> to vector<2x32xf32>
    %409 = vector.extract_strided_slice %404 {offsets = [0, 96], sizes = [2, 32], strides = [1, 1]} : vector<2x128xf32> to vector<2x32xf32>
    %410 = arith.mulf %408, %319 : vector<2x32xf32>
    %411 = arith.mulf %407, %406 : vector<2x32xf32>
    %412 = arith.addf %410, %411 : vector<2x32xf32>
    %413 = math.tanh %412 : vector<2x32xf32>
    %414 = arith.mulf %409, %413 : vector<2x32xf32>
    %415 = arith.addf %414, %301 : vector<2x32xf32>
    %cst_98 = arith.constant dense<0.000000e+00> : vector<2x64xf32>
    %416 = tpu.matmul %415, %4, %cst_98 {dimension_numbers = #tpu.dot_dimension_numbers<[1], [0], [0], [1], [0, 0, 1, 1], [], []>} : vector<2x32xf32>, vector<32x64xf32>, vector<2x64xf32> -> vector<2x64xf32>
    %417 = vector.broadcast %5 : vector<1x64xf32> to vector<2x64xf32>
    %418 = arith.addf %416, %417 : vector<2x64xf32>
    %cst_99 = arith.constant 1.000000e+00 : f32
    %419 = vector.broadcast %cst_99 : f32 to vector<2x64xf32>
    %420 = arith.subf %418, %419 : vector<2x64xf32>
    %421 = arith.negf %420 : vector<2x64xf32>
    %422 = math.exp %421 : vector<2x64xf32>
    %cst_100 = arith.constant 1.000000e+00 : f32
    %423 = vector.broadcast %cst_100 : f32 to vector<2x64xf32>
    %424 = arith.addf %423, %422 : vector<2x64xf32>
    %425 = arith.divf %423, %424 : vector<2x64xf32>
    %426 = arith.mulf %418, %425 : vector<2x64xf32>
    %cst_101 = arith.constant dense<0.000000e+00> : vector<2x32xf32>
    %427 = tpu.matmul %426, %6, %cst_101 {dimension_numbers = #tpu.dot_dimension_numbers<[1], [0], [0], [1], [0, 0, 1, 1], [], []>} : vector<2x64xf32>, vector<64x32xf32>, vector<2x32xf32> -> vector<2x32xf32>
    %428 = arith.addf %415, %427 : vector<2x32xf32>
    %429 = vector.broadcast %7 : vector<1x32xf32> to vector<2x32xf32>
    %430 = arith.addf %428, %429 : vector<2x32xf32>
    %431 = arith.mulf %430, %430 : vector<2x32xf32>
    %cst_102 = arith.constant dense<0.000000e+00> : vector<2xf32>
    %432 = vector.multi_reduction <add>, %431, %cst_102 [1] : vector<2x32xf32> to vector<2xf32>
    %433 = vector.shape_cast %432 : vector<2xf32> to vector<2x1xf32>
    %cst_103 = arith.constant 3.200000e+01 : f32
    %434 = vector.broadcast %cst_103 : f32 to vector<2x1xf32>
    %435 = arith.divf %433, %434 : vector<2x1xf32>
    %436 = vector.broadcast %0 : f32 to vector<2x1xf32>
    %437 = arith.addf %435, %436 : vector<2x1xf32>
    %438 = math.rsqrt %437 : vector<2x1xf32>
    %439 = vector.broadcast %438 : vector<2x1xf32> to vector<2x32xf32>
    %440 = arith.mulf %430, %439 : vector<2x32xf32>
    %441 = vector.extract_strided_slice %9 {offsets = [5, 0, 0], sizes = [1, 2, 32], strides = [1, 1, 1]} : vector<8x2x32xf32> to vector<1x2x32xf32>
    %442 = vector.shape_cast %441 : vector<1x2x32xf32> to vector<2x32xf32>
    %443 = vector.extract_strided_slice %13 {offsets = [5, 0, 0], sizes = [1, 2, 128], strides = [1, 1, 1]} : vector<8x2x128xf32> to vector<1x2x128xf32>
    %444 = vector.shape_cast %443 : vector<1x2x128xf32> to vector<2x128xf32>
    %cst_104 = arith.constant dense<0.000000e+00> : vector<2x128xf32>
    %445 = tpu.matmul %368, %2, %cst_104 {dimension_numbers = #tpu.dot_dimension_numbers<[1], [0], [0], [1], [0, 0, 1, 1], [], []>} : vector<2x32xf32>, vector<32x128xf32>, vector<2x128xf32> -> vector<2x128xf32>
    %446 = arith.addf %444, %445 : vector<2x128xf32>
    %447 = arith.negf %446 : vector<2x128xf32>
    %448 = math.exp %447 : vector<2x128xf32>
    %cst_105 = arith.constant 1.000000e+00 : f32
    %449 = vector.broadcast %cst_105 : f32 to vector<2x128xf32>
    %450 = arith.addf %449, %448 : vector<2x128xf32>
    %451 = arith.divf %449, %450 : vector<2x128xf32>
    %452 = vector.extract_strided_slice %446 {offsets = [0, 64], sizes = [2, 32], strides = [1, 1]} : vector<2x128xf32> to vector<2x32xf32>
    %453 = math.tanh %452 : vector<2x32xf32>
    %454 = vector.extract_strided_slice %451 {offsets = [0, 0], sizes = [2, 32], strides = [1, 1]} : vector<2x128xf32> to vector<2x32xf32>
    %455 = vector.extract_strided_slice %451 {offsets = [0, 32], sizes = [2, 32], strides = [1, 1]} : vector<2x128xf32> to vector<2x32xf32>
    %456 = vector.extract_strided_slice %451 {offsets = [0, 96], sizes = [2, 32], strides = [1, 1]} : vector<2x128xf32> to vector<2x32xf32>
    %457 = arith.mulf %455, %366 : vector<2x32xf32>
    %458 = arith.mulf %454, %453 : vector<2x32xf32>
    %459 = arith.addf %457, %458 : vector<2x32xf32>
    %460 = math.tanh %459 : vector<2x32xf32>
    %461 = arith.mulf %456, %460 : vector<2x32xf32>
    %462 = arith.addf %461, %442 : vector<2x32xf32>
    %cst_106 = arith.constant dense<0.000000e+00> : vector<2x64xf32>
    %463 = tpu.matmul %462, %4, %cst_106 {dimension_numbers = #tpu.dot_dimension_numbers<[1], [0], [0], [1], [0, 0, 1, 1], [], []>} : vector<2x32xf32>, vector<32x64xf32>, vector<2x64xf32> -> vector<2x64xf32>
    %464 = vector.broadcast %5 : vector<1x64xf32> to vector<2x64xf32>
    %465 = arith.addf %463, %464 : vector<2x64xf32>
    %cst_107 = arith.constant 1.000000e+00 : f32
    %466 = vector.broadcast %cst_107 : f32 to vector<2x64xf32>
    %467 = arith.subf %465, %466 : vector<2x64xf32>
    %468 = arith.negf %467 : vector<2x64xf32>
    %469 = math.exp %468 : vector<2x64xf32>
    %cst_108 = arith.constant 1.000000e+00 : f32
    %470 = vector.broadcast %cst_108 : f32 to vector<2x64xf32>
    %471 = arith.addf %470, %469 : vector<2x64xf32>
    %472 = arith.divf %470, %471 : vector<2x64xf32>
    %473 = arith.mulf %465, %472 : vector<2x64xf32>
    %cst_109 = arith.constant dense<0.000000e+00> : vector<2x32xf32>
    %474 = tpu.matmul %473, %6, %cst_109 {dimension_numbers = #tpu.dot_dimension_numbers<[1], [0], [0], [1], [0, 0, 1, 1], [], []>} : vector<2x64xf32>, vector<64x32xf32>, vector<2x32xf32> -> vector<2x32xf32>
    %475 = arith.addf %462, %474 : vector<2x32xf32>
    %476 = vector.broadcast %7 : vector<1x32xf32> to vector<2x32xf32>
    %477 = arith.addf %475, %476 : vector<2x32xf32>
    %478 = arith.mulf %477, %477 : vector<2x32xf32>
    %cst_110 = arith.constant dense<0.000000e+00> : vector<2xf32>
    %479 = vector.multi_reduction <add>, %478, %cst_110 [1] : vector<2x32xf32> to vector<2xf32>
    %480 = vector.shape_cast %479 : vector<2xf32> to vector<2x1xf32>
    %cst_111 = arith.constant 3.200000e+01 : f32
    %481 = vector.broadcast %cst_111 : f32 to vector<2x1xf32>
    %482 = arith.divf %480, %481 : vector<2x1xf32>
    %483 = vector.broadcast %0 : f32 to vector<2x1xf32>
    %484 = arith.addf %482, %483 : vector<2x1xf32>
    %485 = math.rsqrt %484 : vector<2x1xf32>
    %486 = vector.broadcast %485 : vector<2x1xf32> to vector<2x32xf32>
    %487 = arith.mulf %477, %486 : vector<2x32xf32>
    %cst_112 = arith.constant dense<0.000000e+00> : vector<2x128xf32>
    %488 = tpu.matmul %394, %1, %cst_112 {dimension_numbers = #tpu.dot_dimension_numbers<[1], [0], [0], [1], [0, 0, 1, 1], [], []>} : vector<2x32xf32>, vector<32x128xf32>, vector<2x128xf32> -> vector<2x128xf32>
    %489 = vector.broadcast %3 : vector<1x128xf32> to vector<2x128xf32>
    %490 = arith.addf %488, %489 : vector<2x128xf32>
    %cst_113 = arith.constant dense<0.000000e+00> : vector<2x128xf32>
    %491 = tpu.matmul %414, %2, %cst_113 {dimension_numbers = #tpu.dot_dimension_numbers<[1], [0], [0], [1], [0, 0, 1, 1], [], []>} : vector<2x32xf32>, vector<32x128xf32>, vector<2x128xf32> -> vector<2x128xf32>
    %492 = arith.addf %490, %491 : vector<2x128xf32>
    %493 = arith.negf %492 : vector<2x128xf32>
    %494 = math.exp %493 : vector<2x128xf32>
    %cst_114 = arith.constant 1.000000e+00 : f32
    %495 = vector.broadcast %cst_114 : f32 to vector<2x128xf32>
    %496 = arith.addf %495, %494 : vector<2x128xf32>
    %497 = arith.divf %495, %496 : vector<2x128xf32>
    %498 = vector.extract_strided_slice %492 {offsets = [0, 64], sizes = [2, 32], strides = [1, 1]} : vector<2x128xf32> to vector<2x32xf32>
    %499 = math.tanh %498 : vector<2x32xf32>
    %500 = vector.extract_strided_slice %497 {offsets = [0, 0], sizes = [2, 32], strides = [1, 1]} : vector<2x128xf32> to vector<2x32xf32>
    %501 = vector.extract_strided_slice %497 {offsets = [0, 32], sizes = [2, 32], strides = [1, 1]} : vector<2x128xf32> to vector<2x32xf32>
    %502 = vector.extract_strided_slice %497 {offsets = [0, 96], sizes = [2, 32], strides = [1, 1]} : vector<2x128xf32> to vector<2x32xf32>
    %503 = arith.mulf %501, %412 : vector<2x32xf32>
    %504 = arith.mulf %500, %499 : vector<2x32xf32>
    %505 = arith.addf %503, %504 : vector<2x32xf32>
    %506 = math.tanh %505 : vector<2x32xf32>
    %507 = arith.mulf %502, %506 : vector<2x32xf32>
    %508 = arith.addf %507, %394 : vector<2x32xf32>
    %cst_115 = arith.constant dense<0.000000e+00> : vector<2x64xf32>
    %509 = tpu.matmul %508, %4, %cst_115 {dimension_numbers = #tpu.dot_dimension_numbers<[1], [0], [0], [1], [0, 0, 1, 1], [], []>} : vector<2x32xf32>, vector<32x64xf32>, vector<2x64xf32> -> vector<2x64xf32>
    %510 = vector.broadcast %5 : vector<1x64xf32> to vector<2x64xf32>
    %511 = arith.addf %509, %510 : vector<2x64xf32>
    %cst_116 = arith.constant 1.000000e+00 : f32
    %512 = vector.broadcast %cst_116 : f32 to vector<2x64xf32>
    %513 = arith.subf %511, %512 : vector<2x64xf32>
    %514 = arith.negf %513 : vector<2x64xf32>
    %515 = math.exp %514 : vector<2x64xf32>
    %cst_117 = arith.constant 1.000000e+00 : f32
    %516 = vector.broadcast %cst_117 : f32 to vector<2x64xf32>
    %517 = arith.addf %516, %515 : vector<2x64xf32>
    %518 = arith.divf %516, %517 : vector<2x64xf32>
    %519 = arith.mulf %511, %518 : vector<2x64xf32>
    %cst_118 = arith.constant dense<0.000000e+00> : vector<2x32xf32>
    %520 = tpu.matmul %519, %6, %cst_118 {dimension_numbers = #tpu.dot_dimension_numbers<[1], [0], [0], [1], [0, 0, 1, 1], [], []>} : vector<2x64xf32>, vector<64x32xf32>, vector<2x32xf32> -> vector<2x32xf32>
    %521 = arith.addf %508, %520 : vector<2x32xf32>
    %522 = vector.broadcast %7 : vector<1x32xf32> to vector<2x32xf32>
    %523 = arith.addf %521, %522 : vector<2x32xf32>
    %524 = arith.mulf %523, %523 : vector<2x32xf32>
    %cst_119 = arith.constant dense<0.000000e+00> : vector<2xf32>
    %525 = vector.multi_reduction <add>, %524, %cst_119 [1] : vector<2x32xf32> to vector<2xf32>
    %526 = vector.shape_cast %525 : vector<2xf32> to vector<2x1xf32>
    %cst_120 = arith.constant 3.200000e+01 : f32
    %527 = vector.broadcast %cst_120 : f32 to vector<2x1xf32>
    %528 = arith.divf %526, %527 : vector<2x1xf32>
    %529 = vector.broadcast %0 : f32 to vector<2x1xf32>
    %530 = arith.addf %528, %529 : vector<2x1xf32>
    %531 = math.rsqrt %530 : vector<2x1xf32>
    %532 = vector.broadcast %531 : vector<2x1xf32> to vector<2x32xf32>
    %533 = arith.mulf %523, %532 : vector<2x32xf32>
    %534 = vector.extract_strided_slice %9 {offsets = [6, 0, 0], sizes = [1, 2, 32], strides = [1, 1, 1]} : vector<8x2x32xf32> to vector<1x2x32xf32>
    %535 = vector.shape_cast %534 : vector<1x2x32xf32> to vector<2x32xf32>
    %536 = vector.extract_strided_slice %13 {offsets = [6, 0, 0], sizes = [1, 2, 128], strides = [1, 1, 1]} : vector<8x2x128xf32> to vector<1x2x128xf32>
    %537 = vector.shape_cast %536 : vector<1x2x128xf32> to vector<2x128xf32>
    %cst_121 = arith.constant dense<0.000000e+00> : vector<2x128xf32>
    %538 = tpu.matmul %461, %2, %cst_121 {dimension_numbers = #tpu.dot_dimension_numbers<[1], [0], [0], [1], [0, 0, 1, 1], [], []>} : vector<2x32xf32>, vector<32x128xf32>, vector<2x128xf32> -> vector<2x128xf32>
    %539 = arith.addf %537, %538 : vector<2x128xf32>
    %540 = arith.negf %539 : vector<2x128xf32>
    %541 = math.exp %540 : vector<2x128xf32>
    %cst_122 = arith.constant 1.000000e+00 : f32
    %542 = vector.broadcast %cst_122 : f32 to vector<2x128xf32>
    %543 = arith.addf %542, %541 : vector<2x128xf32>
    %544 = arith.divf %542, %543 : vector<2x128xf32>
    %545 = vector.extract_strided_slice %539 {offsets = [0, 64], sizes = [2, 32], strides = [1, 1]} : vector<2x128xf32> to vector<2x32xf32>
    %546 = math.tanh %545 : vector<2x32xf32>
    %547 = vector.extract_strided_slice %544 {offsets = [0, 0], sizes = [2, 32], strides = [1, 1]} : vector<2x128xf32> to vector<2x32xf32>
    %548 = vector.extract_strided_slice %544 {offsets = [0, 32], sizes = [2, 32], strides = [1, 1]} : vector<2x128xf32> to vector<2x32xf32>
    %549 = vector.extract_strided_slice %544 {offsets = [0, 96], sizes = [2, 32], strides = [1, 1]} : vector<2x128xf32> to vector<2x32xf32>
    %550 = arith.mulf %548, %459 : vector<2x32xf32>
    %551 = arith.mulf %547, %546 : vector<2x32xf32>
    %552 = arith.addf %550, %551 : vector<2x32xf32>
    %553 = math.tanh %552 : vector<2x32xf32>
    %554 = arith.mulf %549, %553 : vector<2x32xf32>
    %555 = arith.addf %554, %535 : vector<2x32xf32>
    %cst_123 = arith.constant dense<0.000000e+00> : vector<2x64xf32>
    %556 = tpu.matmul %555, %4, %cst_123 {dimension_numbers = #tpu.dot_dimension_numbers<[1], [0], [0], [1], [0, 0, 1, 1], [], []>} : vector<2x32xf32>, vector<32x64xf32>, vector<2x64xf32> -> vector<2x64xf32>
    %557 = vector.broadcast %5 : vector<1x64xf32> to vector<2x64xf32>
    %558 = arith.addf %556, %557 : vector<2x64xf32>
    %cst_124 = arith.constant 1.000000e+00 : f32
    %559 = vector.broadcast %cst_124 : f32 to vector<2x64xf32>
    %560 = arith.subf %558, %559 : vector<2x64xf32>
    %561 = arith.negf %560 : vector<2x64xf32>
    %562 = math.exp %561 : vector<2x64xf32>
    %cst_125 = arith.constant 1.000000e+00 : f32
    %563 = vector.broadcast %cst_125 : f32 to vector<2x64xf32>
    %564 = arith.addf %563, %562 : vector<2x64xf32>
    %565 = arith.divf %563, %564 : vector<2x64xf32>
    %566 = arith.mulf %558, %565 : vector<2x64xf32>
    %cst_126 = arith.constant dense<0.000000e+00> : vector<2x32xf32>
    %567 = tpu.matmul %566, %6, %cst_126 {dimension_numbers = #tpu.dot_dimension_numbers<[1], [0], [0], [1], [0, 0, 1, 1], [], []>} : vector<2x64xf32>, vector<64x32xf32>, vector<2x32xf32> -> vector<2x32xf32>
    %568 = arith.addf %555, %567 : vector<2x32xf32>
    %569 = vector.broadcast %7 : vector<1x32xf32> to vector<2x32xf32>
    %570 = arith.addf %568, %569 : vector<2x32xf32>
    %571 = arith.mulf %570, %570 : vector<2x32xf32>
    %cst_127 = arith.constant dense<0.000000e+00> : vector<2xf32>
    %572 = vector.multi_reduction <add>, %571, %cst_127 [1] : vector<2x32xf32> to vector<2xf32>
    %573 = vector.shape_cast %572 : vector<2xf32> to vector<2x1xf32>
    %cst_128 = arith.constant 3.200000e+01 : f32
    %574 = vector.broadcast %cst_128 : f32 to vector<2x1xf32>
    %575 = arith.divf %573, %574 : vector<2x1xf32>
    %576 = vector.broadcast %0 : f32 to vector<2x1xf32>
    %577 = arith.addf %575, %576 : vector<2x1xf32>
    %578 = math.rsqrt %577 : vector<2x1xf32>
    %579 = vector.broadcast %578 : vector<2x1xf32> to vector<2x32xf32>
    %580 = arith.mulf %570, %579 : vector<2x32xf32>
    %cst_129 = arith.constant dense<0.000000e+00> : vector<2x128xf32>
    %581 = tpu.matmul %487, %1, %cst_129 {dimension_numbers = #tpu.dot_dimension_numbers<[1], [0], [0], [1], [0, 0, 1, 1], [], []>} : vector<2x32xf32>, vector<32x128xf32>, vector<2x128xf32> -> vector<2x128xf32>
    %582 = vector.broadcast %3 : vector<1x128xf32> to vector<2x128xf32>
    %583 = arith.addf %581, %582 : vector<2x128xf32>
    %cst_130 = arith.constant dense<0.000000e+00> : vector<2x128xf32>
    %584 = tpu.matmul %507, %2, %cst_130 {dimension_numbers = #tpu.dot_dimension_numbers<[1], [0], [0], [1], [0, 0, 1, 1], [], []>} : vector<2x32xf32>, vector<32x128xf32>, vector<2x128xf32> -> vector<2x128xf32>
    %585 = arith.addf %583, %584 : vector<2x128xf32>
    %586 = arith.negf %585 : vector<2x128xf32>
    %587 = math.exp %586 : vector<2x128xf32>
    %cst_131 = arith.constant 1.000000e+00 : f32
    %588 = vector.broadcast %cst_131 : f32 to vector<2x128xf32>
    %589 = arith.addf %588, %587 : vector<2x128xf32>
    %590 = arith.divf %588, %589 : vector<2x128xf32>
    %591 = vector.extract_strided_slice %585 {offsets = [0, 64], sizes = [2, 32], strides = [1, 1]} : vector<2x128xf32> to vector<2x32xf32>
    %592 = math.tanh %591 : vector<2x32xf32>
    %593 = vector.extract_strided_slice %590 {offsets = [0, 0], sizes = [2, 32], strides = [1, 1]} : vector<2x128xf32> to vector<2x32xf32>
    %594 = vector.extract_strided_slice %590 {offsets = [0, 32], sizes = [2, 32], strides = [1, 1]} : vector<2x128xf32> to vector<2x32xf32>
    %595 = vector.extract_strided_slice %590 {offsets = [0, 96], sizes = [2, 32], strides = [1, 1]} : vector<2x128xf32> to vector<2x32xf32>
    %596 = arith.mulf %594, %505 : vector<2x32xf32>
    %597 = arith.mulf %593, %592 : vector<2x32xf32>
    %598 = arith.addf %596, %597 : vector<2x32xf32>
    %599 = math.tanh %598 : vector<2x32xf32>
    %600 = arith.mulf %595, %599 : vector<2x32xf32>
    %601 = arith.addf %600, %487 : vector<2x32xf32>
    %cst_132 = arith.constant dense<0.000000e+00> : vector<2x64xf32>
    %602 = tpu.matmul %601, %4, %cst_132 {dimension_numbers = #tpu.dot_dimension_numbers<[1], [0], [0], [1], [0, 0, 1, 1], [], []>} : vector<2x32xf32>, vector<32x64xf32>, vector<2x64xf32> -> vector<2x64xf32>
    %603 = vector.broadcast %5 : vector<1x64xf32> to vector<2x64xf32>
    %604 = arith.addf %602, %603 : vector<2x64xf32>
    %cst_133 = arith.constant 1.000000e+00 : f32
    %605 = vector.broadcast %cst_133 : f32 to vector<2x64xf32>
    %606 = arith.subf %604, %605 : vector<2x64xf32>
    %607 = arith.negf %606 : vector<2x64xf32>
    %608 = math.exp %607 : vector<2x64xf32>
    %cst_134 = arith.constant 1.000000e+00 : f32
    %609 = vector.broadcast %cst_134 : f32 to vector<2x64xf32>
    %610 = arith.addf %609, %608 : vector<2x64xf32>
    %611 = arith.divf %609, %610 : vector<2x64xf32>
    %612 = arith.mulf %604, %611 : vector<2x64xf32>
    %cst_135 = arith.constant dense<0.000000e+00> : vector<2x32xf32>
    %613 = tpu.matmul %612, %6, %cst_135 {dimension_numbers = #tpu.dot_dimension_numbers<[1], [0], [0], [1], [0, 0, 1, 1], [], []>} : vector<2x64xf32>, vector<64x32xf32>, vector<2x32xf32> -> vector<2x32xf32>
    %614 = arith.addf %601, %613 : vector<2x32xf32>
    %615 = vector.broadcast %7 : vector<1x32xf32> to vector<2x32xf32>
    %616 = arith.addf %614, %615 : vector<2x32xf32>
    %617 = arith.mulf %616, %616 : vector<2x32xf32>
    %cst_136 = arith.constant dense<0.000000e+00> : vector<2xf32>
    %618 = vector.multi_reduction <add>, %617, %cst_136 [1] : vector<2x32xf32> to vector<2xf32>
    %619 = vector.shape_cast %618 : vector<2xf32> to vector<2x1xf32>
    %cst_137 = arith.constant 3.200000e+01 : f32
    %620 = vector.broadcast %cst_137 : f32 to vector<2x1xf32>
    %621 = arith.divf %619, %620 : vector<2x1xf32>
    %622 = vector.broadcast %0 : f32 to vector<2x1xf32>
    %623 = arith.addf %621, %622 : vector<2x1xf32>
    %624 = math.rsqrt %623 : vector<2x1xf32>
    %625 = vector.broadcast %624 : vector<2x1xf32> to vector<2x32xf32>
    %626 = arith.mulf %616, %625 : vector<2x32xf32>
    %627 = vector.extract_strided_slice %9 {offsets = [7, 0, 0], sizes = [1, 2, 32], strides = [1, 1, 1]} : vector<8x2x32xf32> to vector<1x2x32xf32>
    %628 = vector.shape_cast %627 : vector<1x2x32xf32> to vector<2x32xf32>
    %629 = vector.extract_strided_slice %13 {offsets = [7, 0, 0], sizes = [1, 2, 128], strides = [1, 1, 1]} : vector<8x2x128xf32> to vector<1x2x128xf32>
    %630 = vector.shape_cast %629 : vector<1x2x128xf32> to vector<2x128xf32>
    %cst_138 = arith.constant dense<0.000000e+00> : vector<2x128xf32>
    %631 = tpu.matmul %554, %2, %cst_138 {dimension_numbers = #tpu.dot_dimension_numbers<[1], [0], [0], [1], [0, 0, 1, 1], [], []>} : vector<2x32xf32>, vector<32x128xf32>, vector<2x128xf32> -> vector<2x128xf32>
    %632 = arith.addf %630, %631 : vector<2x128xf32>
    %633 = arith.negf %632 : vector<2x128xf32>
    %634 = math.exp %633 : vector<2x128xf32>
    %cst_139 = arith.constant 1.000000e+00 : f32
    %635 = vector.broadcast %cst_139 : f32 to vector<2x128xf32>
    %636 = arith.addf %635, %634 : vector<2x128xf32>
    %637 = arith.divf %635, %636 : vector<2x128xf32>
    %638 = vector.extract_strided_slice %632 {offsets = [0, 64], sizes = [2, 32], strides = [1, 1]} : vector<2x128xf32> to vector<2x32xf32>
    %639 = math.tanh %638 : vector<2x32xf32>
    %640 = vector.extract_strided_slice %637 {offsets = [0, 0], sizes = [2, 32], strides = [1, 1]} : vector<2x128xf32> to vector<2x32xf32>
    %641 = vector.extract_strided_slice %637 {offsets = [0, 32], sizes = [2, 32], strides = [1, 1]} : vector<2x128xf32> to vector<2x32xf32>
    %642 = vector.extract_strided_slice %637 {offsets = [0, 96], sizes = [2, 32], strides = [1, 1]} : vector<2x128xf32> to vector<2x32xf32>
    %643 = arith.mulf %641, %552 : vector<2x32xf32>
    %644 = arith.mulf %640, %639 : vector<2x32xf32>
    %645 = arith.addf %643, %644 : vector<2x32xf32>
    %646 = math.tanh %645 : vector<2x32xf32>
    %647 = arith.mulf %642, %646 : vector<2x32xf32>
    %648 = arith.addf %647, %628 : vector<2x32xf32>
    %cst_140 = arith.constant dense<0.000000e+00> : vector<2x64xf32>
    %649 = tpu.matmul %648, %4, %cst_140 {dimension_numbers = #tpu.dot_dimension_numbers<[1], [0], [0], [1], [0, 0, 1, 1], [], []>} : vector<2x32xf32>, vector<32x64xf32>, vector<2x64xf32> -> vector<2x64xf32>
    %650 = vector.broadcast %5 : vector<1x64xf32> to vector<2x64xf32>
    %651 = arith.addf %649, %650 : vector<2x64xf32>
    %cst_141 = arith.constant 1.000000e+00 : f32
    %652 = vector.broadcast %cst_141 : f32 to vector<2x64xf32>
    %653 = arith.subf %651, %652 : vector<2x64xf32>
    %654 = arith.negf %653 : vector<2x64xf32>
    %655 = math.exp %654 : vector<2x64xf32>
    %cst_142 = arith.constant 1.000000e+00 : f32
    %656 = vector.broadcast %cst_142 : f32 to vector<2x64xf32>
    %657 = arith.addf %656, %655 : vector<2x64xf32>
    %658 = arith.divf %656, %657 : vector<2x64xf32>
    %659 = arith.mulf %651, %658 : vector<2x64xf32>
    %cst_143 = arith.constant dense<0.000000e+00> : vector<2x32xf32>
    %660 = tpu.matmul %659, %6, %cst_143 {dimension_numbers = #tpu.dot_dimension_numbers<[1], [0], [0], [1], [0, 0, 1, 1], [], []>} : vector<2x64xf32>, vector<64x32xf32>, vector<2x32xf32> -> vector<2x32xf32>
    %661 = arith.addf %648, %660 : vector<2x32xf32>
    %662 = vector.broadcast %7 : vector<1x32xf32> to vector<2x32xf32>
    %663 = arith.addf %661, %662 : vector<2x32xf32>
    %664 = arith.mulf %663, %663 : vector<2x32xf32>
    %cst_144 = arith.constant dense<0.000000e+00> : vector<2xf32>
    %665 = vector.multi_reduction <add>, %664, %cst_144 [1] : vector<2x32xf32> to vector<2xf32>
    %666 = vector.shape_cast %665 : vector<2xf32> to vector<2x1xf32>
    %cst_145 = arith.constant 3.200000e+01 : f32
    %667 = vector.broadcast %cst_145 : f32 to vector<2x1xf32>
    %668 = arith.divf %666, %667 : vector<2x1xf32>
    %669 = vector.broadcast %0 : f32 to vector<2x1xf32>
    %670 = arith.addf %668, %669 : vector<2x1xf32>
    %671 = math.rsqrt %670 : vector<2x1xf32>
    %672 = vector.broadcast %671 : vector<2x1xf32> to vector<2x32xf32>
    %673 = arith.mulf %663, %672 : vector<2x32xf32>
    %cst_146 = arith.constant dense<0.000000e+00> : vector<2x128xf32>
    %674 = tpu.matmul %580, %1, %cst_146 {dimension_numbers = #tpu.dot_dimension_numbers<[1], [0], [0], [1], [0, 0, 1, 1], [], []>} : vector<2x32xf32>, vector<32x128xf32>, vector<2x128xf32> -> vector<2x128xf32>
    %675 = vector.broadcast %3 : vector<1x128xf32> to vector<2x128xf32>
    %676 = arith.addf %674, %675 : vector<2x128xf32>
    %cst_147 = arith.constant dense<0.000000e+00> : vector<2x128xf32>
    %677 = tpu.matmul %600, %2, %cst_147 {dimension_numbers = #tpu.dot_dimension_numbers<[1], [0], [0], [1], [0, 0, 1, 1], [], []>} : vector<2x32xf32>, vector<32x128xf32>, vector<2x128xf32> -> vector<2x128xf32>
    %678 = arith.addf %676, %677 : vector<2x128xf32>
    %679 = arith.negf %678 : vector<2x128xf32>
    %680 = math.exp %679 : vector<2x128xf32>
    %cst_148 = arith.constant 1.000000e+00 : f32
    %681 = vector.broadcast %cst_148 : f32 to vector<2x128xf32>
    %682 = arith.addf %681, %680 : vector<2x128xf32>
    %683 = arith.divf %681, %682 : vector<2x128xf32>
    %684 = vector.extract_strided_slice %678 {offsets = [0, 64], sizes = [2, 32], strides = [1, 1]} : vector<2x128xf32> to vector<2x32xf32>
    %685 = math.tanh %684 : vector<2x32xf32>
    %686 = vector.extract_strided_slice %683 {offsets = [0, 0], sizes = [2, 32], strides = [1, 1]} : vector<2x128xf32> to vector<2x32xf32>
    %687 = vector.extract_strided_slice %683 {offsets = [0, 32], sizes = [2, 32], strides = [1, 1]} : vector<2x128xf32> to vector<2x32xf32>
    %688 = vector.extract_strided_slice %683 {offsets = [0, 96], sizes = [2, 32], strides = [1, 1]} : vector<2x128xf32> to vector<2x32xf32>
    %689 = arith.mulf %687, %598 : vector<2x32xf32>
    %690 = arith.mulf %686, %685 : vector<2x32xf32>
    %691 = arith.addf %689, %690 : vector<2x32xf32>
    %692 = math.tanh %691 : vector<2x32xf32>
    %693 = arith.mulf %688, %692 : vector<2x32xf32>
    %694 = arith.addf %693, %580 : vector<2x32xf32>
    %cst_149 = arith.constant dense<0.000000e+00> : vector<2x64xf32>
    %695 = tpu.matmul %694, %4, %cst_149 {dimension_numbers = #tpu.dot_dimension_numbers<[1], [0], [0], [1], [0, 0, 1, 1], [], []>} : vector<2x32xf32>, vector<32x64xf32>, vector<2x64xf32> -> vector<2x64xf32>
    %696 = vector.broadcast %5 : vector<1x64xf32> to vector<2x64xf32>
    %697 = arith.addf %695, %696 : vector<2x64xf32>
    %cst_150 = arith.constant 1.000000e+00 : f32
    %698 = vector.broadcast %cst_150 : f32 to vector<2x64xf32>
    %699 = arith.subf %697, %698 : vector<2x64xf32>
    %700 = arith.negf %699 : vector<2x64xf32>
    %701 = math.exp %700 : vector<2x64xf32>
    %cst_151 = arith.constant 1.000000e+00 : f32
    %702 = vector.broadcast %cst_151 : f32 to vector<2x64xf32>
    %703 = arith.addf %702, %701 : vector<2x64xf32>
    %704 = arith.divf %702, %703 : vector<2x64xf32>
    %705 = arith.mulf %697, %704 : vector<2x64xf32>
    %cst_152 = arith.constant dense<0.000000e+00> : vector<2x32xf32>
    %706 = tpu.matmul %705, %6, %cst_152 {dimension_numbers = #tpu.dot_dimension_numbers<[1], [0], [0], [1], [0, 0, 1, 1], [], []>} : vector<2x64xf32>, vector<64x32xf32>, vector<2x32xf32> -> vector<2x32xf32>
    %707 = arith.addf %694, %706 : vector<2x32xf32>
    %708 = vector.broadcast %7 : vector<1x32xf32> to vector<2x32xf32>
    %709 = arith.addf %707, %708 : vector<2x32xf32>
    %710 = arith.mulf %709, %709 : vector<2x32xf32>
    %cst_153 = arith.constant dense<0.000000e+00> : vector<2xf32>
    %711 = vector.multi_reduction <add>, %710, %cst_153 [1] : vector<2x32xf32> to vector<2xf32>
    %712 = vector.shape_cast %711 : vector<2xf32> to vector<2x1xf32>
    %cst_154 = arith.constant 3.200000e+01 : f32
    %713 = vector.broadcast %cst_154 : f32 to vector<2x1xf32>
    %714 = arith.divf %712, %713 : vector<2x1xf32>
    %715 = vector.broadcast %0 : f32 to vector<2x1xf32>
    %716 = arith.addf %714, %715 : vector<2x1xf32>
    %717 = math.rsqrt %716 : vector<2x1xf32>
    %718 = vector.broadcast %717 : vector<2x1xf32> to vector<2x32xf32>
    %719 = arith.mulf %709, %718 : vector<2x32xf32>
    %cst_155 = arith.constant dense<0.000000e+00> : vector<2x128xf32>
    %720 = tpu.matmul %673, %1, %cst_155 {dimension_numbers = #tpu.dot_dimension_numbers<[1], [0], [0], [1], [0, 0, 1, 1], [], []>} : vector<2x32xf32>, vector<32x128xf32>, vector<2x128xf32> -> vector<2x128xf32>
    %721 = vector.broadcast %3 : vector<1x128xf32> to vector<2x128xf32>
    %722 = arith.addf %720, %721 : vector<2x128xf32>
    %cst_156 = arith.constant dense<0.000000e+00> : vector<2x128xf32>
    %723 = tpu.matmul %693, %2, %cst_156 {dimension_numbers = #tpu.dot_dimension_numbers<[1], [0], [0], [1], [0, 0, 1, 1], [], []>} : vector<2x32xf32>, vector<32x128xf32>, vector<2x128xf32> -> vector<2x128xf32>
    %724 = arith.addf %722, %723 : vector<2x128xf32>
    %725 = arith.negf %724 : vector<2x128xf32>
    %726 = math.exp %725 : vector<2x128xf32>
    %cst_157 = arith.constant 1.000000e+00 : f32
    %727 = vector.broadcast %cst_157 : f32 to vector<2x128xf32>
    %728 = arith.addf %727, %726 : vector<2x128xf32>
    %729 = arith.divf %727, %728 : vector<2x128xf32>
    %730 = vector.extract_strided_slice %724 {offsets = [0, 64], sizes = [2, 32], strides = [1, 1]} : vector<2x128xf32> to vector<2x32xf32>
    %731 = math.tanh %730 : vector<2x32xf32>
    %732 = vector.extract_strided_slice %729 {offsets = [0, 0], sizes = [2, 32], strides = [1, 1]} : vector<2x128xf32> to vector<2x32xf32>
    %733 = vector.extract_strided_slice %729 {offsets = [0, 32], sizes = [2, 32], strides = [1, 1]} : vector<2x128xf32> to vector<2x32xf32>
    %734 = vector.extract_strided_slice %729 {offsets = [0, 96], sizes = [2, 32], strides = [1, 1]} : vector<2x128xf32> to vector<2x32xf32>
    %735 = arith.mulf %733, %691 : vector<2x32xf32>
    %736 = arith.mulf %732, %731 : vector<2x32xf32>
    %737 = arith.addf %735, %736 : vector<2x32xf32>
    %738 = math.tanh %737 : vector<2x32xf32>
    %739 = arith.mulf %734, %738 : vector<2x32xf32>
    %740 = arith.addf %739, %673 : vector<2x32xf32>
    %cst_158 = arith.constant dense<0.000000e+00> : vector<2x64xf32>
    %741 = tpu.matmul %740, %4, %cst_158 {dimension_numbers = #tpu.dot_dimension_numbers<[1], [0], [0], [1], [0, 0, 1, 1], [], []>} : vector<2x32xf32>, vector<32x64xf32>, vector<2x64xf32> -> vector<2x64xf32>
    %742 = vector.broadcast %5 : vector<1x64xf32> to vector<2x64xf32>
    %743 = arith.addf %741, %742 : vector<2x64xf32>
    %cst_159 = arith.constant 1.000000e+00 : f32
    %744 = vector.broadcast %cst_159 : f32 to vector<2x64xf32>
    %745 = arith.subf %743, %744 : vector<2x64xf32>
    %746 = arith.negf %745 : vector<2x64xf32>
    %747 = math.exp %746 : vector<2x64xf32>
    %cst_160 = arith.constant 1.000000e+00 : f32
    %748 = vector.broadcast %cst_160 : f32 to vector<2x64xf32>
    %749 = arith.addf %748, %747 : vector<2x64xf32>
    %750 = arith.divf %748, %749 : vector<2x64xf32>
    %751 = arith.mulf %743, %750 : vector<2x64xf32>
    %cst_161 = arith.constant dense<0.000000e+00> : vector<2x32xf32>
    %752 = tpu.matmul %751, %6, %cst_161 {dimension_numbers = #tpu.dot_dimension_numbers<[1], [0], [0], [1], [0, 0, 1, 1], [], []>} : vector<2x64xf32>, vector<64x32xf32>, vector<2x32xf32> -> vector<2x32xf32>
    %753 = arith.addf %740, %752 : vector<2x32xf32>
    %754 = vector.broadcast %7 : vector<1x32xf32> to vector<2x32xf32>
    %755 = arith.addf %753, %754 : vector<2x32xf32>
    %756 = arith.mulf %755, %755 : vector<2x32xf32>
    %cst_162 = arith.constant dense<0.000000e+00> : vector<2xf32>
    %757 = vector.multi_reduction <add>, %756, %cst_162 [1] : vector<2x32xf32> to vector<2xf32>
    %758 = vector.shape_cast %757 : vector<2xf32> to vector<2x1xf32>
    %cst_163 = arith.constant 3.200000e+01 : f32
    %759 = vector.broadcast %cst_163 : f32 to vector<2x1xf32>
    %760 = arith.divf %758, %759 : vector<2x1xf32>
    %761 = vector.broadcast %0 : f32 to vector<2x1xf32>
    %762 = arith.addf %760, %761 : vector<2x1xf32>
    %763 = math.rsqrt %762 : vector<2x1xf32>
    %764 = vector.broadcast %763 : vector<2x1xf32> to vector<2x32xf32>
    %765 = arith.mulf %755, %764 : vector<2x32xf32>
    %766 = tpu.concatenate %161, %254, %347, %440, %533, %626, %719, %765 in 0 : vector<2x32xf32>, vector<2x32xf32>, vector<2x32xf32>, vector<2x32xf32>, vector<2x32xf32>, vector<2x32xf32>, vector<2x32xf32>, vector<2x32xf32> -> vector<16x32xf32>
    %c0_164 = arith.constant 0 : index
    %c0_165 = arith.constant 0 : index
    %767 = vector.load %arg11[%c0_164, %c0_165] : memref<16x32xf32, #tpu.memory_space<vmem>>, vector<16x32xf32>
    tpu.vector_store %arg11[%c0_164, %c0_165], %766 {strides = array<i32>} : memref<16x32xf32, #tpu.memory_space<vmem>>, vector<16x32xf32>,
    %c0_166 = arith.constant 0 : index
    %c0_167 = arith.constant 0 : index
    %c0_168 = arith.constant 0 : index
    %768 = vector.load %arg12[%c0_166, %c0_167, %c0_168] : memref<2x2x32xf32, #tpu.memory_space<vmem>>, vector<1x2x32xf32>
    %769 = vector.shape_cast %768 : vector<1x2x32xf32> to vector<2x32xf32>
    %770 = vector.shape_cast %647 : vector<2x32xf32> to vector<1x2x32xf32>
    tpu.vector_store %arg12[%c0_166, %c0_167, %c0_168], %770 {strides = array<i32>} : memref<2x2x32xf32, #tpu.memory_space<vmem>>, vector<1x2x32xf32>,
    %c0_169 = arith.constant 0 : index
    %c0_170 = arith.constant 0 : index
    %c0_171 = arith.constant 0 : index
    %771 = vector.load %arg13[%c0_169, %c0_170, %c0_171] : memref<2x2x32xf32, #tpu.memory_space<vmem>>, vector<1x2x32xf32>
    %772 = vector.shape_cast %771 : vector<1x2x32xf32> to vector<2x32xf32>
    %773 = vector.shape_cast %645 : vector<2x32xf32> to vector<1x2x32xf32>
    tpu.vector_store %arg13[%c0_169, %c0_170, %c0_171], %773 {strides = array<i32>} : memref<2x2x32xf32, #tpu.memory_space<vmem>>, vector<1x2x32xf32>,
    %c1_172 = arith.constant 1 : index
    %c0_173 = arith.constant 0 : index
    %c0_174 = arith.constant 0 : index
    %774 = vector.load %arg12[%c1_172, %c0_173, %c0_174] : memref<2x2x32xf32, #tpu.memory_space<vmem>>, vector<1x2x32xf32>
    %775 = vector.shape_cast %774 : vector<1x2x32xf32> to vector<2x32xf32>
    %776 = vector.shape_cast %739 : vector<2x32xf32> to vector<1x2x32xf32>
    tpu.vector_store %arg12[%c1_172, %c0_173, %c0_174], %776 {strides = array<i32>} : memref<2x2x32xf32, #tpu.memory_space<vmem>>, vector<1x2x32xf32>,
    %c1_175 = arith.constant 1 : index
    %c0_176 = arith.constant 0 : index
    %c0_177 = arith.constant 0 : index
    %777 = vector.load %arg13[%c1_175, %c0_176, %c0_177] : memref<2x2x32xf32, #tpu.memory_space<vmem>>, vector<1x2x32xf32>
    %778 = vector.shape_cast %777 : vector<1x2x32xf32> to vector<2x32xf32>
    %779 = vector.shape_cast %737 : vector<2x32xf32> to vector<1x2x32xf32>
    tpu.vector_store %arg13[%c1_175, %c0_176, %c0_177], %779 {strides = array<i32>} : memref<2x2x32xf32, #tpu.memory_space<vmem>>, vector<1x2x32xf32>,
    return
  }
}

</mosaic_0001>

<bundles_post_ra>
// kernel: tpu_custom_call.1
= control target key start
LH: loop header
LB: loop body
LE: loop exit
PB: predicated region body
PF: predicated region fallthrough
CT: control target
= control target key end

     0   :  { %20 = vsyncpa [#allocation4], 0  ;;  %s9178_s0 = inlined_call_operand.hbm [shape: f32[16,32], index: 0, kind: input, shape index: {}]   ;;  %s9179_s1 = inlined_call_operand.hbm [shape: f32[2,2,32], index: 1, kind: input, shape index: {}]   ;;  %s9180_s2 = inlined_call_operand.hbm [shape: f32[2,2,32], index: 2, kind: input, shape index: {}]   ;;  %s9181_s3 = inlined_call_operand.vmem [shape: f32[32,128], index: 3, kind: input, shape index: {}]   ;;  %s9182_s4 = inlined_call_operand.vmem [shape: f32[32,128], index: 4, kind: input, shape index: {}]   ;;  %s9183_s5 = inlined_call_operand.vmem [shape: f32[1,128], index: 5, kind: input, shape index: {}]   ;;  %s9184_s6 = inlined_call_operand.vmem [shape: f32[32,64], index: 6, kind: input, shape index: {}]   ;;  %s9185_s7 = inlined_call_operand.vmem [shape: f32[1,64], index: 7, kind: input, shape index: {}]   ;;  %s9186_s8 = inlined_call_operand.vmem [shape: f32[64,32], index: 8, kind: input, shape index: {}]   ;;  %s9187_s9 = inlined_call_operand.vmem [shape: f32[1,32], index: 9, kind: input, shape index: {}]   ;;  %s9188_s10 = inlined_call_operand.<no memory space> [shape: f32[1,1], index: 10, kind: input, shape index: {}]   ;;  %s9189_s11 = inlined_call_operand.hbm [shape: f32[16,32], index: 11, kind: output, shape index: {0}]   ;;  %s9190_s12 = inlined_call_operand.hbm [shape: f32[2,2,32], index: 12, kind: output, shape index: {1}]   ;;  %s9191_s13 = inlined_call_operand.hbm [shape: f32[2,2,32], index: 13, kind: output, shape index: {2}]  }
   0x1   :  { %21 = vsyncpa [#allocation7], 0 }
   0x2   :  { %22 = vsyncpa [#allocation5], 0 }
   0x3   :  { %23 = vsyncpa [#allocation11], 0  ;;  %s7808_s25 = smov [#allocation6]   ;;  %s7668_s29 = scalar_lea.hbm %s9179_s1, 64 }
   0x4   :  { %s41_s26 = sshll.u32 %s7808_s25, 4  ;;  %p7669_p0 = scmp.ne.s32.totalorder %s9179_s1, %s7668_s29  ;;  %s42_s26 = int_to_ptr.vmem [resolvable:$true] %s41_s26 }
   0x5   :  { %p7672_p1 = scmp.lt.u32.totalorder %s7668_s29, %s9179_s1 }
   0x7   :  { %p7674_p2 = pnand %p7672_p1, %p7669_p0 }
   0x9   :  { %7677 = shalt.err (!%p7674_p2)
}
   0xa   :  { %s7678_s17 = scalar_lea.vmem %s42_s26, 64  ;;  %p7683_p4 = scmp.lt.s32.totalorder %s42_s26, %s42_s26 }
   0xb   :  { %p7679_p3 = scmp.ne.s32.totalorder %s42_s26, %s7678_s17  ;;  %p7684_p5 = scmp.lt.s32.totalorder %s7678_s17, %s7678_s17 }
   0xd   :  { %p7685_p6 = por %p7684_p5, %p7683_p4 }
   0xf   :  { %p7686_p7 = pnand %p7685_p6, %p7679_p3 }
  0x11   :  { %7689 = shalt.err (!%p7686_p7)
}
  0x12   :  { %s7809_s18 = smov 32   ;;  %s7810_s19 = smov 2  }
  0x13   :  { %47 = dma.hbm_to_vmem [thread:$0]  %s9179_s1, 64, %s42_s26, [#allocation7], %s7809_s18, %s7809_s18, %s7810_s19  }
  0x14   :  { %s7811_s22 = smov [#allocation3]   ;;  %s7690_s27 = scalar_lea.hbm %s9178_s0, 256 }
  0x15   :  { %s29_s23 = sshll.u32 %s7811_s22, 4  ;;  %p7691_p8 = scmp.ne.s32.totalorder %s9178_s0, %s7690_s27  ;;  %s30_s23 = int_to_ptr.vmem [resolvable:$true] %s29_s23 }
  0x16   :  { %p7694_p9 = scmp.lt.u32.totalorder %s7690_s27, %s9178_s0 }
  0x18   :  { %p7696_p10 = pnand %p7694_p9, %p7691_p8 }
  0x1a   :  { %7699 = shalt.err (!%p7696_p10)
}
  0x1b   :  { %s7700_s15 = scalar_lea.vmem %s30_s23, 256  ;;  %p7705_p12 = scmp.lt.s32.totalorder %s30_s23, %s30_s23 }
  0x1c   :  { %p7701_p11 = scmp.ne.s32.totalorder %s30_s23, %s7700_s15  ;;  %p7706_p13 = scmp.lt.s32.totalorder %s7700_s15, %s7700_s15 }
  0x1e   :  { %p7707_p0 = por %p7706_p13, %p7705_p12 }
  0x20   :  { %p7708_p1 = pnand %p7707_p0, %p7701_p11 }
  0x22   :  { %7711 = shalt.err (!%p7708_p1)
}
  0x23   :  { %s7812_s1 = smov 128   ;;  %s7813_s26 = smov 8  }
  0x24   :  { %35 = dma.hbm_to_vmem [thread:$0]  %s9178_s0, 256, %s30_s23, [#allocation4], %s7812_s1, %s7812_s1, %s7813_s26  }
  0x25   :  { %s7814_s20 = smov [#allocation8]   ;;  %s7712_s25 = scalar_lea.hbm %s9180_s2, 64 }
  0x26   :  { %s53_s21 = sshll.u32 %s7814_s20, 4  ;;  %p7713_p2 = scmp.ne.s32.totalorder %s9180_s2, %s7712_s25  ;;  %s54_s21 = int_to_ptr.vmem [resolvable:$true] %s53_s21 }
  0x27   :  { %p7716_p3 = scmp.lt.u32.totalorder %s7712_s25, %s9180_s2 }
  0x29   :  { %p7718_p4 = pnand %p7716_p3, %p7713_p2 }
  0x2b   :  { %7721 = shalt.err (!%p7718_p4)
}
  0x2c   :  { %s7722_s14 = scalar_lea.vmem %s54_s21, 64  ;;  %p7727_p6 = scmp.lt.s32.totalorder %s54_s21, %s54_s21 }
  0x2d   :  { %p7723_p5 = scmp.ne.s32.totalorder %s54_s21, %s7722_s14  ;;  %p7728_p7 = scmp.lt.s32.totalorder %s7722_s14, %s7722_s14 }
  0x2f   :  { %p7729_p8 = por %p7728_p7, %p7727_p6 }
  0x31   :  { %p7730_p9 = pnand %p7729_p8, %p7723_p5 }
  0x33   :  { %7733 = shalt.err (!%p7730_p9)
}
  0x34   :  { %59 = dma.hbm_to_vmem [thread:$0]  %s9180_s2, 64, %s54_s21, [#allocation7], %s7809_s18, %s7809_s18, %s7810_s19  }
  0x35   :  { %7800 = dma.done.wait [#allocation4], 256  }
  0x36   :  { %7801 = vsyncadd [#allocation4], 4294967040 }
  0x37   :  { %7802 = dma.done.wait [#allocation7], 128  }
  0x38   :  { %7803 = vsyncadd [#allocation7], 4294967168  ;;  %v7815_v0 = vmov 0.0|0.0   ;;  %vm7816_vm0 = vmmov 0   ;;  %v7817_v1 = vmov 0.0   ;;  %v86_v2 = vld [vmem:[%s9181_s3] sm:$0xff]  ;;  %v117_v19 = vlaneseq }
  0x39   :  { %6964 = vmatprep.subr.bf16.mxu1 %v7815_v0  ;;  %6220 = vmatprep.mubr.msk.f32.mxu1 %vm7816_vm0, %v7817_v1  ;;  %v87_v3 = vld [vmem:[%s9181_s3 + $0x8] sm:$0xff]  ;;  %v88_v4 = vld [vmem:[%s9181_s3 + $0x10] sm:$0xff]  ;;  %vm153_vm1 = vcmask 261120   ;;  %v89_v6 = vld [vmem:[%s9181_s3 + $0x18] sm:$0xff]  ;;  %v7818_v17 = vmov 1983009808  }
  0x3a   :  { %v7951_v5 = vpack.c.bf16 %v87_v3, %v86_v2  ;;  %v90_v7 = vld [vmem:[%s9182_s4] sm:$0xff]  ;;  %v91_v8 = vld [vmem:[%s9182_s4 + $0x8] sm:$0xff]  ;;  %v7962_v9 = vpack.c.bf16 %v89_v6, %v88_v4  ;;  %v92_v12 = vld [vmem:[%s9182_s4 + $0x10] sm:$0xff]  ;;  %v115_v18 = vunpack.c.l.s4 %v7818_v17  ;;  %v118_v21 = vshrl.u32 %v117_v19, 7  ;;  %s7819_s15 = smov 64   ;;  %s7820_s16 = smov 96  }
  0x3b   :  { %v7964_v10 = vpack.c.bf16 %v91_v8, %v90_v7  ;;  %v7966_v11 = vld [vmem:[#allocation3] sm:$0xff]  ;;  %v93_v13 = vld [vmem:[%s9182_s4 + $0x18] sm:$0xff]  ;;  %v110_v15 = vld [vmem:[#allocation3 + $0x8] sm:$0xff]  ;;  %vm492_vm2 = vcmask 523264   ;;  %vm606_vm3 = vcmask 254976   ;;  %vm5637_vm4 = vcmask 1041408  }
  0x3c   :  { %6957 = vmatprep.subr.bf16.mxu0 %v7951_v5  ;;  %6209 = vmatprep.mubr.msk.f32.mxu0 %vm153_vm1, %v7966_v11  ;;  %v7979_v14 = vpack.c.bf16 %v93_v13, %v92_v12  ;;  %v277_v16 = vld [vmem:[#allocation6] sm:$0x3]  ;;  %v116_v20 = vunpack.c.0.s8 %v115_v18  ;;  %v7996_v22 = vld [vmem:[%s9183_s5] ss:$0 sm:$0xff]  ;;  %v96_v45 = vld [vmem:[%s9184_s6 + $0x8] sm:$0xff]  ;;  %vm5641_vm5 = vcmask 1045504  }
  0x3d   :  { %6959 = vmatpush3.bf16.msra.mxu0 %v7951_v5  ;;  %6966 = vmatpush3.bf16.msra.mxu1 %v7964_v10  ;;  %v5746_v32 = vld.sshfl [vmem:[#allocation8] sm:$0x3 pattern:$0x76325410]  ;;  %v95_v44 = vld [vmem:[%s9184_s6] sm:$0xff]  ;;  %v98_v48 = vld [vmem:[%s9184_s6 + $0x18] sm:$0xff] }
  0x3e   :  { %6961 = vmatprep.subr.bf16.mxu0 %v7962_v9  ;;  %6967 = vmatprep.subr.bf16.mxu1 %v7815_v0  ;;  %v8000_v24 = vsub.s32 %v116_v20, %v118_v21  ;;  %v97_v46 = vld [vmem:[%s9184_s6 + $0x10] sm:$0xff]  ;;  %v8031_v47 = vpack.c.bf16 %v96_v45, %v95_v44  ;;  %v100_v59 = vld [vmem:[%s9186_s8] sm:$0xff]  ;;  %v101_v60 = vld [vmem:[%s9186_s8 + $0x8] sm:$0xff]  ;;  %vm5639_vm6 = vcmask 1043456   ;;  %s7823_s21 = smov [#allocation12]  }
  0x3f   :  { %v8037_v49 = vpack.c.bf16 %v98_v48, %v97_v46  ;;  %v8070_v61 = vpack.c.bf16 %v101_v60, %v100_v59  ;;  %v102_v62 = vld [vmem:[%s9186_s8 + $0x10] sm:$0xff]  ;;  %v103_v63 = vld [vmem:[%s9186_s8 + $0x18] sm:$0xff]  ;;  %v104_v3 = vld [vmem:[%s9186_s8 + $0x20] sm:$0xff]  ;;  %s5721_s22 = sshll.u32 %s7823_s21, 4  ;;  %s9140_s22 = int_to_ptr.vmem [resolvable:$true] %s5721_s22 }
  0x40   :  { %v8015_v39 = vrot.slane %v7966_v11, %v8000_v24  ;;  %v8080_v2 = vpack.c.bf16 %v103_v63, %v102_v62  ;;  %v105_v4 = vld [vmem:[%s9186_s8 + $0x28] sm:$0xff]  ;;  %v106_v7 = vld [vmem:[%s9186_s8 + $0x30] sm:$0xff]  ;;  %v107_v8 = vld [vmem:[%s9186_s8 + $0x38] sm:$0xff] }
  0x41   :  { %6963 = vmatpush3.bf16.msra.mxu0 %v7962_v9  ;;  %6969 = vmatpush3.bf16.msra.mxu1 %v7979_v14  ;;  %v8090_v6 = vpack.c.bf16 %v105_v4, %v104_v3  ;;  %v8100_v12 = vpack.c.bf16 %v107_v8, %v106_v7  ;;  %v8107_v13 = vld [vmem:[%s9185_s7] ss:$0 sm:$0xff]  ;;  %v8158_v7 = vstv %s9188_s10 }
  0x42   :  { %6970 = vmatprep.subr.bf16.mxu0 %v7815_v0  ;;  %6976 = vmatprep.subr.bf16.mxu1 %v7815_v0  ;;  %v128_v60 = vcombine.high %v8015_v39, %v8015_v39 }
  0x44   :  { %6210 = vmatmul.mubr.msk.f32.vlgmr.msra.gmra.mrb[0].mxu0 %vm153_vm1, %v110_v15  ;;  %6221 = vmatmul.mubr.msk.f32.vlgmr.msra.gmra.mrb[0].mxu1 %vm153_vm1, %v277_v16 }
  0x45   :  { %6231 = vmatprep.mubr.msk.f32.mxu0 %vm7816_vm0, %v7817_v1  ;;  %6250 = vmatprep.mubr.msk.f32.mxu1 %vm7816_vm0, %v7817_v1 }
  0x46   :  { %6972 = vmatpush3.bf16.msra.mxu0 %v8031_v47  ;;  %6978 = vmatpush3.bf16.msra.mxu1 %v8070_v61 }
  0x47   :  { %6973 = vmatprep.subr.bf16.mxu0 %v7815_v0  ;;  %6979 = vmatprep.subr.bf16.mxu1 %v7815_v0 }
  0x4a   :  { %6975 = vmatpush3.bf16.msra.mxu0 %v8037_v49  ;;  %6981 = vmatpush3.bf16.msra.mxu1 %v8080_v2 }
  0x4b   :  { %6988 = vmatprep.subr.bf16.mxu0 %v7815_v0  ;;  %6982 = vmatprep.subr.bf16.mxu1 %v7815_v0 }
  0x4e   :  { %6984 = vmatpush3.bf16.msra.mxu1 %v8090_v6 }
  0x4f   :  { %6985 = vmatprep.subr.bf16.mxu1 %v7815_v0 }
  0x52   :  { %6987 = vmatpush3.bf16.msra.mxu1 %v8100_v12 }
  0x53   :  { %7000 = vmatprep.subr.bf16.mxu1 %v7815_v0 }
 0x117   :  { %v7998_v23 = vpop.f32.mrb[0].mxu0  ;;  %v352_v25 = vpop.f32.mrb[0].mxu1 }
 0x118   :  { %v224_v26 = vpop.f32.mrb[1].mxu0  ;;  %v6222_v27 = vpop.f32.mrb[1].mxu1 }
 0x119   :  { %v8003_v28 = vadd.f32 %v7996_v22, %v224_v26 }
 0x11b   :  { %v8007_v29 = vrot.slane %v8003_v28, %v8000_v24 }
 0x11d   :  { %v356_v30 = vadd.f32 %v352_v25, %v8007_v29  ;;  %v250_v20 = vcombine.high %v8007_v29, %v8007_v29  ;;  %v5752_v29 = vld [vmem:[%s9187_s9] ss:$0 sm:$0xff] }
 0x11f   :  { %7438 = vtanh.f32 %v356_v30  ;;  %v5745_v33 = vmul.f32 -1.442695, %v356_v30 }
 0x121   :  { %7440 = vpow2.f32 %v5745_v33  ;;  %v589_v33 = vrot.slane %v5752_v29, %v8000_v24 }
 0x129   :  { %v7439_v31 = vpop.eup %7438 }
 0x12a   :  { %377 = vrot.lane.b32.xlu0 %v7439_v31, %s7819_s15 }
 0x12b   :  { %v7441_v34 = vpop.eup %7440 }
 0x12c   :  { %v360_v35 = vadd.f32 1.0, %v7441_v34 }
 0x12e   :  { %372 = vrot.lane.b32.xlu0 %v5746_v32, %s7809_s18  ;;  %7442 = vrcp.f32 %v360_v35 }
 0x132   :  { %392 = vrot.lane.b32.xlu0 %v8015_v39, %s7820_s16 }
 0x138   :  { %v7443_v36 = vpop.eup %7442 }
 0x19c   :  { %v378_v37 = vpop.permute.xlu0 %377 }
 0x19d   :  { %v380_v38 = vmul.f32 %v7443_v36, %v378_v37 }
 0x19f   :  { %382 = vrot.lane.b32.xlu1 %v380_v38, %s7809_s18 }
 0x1a0   :  { %v373_v40 = vpop.permute.xlu0 %372 }
 0x1a1   :  { %v375_v41 = vmul.f32 %v7443_v36, %v373_v40 }
 0x1a4   :  { %v393_v52 = vpop.permute.xlu0 %392 }
 0x211   :  { %v383_v42 = vpop.permute.xlu1 %382 }
 0x212   :  { %v8019_v43 = vadd.f32 %v383_v42, %v375_v41 }
 0x214   :  { %7444 = vtanh.f32 %v8019_v43 }
 0x21e   :  { %v7445_v50 = vpop.eup %7444 }
 0x21f   :  { %388 = vrot.lane.b32.xlu1 %v7445_v50, %s7819_s15 }
 0x291   :  { %v389_v51 = vpop.permute.xlu1 %388 }
 0x292   :  { %v391_v53 = vmul.f32 %v7443_v36, %v389_v51 }
 0x294   :  { %v8043_v54 = vadd.f32 %v393_v52, %v391_v53  ;;  %v623_v55 = vrot.slane %v391_v53, %v8000_v24 }
 0x296   :  { %624 = vrot.lane.b32.xlu0 %v623_v55, %s7809_s18  ;;  %v409_v56 = vrot.slane %v8043_v54, %v8000_v24 }
 0x298   :  { %410 = vrot.lane.b32.xlu1 %v409_v56, %s7809_s18 }
 0x29a   :  { %590 = vrot.lane.b32.xlu0 %v589_v33, %s7820_s16 }
 0x308   :  { %v625_v58 = vpop.permute.xlu0 %624 }
 0x30a   :  { %v411_v57 = vpop.permute.xlu1 %410 }
 0x30b   :  { %6232 = vmatmul.mubr.msk.f32.vlgmr.msra.gmra.mrb[2].mxu0 %vm153_vm1, %v411_v57 }
 0x30c   :  { %6990 = vmatpush3.bf16.msra.mxu0 %v7964_v10  ;;  %6261 = vmatprep.mubr.msk.f32.mxu0 %vm7816_vm0, %v7817_v1  ;;  %v8131_v44 = vpop.permute.xlu0 %590 }
 0x30d   :  { %6991 = vmatprep.subr.bf16.mxu0 %v7815_v0 }
 0x310   :  { %6993 = vmatpush3.bf16.msra.mxu0 %v7979_v14 }
 0x311   :  { %6994 = vmatprep.subr.bf16.mxu0 %v7815_v0 }
 0x313   :  { %6262 = vmatmul.mubr.msk.f32.vlgmr.msra.gmra.mrb[4].mxu0 %vm153_vm1, %v625_v58 }
 0x314   :  { %6996 = vmatpush3.bf16.msra.mxu0 %v8031_v47  ;;  %6272 = vmatprep.mubr.msk.f32.mxu0 %vm7816_vm0, %v7817_v1 }
 0x315   :  { %6997 = vmatprep.subr.bf16.mxu0 %v7815_v0 }
 0x318   :  { %6999 = vmatpush3.bf16.msra.mxu0 %v8037_v49 }
 0x319   :  { %7012 = vmatprep.subr.bf16.mxu0 %v7815_v0 }
 0x3de   :  { %v480_v15 = vpop.f32.mrb[2].mxu0 }
 0x3df   :  { %v481_v16 = vadd.f32 %v8107_v13, %v480_v15  ;;  %v6233_v17 = vpop.f32.mrb[3].mxu0 }
 0x3e1   :  { %v5749_v18 = vadd.f32 -1.0, %v481_v16 }
 0x3e3   :  { %v5750_v19 = vmul.f32 -1.442695, %v5749_v18 }
 0x3e5   :  { %7446 = vpow2.f32 %v5750_v19 }
 0x3e6   :  { %v694_v21 = vpop.f32.mrb[4].mxu0 }
 0x3e7   :  { %v698_v25 = vadd.f32 %v694_v21, %v250_v20  ;;  %v6263_v26 = vpop.f32.mrb[5].mxu0  ;;  %v279_v21 = vld [vmem:[#allocation6 + $0x2] sm:$0x3] }
 0x3e9   :  { %v5754_v38 = vmul.f32 -1.442695, %v698_v25 }
 0x3ef   :  { %v7447_v27 = vpop.eup %7446 }
 0x3f0   :  { %v488_v30 = vadd.f32 1.0, %v7447_v27 }
 0x3f2   :  { %7448 = vrcp.f32 %v488_v30 }
 0x3f3   :  { %7450 = vtanh.f32 %v698_v25 }
 0x3f4   :  { %7452 = vpow2.f32 %v5754_v38 }
 0x3fc   :  { %v7449_v31 = vpop.eup %7448 }
 0x3fd   :  { %v491_v32 = vmul.f32 %v7449_v31, %v481_v16  ;;  %v7451_v37 = vpop.eup %7450 }
 0x3fe   :  { %v7453_v40 = vpop.eup %7452 }
 0x3ff   :  { %6251 = vmatmul.mubr.msk.f32.vlgmr.msra.gmra.mrb[2].mxu1 %vm492_vm2, %v491_v32  ;;  %v702_v41 = vadd.f32 1.0, %v7453_v40  ;;  %v282_v40 = vld [vmem:[#allocation8 + $0x2] sm:$0x3] }
 0x400   :  { %7002 = vmatpush3.bf16.msra.mxu1 %v8070_v61  ;;  %6291 = vmatprep.mubr.msk.f32.mxu1 %vm7816_vm0, %v7817_v1 }
 0x401   :  { %7003 = vmatprep.subr.bf16.mxu1 %v7815_v0  ;;  %7454 = vrcp.f32 %v702_v41 }
 0x404   :  { %7005 = vmatpush3.bf16.msra.mxu1 %v8080_v2 }
 0x405   :  { %7006 = vmatprep.subr.bf16.mxu1 %v7815_v0 }
 0x408   :  { %7008 = vmatpush3.bf16.msra.mxu1 %v8090_v6 }
 0x409   :  { %7009 = vmatprep.subr.bf16.mxu1 %v7815_v0 }
 0x40b   :  { %v7455_v48 = vpop.eup %7454 }
 0x40c   :  { %7011 = vmatpush3.bf16.msra.mxu1 %v8100_v12  ;;  %v706_v55 = vmul.f32 %v7455_v48, %v8019_v43 }
 0x40d   :  { %7024 = vmatprep.subr.bf16.mxu1 %v7815_v0 }
 0x4d2   :  { %v562_v34 = vpop.f32.mrb[2].mxu1 }
 0x4d3   :  { %v573_v35 = vrot.slane %v562_v34, %v8000_v24  ;;  %v6252_v36 = vpop.f32.mrb[3].mxu1 }
 0x4d5   :  { %574 = vrot.lane.b32.xlu1 %v573_v35, %s7820_s16 }
 0x4d9   :  { %708 = vrot.lane.b32.xlu1 %v7451_v37, %s7819_s15 }
 0x547   :  { %v575_v42 = vpop.permute.xlu1 %574 }
 0x548   :  { %v577_v45 = vadd.f32 %v575_v42, %v8043_v54 }
 0x54a   :  { %v593_v46 = vadd.f32 %v8131_v44, %v577_v45 }
 0x54b   :  { %v709_v50 = vpop.permute.xlu1 %708 }
 0x54c   :  { %v711_v51 = vmul.f32 %v7455_v48, %v709_v50  ;;  %v594_v52 = vmul.f32 %v593_v46, %v593_v46 }
 0x54e   :  { %713 = vrot.lane.b32.xlu1 %v711_v51, %s7809_s18  ;;  %v602_v53 = vrot.slane %v594_v52, %v8000_v24 }
 0x550   :  { %603 = vrot.lane.b32.xlu0 %v602_v53, %s7809_s18 }
 0x5c0   :  { %v714_v56 = vpop.permute.xlu1 %713 }
 0x5c1   :  { %v8139_v57 = vadd.f32 %v714_v56, %v706_v55 }
 0x5c2   :  { %v604_v58 = vpop.permute.xlu0 %603 }
 0x5c3   :  { %7456 = vtanh.f32 %v8139_v57  ;;  %v607_v54 = vsel %vm606_vm3, %v604_v58, 0.0 }
 0x5c4   :  { %608 = vadd.xlane.f32.xlu0 %v607_v54 }
 0x5cd   :  { %v7457_v59 = vpop.eup %7456 }
 0x5ce   :  { %719 = vrot.lane.b32.xlu1 %v7457_v59, %s7819_s15 }
 0x5d2   :  { %723 = vrot.lane.b32.xlu1 %v128_v60, %s7820_s16 }
 0x640   :  { %v720_v62 = vpop.permute.xlu1 %719 }
 0x641   :  { %v8147_v43 = vmul.f32 %v7455_v48, %v720_v62 }
 0x643   :  { %v1291_v59 = vrot.slane %v8147_v43, %v8000_v24 }
 0x644   :  { %v724_v63 = vpop.permute.xlu1 %723 }
 0x645   :  { %v8150_v3 = vadd.f32 %v724_v63, %v8147_v43 }
 0x647   :  { %v734_v4 = vrot.slane %v8150_v3, %v8000_v24 }
 0x649   :  { %735 = vrot.lane.b32.xlu1 %v734_v4, %s7809_s18 }
 0x651   :  { %v609_v39 = vpop.xlane.xlu0 %608 }
 0x652   :  { %v611_v8 = vmul.f32 0.03125, %v609_v39 }
 0x654   :  { %v613_v15 = vadd.f32 %v8158_v7, %v611_v8 }
 0x656   :  { %7458 = vrsqrt.f32 %v613_v15 }
 0x660   :  { %v7459_v16 = vpop.eup %7458 }
 0x661   :  { %v8161_v17 = vmul.f32 %v7459_v16, %v593_v46 }
 0x663   :  { %v929_v18 = vrot.slane %v8161_v17, %v8000_v24 }
 0x665   :  { %930 = vrot.lane.b32.xlu1 %v929_v18, %s7809_s18 }
 0x6bb   :  { %v736_v19 = vpop.permute.xlu1 %735 }
 0x6bc   :  { %6273 = vmatmul.mubr.msk.f32.vlgmr.msra.gmra.mrb[6].mxu0 %vm153_vm1, %v736_v19 }
 0x6bd   :  { %7014 = vmatpush3.bf16.msra.mxu0 %v7951_v5  ;;  %6302 = vmatprep.mubr.msk.f32.mxu0 %vm7816_vm0, %v7817_v1 }
 0x6be   :  { %7015 = vmatprep.subr.bf16.mxu0 %v7815_v0 }
 0x6c1   :  { %7017 = vmatpush3.bf16.msra.mxu0 %v7962_v9 }
 0x6c2   :  { %7018 = vmatprep.subr.bf16.mxu0 %v7815_v0 }
 0x6d7   :  { %v931_v20 = vpop.permute.xlu1 %930 }
 0x6d8   :  { %6303 = vmatmul.mubr.msk.f32.vlgmr.msra.gmra.mrb[8].mxu0 %vm153_vm1, %v931_v20 }
 0x6d9   :  { %7020 = vmatpush3.bf16.msra.mxu0 %v7964_v10  ;;  %6313 = vmatprep.mubr.msk.f32.mxu0 %vm7816_vm0, %v7817_v1 }
 0x6da   :  { %7021 = vmatprep.subr.bf16.mxu0 %v7815_v0 }
 0x6dd   :  { %7023 = vmatpush3.bf16.msra.mxu0 %v7979_v14 }
 0x6de   :  { %7030 = vmatprep.subr.bf16.mxu0 %v7815_v0 }
 0x6e0   :  { %6314 = vmatmul.mubr.msk.f32.vlgmr.msra.gmra.mrb[8].mxu0 %vm153_vm1, %v279_v21 }
 0x6e1   :  { %7032 = vmatpush3.bf16.msra.mxu0 %v8070_v61  ;;  %6343 = vmatprep.mubr.msk.f32.mxu0 %vm7816_vm0, %v7817_v1 }
 0x6e2   :  { %7033 = vmatprep.subr.bf16.mxu0 %v7815_v0 }
 0x6e5   :  { %7035 = vmatpush3.bf16.msra.mxu0 %v8080_v2 }
 0x6e6   :  { %7036 = vmatprep.subr.bf16.mxu0 %v7815_v0 }
 0x6e9   :  { %7038 = vmatpush3.bf16.msra.mxu0 %v8090_v6 }
 0x6ea   :  { %7039 = vmatprep.subr.bf16.mxu0 %v7815_v0 }
 0x6ed   :  { %7041 = vmatpush3.bf16.msra.mxu0 %v8100_v12 }
 0x6ee   :  { %7054 = vmatprep.subr.bf16.mxu0 %v7815_v0 }
 0x78f   :  { %v805_v25 = vpop.f32.mrb[6].mxu0 }
 0x790   :  { %v806_v26 = vadd.f32 %v8107_v13, %v805_v25  ;;  %v6274_v27 = vpop.f32.mrb[7].mxu0 }
 0x792   :  { %v5756_v30 = vadd.f32 -1.0, %v806_v26 }
 0x794   :  { %v5757_v31 = vmul.f32 -1.442695, %v5756_v30 }
 0x796   :  { %7460 = vpow2.f32 %v5757_v31 }
 0x7a0   :  { %v7461_v32 = vpop.eup %7460 }
 0x7a1   :  { %v813_v29 = vadd.f32 1.0, %v7461_v32 }
 0x7a3   :  { %7462 = vrcp.f32 %v813_v29 }
 0x7ad   :  { %v7463_v33 = vpop.eup %7462 }
 0x7ae   :  { %v816_v34 = vmul.f32 %v7463_v33, %v806_v26 }
 0x7b0   :  { %6292 = vmatmul.mubr.msk.f32.vlgmr.msra.gmra.mrb[4].mxu1 %vm492_vm2, %v816_v34 }
 0x7b1   :  { %7026 = vmatpush3.bf16.msra.mxu1 %v8031_v47  ;;  %6324 = vmatprep.mubr.msk.f32.mxu1 %vm7816_vm0, %v7817_v1 }
 0x7b2   :  { %7027 = vmatprep.subr.bf16.mxu1 %v7815_v0 }
 0x7b3   :  { %v1073_v35 = vpop.f32.mrb[8].mxu0 }
 0x7b4   :  { %v7396_v36 = vadd.f32 %v7996_v22, %v1073_v35  ;;  %v6315_v37 = vpop.f32.mrb[9].mxu0 }
 0x7b5   :  { %7029 = vmatpush3.bf16.msra.mxu1 %v8037_v49 }
 0x7b6   :  { %7464 = vtanh.f32 %v7396_v36  ;;  %7042 = vmatprep.subr.bf16.mxu1 %v7815_v0  ;;  %v5761_v41 = vmul.f32 -1.442695, %v7396_v36 }
 0x7b8   :  { %7466 = vpow2.f32 %v5761_v41 }
 0x7c0   :  { %v7465_v38 = vpop.eup %7464 }
 0x7c1   :  { %1091 = vrot.lane.b32.xlu1 %v7465_v38, %s7819_s15 }
 0x7c2   :  { %v7467_v42 = vpop.eup %7466 }
 0x7c3   :  { %v1081_v45 = vadd.f32 1.0, %v7467_v42 }
 0x7c5   :  { %1086 = vrot.lane.b32.xlu1 %v282_v40, %s7809_s18  ;;  %7468 = vrcp.f32 %v1081_v45 }
 0x7cf   :  { %v7469_v46 = vpop.eup %7468 }
 0x833   :  { %v1092_v48 = vpop.permute.xlu1 %1091 }
 0x834   :  { %v1094_v50 = vmul.f32 %v7469_v46, %v1092_v48 }
 0x836   :  { %1096 = vrot.lane.b32.xlu1 %v1094_v50, %s7809_s18 }
 0x837   :  { %v1087_v53 = vpop.permute.xlu1 %1086 }
 0x838   :  { %v1089_v55 = vmul.f32 %v7469_v46, %v1087_v53 }
 0x883   :  { %v886_v51 = vpop.f32.mrb[4].mxu1 }
 0x884   :  { %v6293_v52 = vpop.f32.mrb[5].mxu1  ;;  %v897_v60 = vrot.slane %v886_v51, %v8000_v24 }
 0x8a8   :  { %v1097_v56 = vpop.permute.xlu1 %1096 }
 0x8a9   :  { %v8203_v58 = vadd.f32 %v1097_v56, %v1089_v55  ;;  %v113_v55 = vcombine.high %v7966_v11, %v7966_v11 }
 0x8ab   :  { %7470 = vtanh.f32 %v8203_v58 }
 0x8b5   :  { %v7471_v54 = vpop.eup %7470 }
 0x8b6   :  { %1102 = vrot.lane.b32.xlu1 %v7471_v54, %s7819_s15  ;;  %v8269_v54 = vrot.slane %v113_v55, %v8000_v24 }
 0x8ba   :  { %1292 = vrot.lane.b32.xlu1 %v1291_v59, %s7809_s18 }
 0x8be   :  { %898 = vrot.lane.b32.xlu1 %v897_v60, %s7820_s16 }
 0x928   :  { %v1103_v62 = vpop.permute.xlu1 %1102 }
 0x929   :  { %v8212_v63 = vmul.f32 %v7469_v46, %v1103_v62 }
 0x92b   :  { %v8216_v4 = vadd.f32 %v8212_v63, %v8161_v17  ;;  %v235_v17 = vcombine.high %v8003_v28, %v8003_v28 }
 0x92c   :  { %v1293_v43 = vpop.permute.xlu1 %1292 }
 0x92d   :  { %1108 = vrot.lane.b32.xlu0 %v8216_v4, %s7809_s18  ;;  %v8238_v20 = vrot.slane %v235_v17, %v8000_v24 }
 0x930   :  { %v899_v25 = vpop.permute.xlu1 %898 }
 0x931   :  { %v901_v30 = vadd.f32 %v899_v25, %v8150_v3 }
 0x933   :  { %v902_v31 = vadd.f32 %v901_v30, %v8131_v44 }
 0x935   :  { %v903_v28 = vmul.f32 %v902_v31, %v902_v31 }
 0x937   :  { %v911_v34 = vrot.slane %v903_v28, %v8000_v24 }
 0x99f   :  { %v1109_v39 = vpop.permute.xlu0 %1108 }
 0x9a0   :  { %6325 = vmatmul.mubr.msk.f32.vlgmr.msra.gmra.mrb[6].mxu1 %vm153_vm1, %v1109_v39 }
 0x9a1   :  { %7044 = vmatpush3.bf16.msra.mxu1 %v7964_v10  ;;  %6354 = vmatprep.mubr.msk.f32.mxu1 %vm7816_vm0, %v7817_v1 }
 0x9a2   :  { %7045 = vmatprep.subr.bf16.mxu1 %v7815_v0 }
 0x9a5   :  { %7047 = vmatpush3.bf16.msra.mxu1 %v7979_v14 }
 0x9a6   :  { %7048 = vmatprep.subr.bf16.mxu1 %v7815_v0 }
 0x9a8   :  { %6355 = vmatmul.mubr.msk.f32.vlgmr.msra.gmra.mrb[8].mxu1 %vm153_vm1, %v1293_v43 }
 0x9a9   :  { %7050 = vmatpush3.bf16.msra.mxu1 %v8031_v47  ;;  %6365 = vmatprep.mubr.msk.f32.mxu1 %vm7816_vm0, %v7817_v1 }
 0x9aa   :  { %7051 = vmatprep.subr.bf16.mxu1 %v7815_v0 }
 0x9ad   :  { %7053 = vmatpush3.bf16.msra.mxu1 %v8037_v49 }
 0x9ae   :  { %7066 = vmatprep.subr.bf16.mxu1 %v7815_v0 }
 0xa73   :  { %v1178_v8 = vpop.f32.mrb[6].mxu1 }
 0xa74   :  { %v1179_v15 = vadd.f32 %v8107_v13, %v1178_v8  ;;  %v6326_v16 = vpop.f32.mrb[7].mxu1 }
 0xa76   :  { %v5763_v18 = vadd.f32 -1.0, %v1179_v15 }
 0xa78   :  { %v5764_v19 = vmul.f32 -1.442695, %v5763_v18 }
 0xa7a   :  { %7472 = vpow2.f32 %v5764_v19 }
 0xa7b   :  { %v1362_v21 = vpop.f32.mrb[8].mxu1 }
 0xa7c   :  { %v1366_v26 = vadd.f32 %v1362_v21, %v8238_v20  ;;  %v6356_v27 = vpop.f32.mrb[9].mxu1 }
 0xa7e   :  { %7474 = vtanh.f32 %v1366_v26  ;;  %v5767_v3 = vmul.f32 -1.442695, %v1366_v26 }
 0xa84   :  { %v7473_v32 = vpop.eup %7472 }
 0xa85   :  { %v1186_v29 = vadd.f32 1.0, %v7473_v32 }
 0xa87   :  { %7476 = vrcp.f32 %v1186_v29 }
 0xa88   :  { %v7475_v33 = vpop.eup %7474  ;;  %7478 = vpow2.f32 %v5767_v3 }
 0xa89   :  { %1376 = vrot.lane.b32.xlu1 %v7475_v33, %s7819_s15 }
 0xa8d   :  { %912 = vrot.lane.b32.xlu1 %v911_v34, %s7809_s18 }
 0xa91   :  { %v7477_v35 = vpop.eup %7476 }
 0xa92   :  { %v1189_v36 = vmul.f32 %v7477_v35, %v1179_v15  ;;  %v7479_v37 = vpop.eup %7478 }
 0xa93   :  { %v1370_v38 = vadd.f32 1.0, %v7479_v37 }
 0xa94   :  { %6344 = vmatmul.mubr.msk.f32.vlgmr.msra.gmra.mrb[10].mxu0 %vm492_vm2, %v1189_v36 }
 0xa95   :  { %7056 = vmatpush3.bf16.msra.mxu0 %v8070_v61  ;;  %6384 = vmatprep.mubr.msk.f32.mxu0 %vm7816_vm0, %v7817_v1  ;;  %7480 = vrcp.f32 %v1370_v38 }
 0xa96   :  { %7057 = vmatprep.subr.bf16.mxu0 %v7815_v0 }
 0xa99   :  { %7059 = vmatpush3.bf16.msra.mxu0 %v8080_v2 }
 0xa9a   :  { %7060 = vmatprep.subr.bf16.mxu0 %v7815_v0 }
 0xa9d   :  { %7062 = vmatpush3.bf16.msra.mxu0 %v8090_v6 }
 0xa9e   :  { %7063 = vmatprep.subr.bf16.mxu0 %v7815_v0 }
 0xa9f   :  { %v7481_v40 = vpop.eup %7480 }
 0xaa0   :  { %v1374_v51 = vmul.f32 %v7481_v40, %v8139_v57 }
 0xaa1   :  { %7065 = vmatpush3.bf16.msra.mxu0 %v8100_v12 }
 0xaa2   :  { %7078 = vmatprep.subr.bf16.mxu0 %v7815_v0 }
 0xafb   :  { %v1377_v41 = vpop.permute.xlu1 %1376 }
 0xafc   :  { %v1379_v42 = vmul.f32 %v7481_v40, %v1377_v41 }
 0xafe   :  { %1381 = vrot.lane.b32.xlu1 %v1379_v42, %s7809_s18 }
 0xaff   :  { %v913_v45 = vpop.permute.xlu1 %912 }
 0xb00   :  { %v915_v46 = vsel %vm606_vm3, %v913_v45, 0.0 }
 0xb22   :  { %916 = vadd.xlane.f32.xlu1 %v915_v46 }
 0xb67   :  { %v8259_v48 = vpop.f32.mrb[10].mxu0 }
 0xb68   :  { %v6345_v50 = vpop.f32.mrb[11].mxu0 }
 0xb70   :  { %v1382_v52 = vpop.permute.xlu1 %1381 }
 0xb71   :  { %v8262_v53 = vadd.f32 %v1382_v52, %v1374_v51 }
 0xb73   :  { %7482 = vtanh.f32 %v8262_v53 }
 0xb7d   :  { %v7483_v56 = vpop.eup %7482 }
 0xb7e   :  { %1387 = vrot.lane.b32.xlu0 %v7483_v56, %s7819_s15 }
 0xb82   :  { %1391 = vrot.lane.b32.xlu0 %v8269_v54, %s7820_s16 }
 0xbaf   :  { %v917_v59 = vpop.xlane.xlu1 %916 }
 0xbb0   :  { %v918_v60 = vmul.f32 0.03125, %v917_v59 }
 0xbb2   :  { %v919_v57 = vadd.f32 %v918_v60, %v8158_v7 }
 0xbb4   :  { %7484 = vrsqrt.f32 %v919_v57 }
 0xbbe   :  { %v7485_v8 = vpop.eup %7484 }
 0xbbf   :  { %v8280_v17 = vmul.f32 %v7485_v8, %v902_v31 }
 0xbc1   :  { %v1597_v18 = vrot.slane %v8280_v17, %v8000_v24 }
 0xbf0   :  { %v1388_v62 = vpop.permute.xlu0 %1387 }
 0xbf1   :  { %v1390_v39 = vmul.f32 %v7481_v40, %v1388_v62 }
 0xbf3   :  { %v1954_v43 = vrot.slane %v1390_v39, %v8000_v24 }
 0xbf4   :  { %v1392_v11 = vpop.permute.xlu0 %1391 }
 0xbf5   :  { %v8275_v15 = vadd.f32 %v1392_v11, %v1390_v39  ;;  %1955 = vrot.lane.b32.xlu1 %v1954_v43, %s7809_s18 }
 0xbf7   :  { %v1402_v16 = vrot.slane %v8275_v15, %v8000_v24 }
 0xbf9   :  { %1403 = vrot.lane.b32.xlu0 %v1402_v16, %s7809_s18 }
 0xbfd   :  { %1598 = vrot.lane.b32.xlu0 %v1597_v18, %s7809_s18 }
 0xc01   :  { %1673 = vrot.lane.b32.xlu0 %v8212_v63, %s7809_s18 }
 0xc67   :  { %v1956_v62 = vpop.permute.xlu1 %1955 }
 0xc6b   :  { %v1404_v19 = vpop.permute.xlu0 %1403 }
 0xc6c   :  { %6366 = vmatmul.mubr.msk.f32.vlgmr.msra.gmra.mrb[10].mxu1 %vm153_vm1, %v1404_v19 }
 0xc6d   :  { %7068 = vmatpush3.bf16.msra.mxu1 %v7951_v5  ;;  %6395 = vmatprep.mubr.msk.f32.mxu1 %vm7816_vm0, %v7817_v1 }
 0xc6e   :  { %7069 = vmatprep.subr.bf16.mxu1 %v7815_v0 }
 0xc6f   :  { %v1599_v21 = vpop.permute.xlu0 %1598 }
 0xc71   :  { %7071 = vmatpush3.bf16.msra.mxu1 %v7962_v9 }
 0xc72   :  { %7072 = vmatprep.subr.bf16.mxu1 %v7815_v0 }
 0xc73   :  { %v1674_v63 = vpop.permute.xlu0 %1673 }
 0xc74   :  { %6396 = vmatmul.mubr.msk.f32.vlgmr.msra.gmra.mrb[12].mxu1 %vm153_vm1, %v1599_v21 }
 0xc75   :  { %7074 = vmatpush3.bf16.msra.mxu1 %v7964_v10  ;;  %6406 = vmatprep.mubr.msk.f32.mxu1 %vm7816_vm0, %v7817_v1 }
 0xc76   :  { %7075 = vmatprep.subr.bf16.mxu1 %v7815_v0 }
 0xc79   :  { %7077 = vmatpush3.bf16.msra.mxu1 %v7979_v14 }
 0xc7a   :  { %7084 = vmatprep.subr.bf16.mxu1 %v7815_v0 }
 0xc7c   :  { %6407 = vmatmul.mubr.msk.f32.vlgmr.msra.gmra.mrb[12].mxu1 %vm153_vm1, %v1674_v63 }
 0xc7d   :  { %7086 = vmatpush3.bf16.msra.mxu1 %v8070_v61  ;;  %6436 = vmatprep.mubr.msk.f32.mxu1 %vm7816_vm0, %v7817_v1 }
 0xc7e   :  { %7087 = vmatprep.subr.bf16.mxu1 %v7815_v0 }
 0xc81   :  { %7089 = vmatpush3.bf16.msra.mxu1 %v8080_v2 }
 0xc82   :  { %7090 = vmatprep.subr.bf16.mxu1 %v7815_v0 }
 0xc85   :  { %7092 = vmatpush3.bf16.msra.mxu1 %v8090_v6 }
 0xc86   :  { %7093 = vmatprep.subr.bf16.mxu1 %v7815_v0 }
 0xc89   :  { %7095 = vmatpush3.bf16.msra.mxu1 %v8100_v12 }
 0xc8a   :  { %7108 = vmatprep.subr.bf16.mxu1 %v7815_v0 }
 0xd3f   :  { %v1473_v25 = vpop.f32.mrb[10].mxu1 }
 0xd40   :  { %v1474_v26 = vadd.f32 %v8107_v13, %v1473_v25  ;;  %v6367_v27 = vpop.f32.mrb[11].mxu1 }
 0xd42   :  { %v5769_v30 = vadd.f32 -1.0, %v1474_v26 }
 0xd44   :  { %v5770_v31 = vmul.f32 -1.442695, %v5769_v30 }
 0xd46   :  { %7486 = vpow2.f32 %v5770_v31 }
 0xd4f   :  { %v1743_v32 = vpop.f32.mrb[12].mxu1 }
 0xd50   :  { %v7487_v29 = vpop.eup %7486  ;;  %v7397_v28 = vadd.f32 %v7996_v22, %v1743_v32  ;;  %v6408_v33 = vpop.f32.mrb[13].mxu1 }
 0xd51   :  { %v1481_v34 = vadd.f32 1.0, %v7487_v29 }
 0xd52   :  { %7488 = vtanh.f32 %v7397_v28  ;;  %v5774_v22 = vmul.f32 -1.442695, %v7397_v28 }
 0xd53   :  { %7490 = vrcp.f32 %v1481_v34 }
 0xd54   :  { %7492 = vpow2.f32 %v5774_v22 }
 0xd5c   :  { %v7489_v35 = vpop.eup %7488 }
 0xd5d   :  { %v7491_v36 = vpop.eup %7490  ;;  %1757 = vrot.lane.b32.xlu0 %v7489_v35, %s7819_s15 }
 0xd5e   :  { %v1484_v3 = vmul.f32 %v7491_v36, %v1474_v26  ;;  %v7493_v37 = vpop.eup %7492 }
 0xd5f   :  { %v1751_v38 = vadd.f32 1.0, %v7493_v37 }
 0xd60   :  { %6385 = vmatmul.mubr.msk.f32.vlgmr.msra.gmra.mrb[12].mxu0 %vm492_vm2, %v1484_v3 }
 0xd61   :  { %7080 = vmatpush3.bf16.msra.mxu0 %v8031_v47  ;;  %6417 = vmatprep.mubr.msk.f32.mxu0 %vm7816_vm0, %v7817_v1  ;;  %7494 = vrcp.f32 %v1751_v38 }
 0xd62   :  { %7081 = vmatprep.subr.bf16.mxu0 %v7815_v0 }
 0xd65   :  { %7083 = vmatpush3.bf16.msra.mxu0 %v8037_v49 }
 0xd66   :  { %7096 = vmatprep.subr.bf16.mxu0 %v7815_v0 }
 0xd6b   :  { %v7495_v40 = vpop.eup %7494 }
 0xd6c   :  { %v1755_v50 = vmul.f32 %v7495_v40, %v8203_v58 }
 0xdcf   :  { %v1758_v41 = vpop.permute.xlu0 %1757 }
 0xdd0   :  { %v1760_v42 = vmul.f32 %v7495_v40, %v1758_v41 }
 0xdd2   :  { %1762 = vrot.lane.b32.xlu0 %v1760_v42, %s7809_s18 }
 0xe33   :  { %v1554_v45 = vpop.f32.mrb[12].mxu0 }
 0xe34   :  { %v6386_v46 = vpop.f32.mrb[13].mxu0  ;;  %v1565_v58 = vrot.slane %v1554_v45, %v8000_v24 }
 0xe44   :  { %v1763_v51 = vpop.permute.xlu0 %1762 }
 0xe45   :  { %v8325_v52 = vadd.f32 %v1763_v51, %v1755_v50  ;;  %v129_v50 = vcombine.high %v8269_v54, %v8269_v54 }
 0xe47   :  { %7496 = vtanh.f32 %v8325_v52 }
 0xe51   :  { %v7497_v55 = vpop.eup %7496 }
 0xe52   :  { %1768 = vrot.lane.b32.xlu0 %v7497_v55, %s7819_s15 }
 0xec4   :  { %v1769_v56 = vpop.permute.xlu0 %1768 }
 0xec5   :  { %v8329_v59 = vmul.f32 %v7495_v40, %v1769_v56 }
 0xec7   :  { %v8333_v60 = vadd.f32 %v8329_v59, %v8280_v17  ;;  %v251_v17 = vcombine.high %v8238_v20, %v8238_v20 }
 0xec9   :  { %1774 = vrot.lane.b32.xlu0 %v8333_v60, %s7809_s18 }
 0xecd   :  { %1566 = vrot.lane.b32.xlu0 %v1565_v58, %s7820_s16 }
 0xf3b   :  { %v1775_v57 = vpop.permute.xlu0 %1774 }
 0xf3c   :  { %6418 = vmatmul.mubr.msk.f32.vlgmr.msra.gmra.mrb[14].mxu0 %vm153_vm1, %v1775_v57 }
 0xf3d   :  { %7098 = vmatpush3.bf16.msra.mxu0 %v7964_v10  ;;  %6447 = vmatprep.mubr.msk.f32.mxu0 %vm7816_vm0, %v7817_v1 }
 0xf3e   :  { %7099 = vmatprep.subr.bf16.mxu0 %v7815_v0 }
 0xf3f   :  { %v1567_v19 = vpop.permute.xlu0 %1566 }
 0xf40   :  { %v1569_v25 = vadd.f32 %v1567_v19, %v8275_v15 }
 0xf41   :  { %7101 = vmatpush3.bf16.msra.mxu0 %v7979_v14 }
 0xf42   :  { %7102 = vmatprep.subr.bf16.mxu0 %v7815_v0  ;;  %v1570_v26 = vadd.f32 %v1569_v25, %v8131_v44 }
 0xf44   :  { %6448 = vmatmul.mubr.msk.f32.vlgmr.msra.gmra.mrb[16].mxu0 %vm153_vm1, %v1956_v62  ;;  %v1571_v31 = vmul.f32 %v1570_v26, %v1570_v26 }
 0xf45   :  { %7104 = vmatpush3.bf16.msra.mxu0 %v8031_v47  ;;  %6458 = vmatprep.mubr.msk.f32.mxu0 %vm7816_vm0, %v7817_v1 }
 0xf46   :  { %7105 = vmatprep.subr.bf16.mxu0 %v7815_v0  ;;  %v1579_v29 = vrot.slane %v1571_v31, %v8000_v24 }
 0xf49   :  { %7107 = vmatpush3.bf16.msra.mxu0 %v8037_v49 }
 0xf4a   :  { %7120 = vmatprep.subr.bf16.mxu0 %v7815_v0 }
0x100f   :  { %v1844_v39 = vpop.f32.mrb[14].mxu0 }
0x1010   :  { %v1845_v43 = vadd.f32 %v8107_v13, %v1844_v39  ;;  %v6419_v8 = vpop.f32.mrb[15].mxu0 }
0x1012   :  { %v5776_v11 = vadd.f32 -1.0, %v1845_v43 }
0x1014   :  { %v5777_v16 = vmul.f32 -1.442695, %v5776_v11 }
0x1016   :  { %7498 = vpow2.f32 %v5777_v16 }
0x1017   :  { %v2025_v18 = vpop.f32.mrb[16].mxu0 }
0x1018   :  { %v2029_v21 = vadd.f32 %v2025_v18, %v251_v17  ;;  %v6449_v63 = vpop.f32.mrb[17].mxu0 }
0x101a   :  { %7500 = vtanh.f32 %v2029_v21  ;;  %v5780_v15 = vmul.f32 -1.442695, %v2029_v21 }
0x1020   :  { %v7499_v27 = vpop.eup %7498 }
0x1021   :  { %v1852_v30 = vadd.f32 1.0, %v7499_v27  ;;  %v8429_v27 = vld [vmem:[%s9183_s5] ss:$0 sm:$0xff] }
0x1023   :  { %7502 = vrcp.f32 %v1852_v30 }
0x1024   :  { %v7501_v32 = vpop.eup %7500  ;;  %7504 = vpow2.f32 %v5780_v15 }
0x1025   :  { %2039 = vrot.lane.b32.xlu0 %v7501_v32, %s7819_s15 }
0x1029   :  { %1580 = vrot.lane.b32.xlu0 %v1579_v29, %s7809_s18 }
0x102d   :  { %v7503_v20 = vpop.eup %7502 }
0x102e   :  { %v1855_v28 = vmul.f32 %v7503_v20, %v1845_v43  ;;  %v7505_v33 = vpop.eup %7504 }
0x102f   :  { %v2033_v34 = vadd.f32 1.0, %v7505_v33 }
0x1030   :  { %6437 = vmatmul.mubr.msk.f32.vlgmr.msra.gmra.mrb[14].mxu1 %vm492_vm2, %v1855_v28 }
0x1031   :  { %7110 = vmatpush3.bf16.msra.mxu1 %v8070_v61  ;;  %6477 = vmatprep.mubr.msk.f32.mxu1 %vm7816_vm0, %v7817_v1  ;;  %7506 = vrcp.f32 %v2033_v34 }
0x1032   :  { %7111 = vmatprep.subr.bf16.mxu1 %v7815_v0 }
0x1035   :  { %7113 = vmatpush3.bf16.msra.mxu1 %v8080_v2 }
0x1036   :  { %7114 = vmatprep.subr.bf16.mxu1 %v7815_v0 }
0x1039   :  { %7116 = vmatpush3.bf16.msra.mxu1 %v8090_v6 }
0x103a   :  { %7117 = vmatprep.subr.bf16.mxu1 %v7815_v0 }
0x103b   :  { %v7507_v35 = vpop.eup %7506 }
0x103c   :  { %v2037_v41 = vmul.f32 %v7507_v35, %v8262_v53 }
0x103d   :  { %7119 = vmatpush3.bf16.msra.mxu1 %v8100_v12 }
0x103e   :  { %7132 = vmatprep.subr.bf16.mxu1 %v7815_v0 }
0x1097   :  { %v2040_v36 = vpop.permute.xlu0 %2039 }
0x1098   :  { %v2042_v3 = vmul.f32 %v7507_v35, %v2040_v36 }
0x109a   :  { %2044 = vrot.lane.b32.xlu0 %v2042_v3, %s7809_s18 }
0x109b   :  { %v1581_v22 = vpop.permute.xlu0 %1580 }
0x109c   :  { %v1583_v37 = vsel %vm606_vm3, %v1581_v22, 0.0 }
0x10b9   :  { %1584 = vadd.xlane.f32.xlu0 %v1583_v37 }
0x1103   :  { %v8374_v38 = vpop.f32.mrb[14].mxu1 }
0x1104   :  { %v6438_v40 = vpop.f32.mrb[15].mxu1 }
0x110c   :  { %v2045_v42 = vpop.permute.xlu0 %2044 }
0x110d   :  { %v8377_v45 = vadd.f32 %v2045_v42, %v2037_v41 }
0x110f   :  { %7508 = vtanh.f32 %v8377_v45 }
0x1119   :  { %v7509_v46 = vpop.eup %7508 }
0x111a   :  { %2050 = vrot.lane.b32.xlu1 %v7509_v46, %s7819_s15 }
0x111e   :  { %2054 = vrot.lane.b32.xlu1 %v129_v50, %s7820_s16 }
0x1146   :  { %v1585_v51 = vpop.xlane.xlu0 %1584 }
0x1147   :  { %v1586_v55 = vmul.f32 0.03125, %v1585_v51 }
0x1149   :  { %v1587_v56 = vadd.f32 %v1586_v55, %v8158_v7 }
0x114b   :  { %7510 = vrsqrt.f32 %v1587_v56 }
0x1155   :  { %v7511_v57 = vpop.eup %7510 }
0x1156   :  { %v8392_v8 = vmul.f32 %v7511_v57, %v1570_v26 }
0x1158   :  { %v2260_v54 = vrot.slane %v8392_v8, %v8000_v24 }
0x118c   :  { %v2051_v58 = vpop.permute.xlu1 %2050 }
0x118d   :  { %v8385_v53 = vmul.f32 %v7507_v35, %v2051_v58 }
0x118f   :  { %v2617_v50 = vrot.slane %v8385_v53, %v8000_v24 }
0x1190   :  { %v2055_v62 = vpop.permute.xlu1 %2054 }
0x1191   :  { %v8388_v39 = vadd.f32 %v2055_v62, %v8385_v53 }
0x1193   :  { %v2065_v43 = vrot.slane %v8388_v39, %v8000_v24 }
0x1195   :  { %2066 = vrot.lane.b32.xlu1 %v2065_v43, %s7809_s18 }
0x1199   :  { %2261 = vrot.lane.b32.xlu1 %v2260_v54, %s7809_s18 }
0x119d   :  { %2336 = vrot.lane.b32.xlu1 %v8329_v59, %s7809_s18 }
0x1207   :  { %v2067_v11 = vpop.permute.xlu1 %2066 }
0x1208   :  { %6459 = vmatmul.mubr.msk.f32.vlgmr.msra.gmra.mrb[18].mxu0 %vm153_vm1, %v2067_v11 }
0x1209   :  { %7122 = vmatpush3.bf16.msra.mxu0 %v7951_v5  ;;  %6488 = vmatprep.mubr.msk.f32.mxu0 %vm7816_vm0, %v7817_v1 }
0x120a   :  { %7123 = vmatprep.subr.bf16.mxu0 %v7815_v0 }
0x120b   :  { %v2262_v16 = vpop.permute.xlu1 %2261 }
0x120d   :  { %7125 = vmatpush3.bf16.msra.mxu0 %v7962_v9 }
0x120e   :  { %7126 = vmatprep.subr.bf16.mxu0 %v7815_v0 }
0x120f   :  { %v2337_v59 = vpop.permute.xlu1 %2336 }
0x1210   :  { %6489 = vmatmul.mubr.msk.f32.vlgmr.msra.gmra.mrb[20].mxu0 %vm153_vm1, %v2262_v16 }
0x1211   :  { %7128 = vmatpush3.bf16.msra.mxu0 %v7964_v10  ;;  %6499 = vmatprep.mubr.msk.f32.mxu0 %vm7816_vm0, %v7817_v1 }
0x1212   :  { %7129 = vmatprep.subr.bf16.mxu0 %v7815_v0 }
0x1215   :  { %7131 = vmatpush3.bf16.msra.mxu0 %v7979_v14 }
0x1216   :  { %7138 = vmatprep.subr.bf16.mxu0 %v7815_v0 }
0x1218   :  { %6500 = vmatmul.mubr.msk.f32.vlgmr.msra.gmra.mrb[20].mxu0 %vm153_vm1, %v2337_v59 }
0x1219   :  { %7140 = vmatpush3.bf16.msra.mxu0 %v8070_v61  ;;  %6529 = vmatprep.mubr.msk.f32.mxu0 %vm7816_vm0, %v7817_v1 }
0x121a   :  { %7141 = vmatprep.subr.bf16.mxu0 %v7815_v0 }
0x121d   :  { %7143 = vmatpush3.bf16.msra.mxu0 %v8080_v2 }
0x121e   :  { %7144 = vmatprep.subr.bf16.mxu0 %v7815_v0 }
0x1221   :  { %7146 = vmatpush3.bf16.msra.mxu0 %v8090_v6 }
0x1222   :  { %7147 = vmatprep.subr.bf16.mxu0 %v7815_v0 }
0x1225   :  { %7149 = vmatpush3.bf16.msra.mxu0 %v8100_v12 }
0x1226   :  { %7162 = vmatprep.subr.bf16.mxu0 %v7815_v0 }
0x12db   :  { %v2136_v17 = vpop.f32.mrb[18].mxu0 }
0x12dc   :  { %v2137_v18 = vadd.f32 %v8107_v13, %v2136_v17  ;;  %v6460_v19 = vpop.f32.mrb[19].mxu0 }
0x12de   :  { %v5782_v21 = vadd.f32 -1.0, %v2137_v18 }
0x12e0   :  { %v5783_v63 = vmul.f32 -1.442695, %v5782_v21 }
0x12e2   :  { %7512 = vpow2.f32 %v5783_v63 }
0x12eb   :  { %v2406_v25 = vpop.f32.mrb[20].mxu0 }
0x12ec   :  { %v7513_v26 = vpop.eup %7512  ;;  %v7398_v30 = vadd.f32 %v8429_v27, %v2406_v25  ;;  %v6501_v31 = vpop.f32.mrb[21].mxu0 }
0x12ed   :  { %v2144_v32 = vadd.f32 1.0, %v7513_v26 }
0x12ee   :  { %7514 = vtanh.f32 %v7398_v30  ;;  %v5787_v15 = vmul.f32 -1.442695, %v7398_v30 }
0x12ef   :  { %7516 = vrcp.f32 %v2144_v32 }
0x12f0   :  { %7518 = vpow2.f32 %v5787_v15 }
0x12f8   :  { %v7515_v29 = vpop.eup %7514 }
0x12f9   :  { %v7517_v20 = vpop.eup %7516  ;;  %2420 = vrot.lane.b32.xlu1 %v7515_v29, %s7819_s15 }
0x12fa   :  { %v2147_v28 = vmul.f32 %v7517_v20, %v2137_v18  ;;  %v7519_v33 = vpop.eup %7518 }
0x12fb   :  { %v2414_v34 = vadd.f32 1.0, %v7519_v33 }
0x12fc   :  { %6478 = vmatmul.mubr.msk.f32.vlgmr.msra.gmra.mrb[16].mxu1 %vm492_vm2, %v2147_v28 }
0x12fd   :  { %7134 = vmatpush3.bf16.msra.mxu1 %v8031_v47  ;;  %6510 = vmatprep.mubr.msk.f32.mxu1 %vm7816_vm0, %v7817_v1  ;;  %7520 = vrcp.f32 %v2414_v34 }
0x12fe   :  { %7135 = vmatprep.subr.bf16.mxu1 %v7815_v0 }
0x1301   :  { %7137 = vmatpush3.bf16.msra.mxu1 %v8037_v49 }
0x1302   :  { %7150 = vmatprep.subr.bf16.mxu1 %v7815_v0 }
0x1307   :  { %v7521_v35 = vpop.eup %7520 }
0x1308   :  { %v2418_v40 = vmul.f32 %v7521_v35, %v8325_v52 }
0x136b   :  { %v2421_v36 = vpop.permute.xlu1 %2420 }
0x136c   :  { %v2423_v3 = vmul.f32 %v7521_v35, %v2421_v36 }
0x136e   :  { %2425 = vrot.lane.b32.xlu1 %v2423_v3, %s7809_s18 }
0x13cf   :  { %v2217_v22 = vpop.f32.mrb[16].mxu1 }
0x13d0   :  { %v6479_v37 = vpop.f32.mrb[17].mxu1  ;;  %v2228_v51 = vrot.slane %v2217_v22, %v8000_v24 }
0x13e0   :  { %v2426_v41 = vpop.permute.xlu1 %2425 }
0x13e1   :  { %v8442_v42 = vadd.f32 %v2426_v41, %v2418_v40 }
0x13e3   :  { %7522 = vtanh.f32 %v8442_v42 }
0x13ed   :  { %v7523_v46 = vpop.eup %7522 }
0x13ee   :  { %2431 = vrot.lane.b32.xlu1 %v7523_v46, %s7819_s15  ;;  %v8508_v46 = vld [vmem:[#allocation3 + $0x8] sm:$0xff] }
0x13f2   :  { %2618 = vrot.lane.b32.xlu1 %v2617_v50, %s7809_s18  ;;  %v8512_v50 = vrot.slane %v8508_v46, %v8000_v24 }
0x13f6   :  { %2229 = vrot.lane.b32.xlu1 %v2228_v51, %s7820_s16 }
0x1460   :  { %v2432_v55 = vpop.permute.xlu1 %2431 }
0x1461   :  { %v8451_v56 = vmul.f32 %v7521_v35, %v2432_v55 }
0x1463   :  { %v8455_v52 = vadd.f32 %v8451_v56, %v8392_v8  ;;  %v8476_v8 = vadd.f32 %v8429_v27, %v7998_v23 }
0x1464   :  { %v2619_v53 = vpop.permute.xlu1 %2618 }
0x1465   :  { %2437 = vrot.lane.b32.xlu0 %v8455_v52, %s7809_s18  ;;  %v8480_v16 = vrot.slane %v8476_v8, %v8000_v24 }
0x1468   :  { %v2230_v17 = vpop.permute.xlu1 %2229 }
0x14d7   :  { %v2438_v58 = vpop.permute.xlu0 %2437 }
0x14d8   :  { %6511 = vmatmul.mubr.msk.f32.vlgmr.msra.gmra.mrb[18].mxu1 %vm153_vm1, %v2438_v58 }
0x14d9   :  { %7152 = vmatpush3.bf16.msra.mxu1 %v7964_v10  ;;  %6540 = vmatprep.mubr.msk.f32.mxu1 %vm7816_vm0, %v7817_v1 }
0x14da   :  { %7153 = vmatprep.subr.bf16.mxu1 %v7815_v0 }
0x14dd   :  { %7155 = vmatpush3.bf16.msra.mxu1 %v7979_v14 }
0x14de   :  { %7156 = vmatprep.subr.bf16.mxu1 %v7815_v0 }
0x14e0   :  { %6541 = vmatmul.mubr.msk.f32.vlgmr.msra.gmra.mrb[20].mxu1 %vm153_vm1, %v2619_v53 }
0x14e1   :  { %7158 = vmatpush3.bf16.msra.mxu1 %v8031_v47  ;;  %6551 = vmatprep.mubr.msk.f32.mxu1 %vm7816_vm0, %v7817_v1 }
0x14e2   :  { %7159 = vmatprep.subr.bf16.mxu1 %v7815_v0 }
0x14e5   :  { %7161 = vmatpush3.bf16.msra.mxu1 %v8037_v49 }
0x14e6   :  { %7174 = vmatprep.subr.bf16.mxu1 %v7815_v0 }
0x15ab   :  { %v2507_v57 = vpop.f32.mrb[18].mxu1 }
0x15ac   :  { %v2508_v62 = vadd.f32 %v8107_v13, %v2507_v57  ;;  %v6512_v43 = vpop.f32.mrb[19].mxu1  ;;  %v2232_v13 = vadd.f32 %v2230_v17, %v8388_v39 }
0x15ae   :  { %v5789_v54 = vadd.f32 -1.0, %v2508_v62  ;;  %v2233_v21 = vadd.f32 %v2232_v13, %v8131_v44 }
0x15b0   :  { %v5790_v11 = vmul.f32 -1.442695, %v5789_v54  ;;  %v2234_v25 = vmul.f32 %v2233_v21, %v2233_v21 }
0x15b2   :  { %7524 = vpow2.f32 %v5790_v11  ;;  %v2242_v30 = vrot.slane %v2234_v25, %v8000_v24 }
0x15b3   :  { %v2688_v59 = vpop.f32.mrb[20].mxu1 }
0x15b4   :  { %v2692_v18 = vadd.f32 %v2688_v59, %v8480_v16  ;;  %v6542_v19 = vpop.f32.mrb[21].mxu1 }
0x15b6   :  { %7526 = vtanh.f32 %v2692_v18  ;;  %v5793_v39 = vmul.f32 -1.442695, %v2692_v18 }
0x15bc   :  { %v7525_v63 = vpop.eup %7524 }
0x15bd   :  { %v2515_v23 = vadd.f32 1.0, %v7525_v63 }
0x15bf   :  { %7528 = vrcp.f32 %v2515_v23 }
0x15c0   :  { %v7527_v26 = vpop.eup %7526  ;;  %7530 = vpow2.f32 %v5793_v39 }
0x15c1   :  { %2702 = vrot.lane.b32.xlu1 %v7527_v26, %s7819_s15 }
0x15c5   :  { %2243 = vrot.lane.b32.xlu1 %v2242_v30, %s7809_s18 }
0x15c9   :  { %v7529_v31 = vpop.eup %7528 }
0x15ca   :  { %v2518_v32 = vmul.f32 %v7529_v31, %v2508_v62  ;;  %v7531_v29 = vpop.eup %7530 }
0x15cb   :  { %v2696_v20 = vadd.f32 1.0, %v7531_v29 }
0x15cc   :  { %6530 = vmatmul.mubr.msk.f32.vlgmr.msra.gmra.mrb[22].mxu0 %vm492_vm2, %v2518_v32 }
0x15cd   :  { %7164 = vmatpush3.bf16.msra.mxu0 %v8070_v61  ;;  %6570 = vmatprep.mubr.msk.f32.mxu0 %vm7816_vm0, %v7817_v1  ;;  %7532 = vrcp.f32 %v2696_v20 }
0x15ce   :  { %7165 = vmatprep.subr.bf16.mxu0 %v7815_v0 }
0x15d1   :  { %7167 = vmatpush3.bf16.msra.mxu0 %v8080_v2 }
0x15d2   :  { %7168 = vmatprep.subr.bf16.mxu0 %v7815_v0 }
0x15d5   :  { %7170 = vmatpush3.bf16.msra.mxu0 %v8090_v6 }
0x15d6   :  { %7171 = vmatprep.subr.bf16.mxu0 %v7815_v0 }
0x15d7   :  { %v7533_v28 = vpop.eup %7532 }
0x15d8   :  { %v2700_v22 = vmul.f32 %v7533_v28, %v8377_v45 }
0x15d9   :  { %7173 = vmatpush3.bf16.msra.mxu0 %v8100_v12 }
0x15da   :  { %7186 = vmatprep.subr.bf16.mxu0 %v7815_v0 }
0x1633   :  { %v2703_v15 = vpop.permute.xlu1 %2702 }
0x1634   :  { %v2705_v33 = vmul.f32 %v7533_v28, %v2703_v15 }
0x1636   :  { %2707 = vrot.lane.b32.xlu1 %v2705_v33, %s7809_s18 }
0x1637   :  { %v2244_v34 = vpop.permute.xlu1 %2243 }
0x1638   :  { %v2246_v35 = vsel %vm606_vm3, %v2244_v34, 0.0 }
0x165a   :  { %2247 = vadd.xlane.f32.xlu1 %v2246_v35 }
0x169f   :  { %v8501_v36 = vpop.f32.mrb[22].mxu0 }
0x16a0   :  { %v6531_v3 = vpop.f32.mrb[23].mxu0 }
0x16a8   :  { %v2708_v37 = vpop.permute.xlu1 %2707 }
0x16a9   :  { %v8504_v40 = vadd.f32 %v2708_v37, %v2700_v22 }
0x16ab   :  { %7534 = vtanh.f32 %v8504_v40 }
0x16b5   :  { %v7535_v41 = vpop.eup %7534 }
0x16b6   :  { %2713 = vrot.lane.b32.xlu0 %v7535_v41, %s7819_s15 }
0x16ba   :  { %2717 = vrot.lane.b32.xlu0 %v8512_v50, %s7820_s16 }
0x16e7   :  { %v2248_v51 = vpop.xlane.xlu1 %2247 }
0x16e8   :  { %v2249_v55 = vmul.f32 0.03125, %v2248_v51 }
0x16ea   :  { %v2250_v45 = vadd.f32 %v2249_v55, %v8158_v7 }
0x16ec   :  { %7536 = vrsqrt.f32 %v2250_v45 }
0x16f6   :  { %v7537_v62 = vpop.eup %7536 }
0x16f7   :  { %v8523_v59 = vmul.f32 %v7537_v62, %v2233_v21  ;;  %v8559_v21 = vld [vmem:[%s9185_s7] ss:$0 sm:$0xff] }
0x16f9   :  { %v2923_v17 = vrot.slane %v8523_v59, %v8000_v24 }
0x1728   :  { %v2714_v58 = vpop.permute.xlu0 %2713 }
0x1729   :  { %v2716_v53 = vmul.f32 %v7533_v28, %v2714_v58 }
0x172b   :  { %v3280_v57 = vrot.slane %v2716_v53, %v8000_v24 }
0x172c   :  { %v2718_v43 = vpop.permute.xlu0 %2717 }
0x172d   :  { %v8518_v54 = vadd.f32 %v2718_v43, %v2716_v53  ;;  %3281 = vrot.lane.b32.xlu1 %v3280_v57, %s7809_s18 }
0x172f   :  { %v2728_v11 = vrot.slane %v8518_v54, %v8000_v24 }
0x1731   :  { %2729 = vrot.lane.b32.xlu0 %v2728_v11, %s7809_s18 }
0x1735   :  { %2924 = vrot.lane.b32.xlu0 %v2923_v17, %s7809_s18 }
0x1739   :  { %2999 = vrot.lane.b32.xlu0 %v8451_v56, %s7809_s18 }
0x17a3   :  { %v2730_v18 = vpop.permute.xlu0 %2729 }
0x17a4   :  { %6552 = vmatmul.mubr.msk.f32.vlgmr.msra.gmra.mrb[22].mxu1 %vm153_vm1, %v2730_v18 }
0x17a5   :  { %7176 = vmatpush3.bf16.msra.mxu1 %v7951_v5  ;;  %6581 = vmatprep.mubr.msk.f32.mxu1 %vm7816_vm0, %v7817_v1 }
0x17a6   :  { %7177 = vmatprep.subr.bf16.mxu1 %v7815_v0 }
0x17a7   :  { %v2925_v19 = vpop.permute.xlu0 %2924 }
0x17a9   :  { %7179 = vmatpush3.bf16.msra.mxu1 %v7962_v9 }
0x17aa   :  { %7180 = vmatprep.subr.bf16.mxu1 %v7815_v0 }
0x17ab   :  { %v3000_v56 = vpop.permute.xlu0 %2999 }
0x17ac   :  { %6582 = vmatmul.mubr.msk.f32.vlgmr.msra.gmra.mrb[24].mxu1 %vm153_vm1, %v2925_v19 }
0x17ad   :  { %7182 = vmatpush3.bf16.msra.mxu1 %v7964_v10  ;;  %6592 = vmatprep.mubr.msk.f32.mxu1 %vm7816_vm0, %v7817_v1 }
0x17ae   :  { %7183 = vmatprep.subr.bf16.mxu1 %v7815_v0 }
0x17b1   :  { %7185 = vmatpush3.bf16.msra.mxu1 %v7979_v14 }
0x17b2   :  { %7192 = vmatprep.subr.bf16.mxu1 %v7815_v0 }
0x17b4   :  { %6593 = vmatmul.mubr.msk.f32.vlgmr.msra.gmra.mrb[24].mxu1 %vm153_vm1, %v3000_v56 }
0x17b5   :  { %7194 = vmatpush3.bf16.msra.mxu1 %v8070_v61  ;;  %6622 = vmatprep.mubr.msk.f32.mxu1 %vm7816_vm0, %v7817_v1 }
0x17b6   :  { %7195 = vmatprep.subr.bf16.mxu1 %v7815_v0 }
0x17b9   :  { %7197 = vmatpush3.bf16.msra.mxu1 %v8080_v2 }
0x17ba   :  { %7198 = vmatprep.subr.bf16.mxu1 %v7815_v0 }
0x17bd   :  { %7200 = vmatpush3.bf16.msra.mxu1 %v8090_v6 }
0x17be   :  { %7201 = vmatprep.subr.bf16.mxu1 %v7815_v0 }
0x17c1   :  { %7203 = vmatpush3.bf16.msra.mxu1 %v8100_v12 }
0x17c2   :  { %7216 = vmatprep.subr.bf16.mxu1 %v7815_v0 }
0x1877   :  { %v2799_v13 = vpop.f32.mrb[22].mxu1 }
0x1878   :  { %v2800_v63 = vadd.f32 %v8559_v21, %v2799_v13  ;;  %v6553_v23 = vpop.f32.mrb[23].mxu1 }
0x187a   :  { %v5795_v25 = vadd.f32 -1.0, %v2800_v63 }
0x187c   :  { %v5796_v26 = vmul.f32 -1.442695, %v5795_v25 }
0x187e   :  { %7538 = vpow2.f32 %v5796_v26 }
0x1887   :  { %v3069_v30 = vpop.f32.mrb[24].mxu1 }
0x1888   :  { %v7539_v31 = vpop.eup %7538  ;;  %v7399_v32 = vadd.f32 %v8429_v27, %v3069_v30  ;;  %v6594_v39 = vpop.f32.mrb[25].mxu1 }
0x1889   :  { %v2807_v29 = vadd.f32 1.0, %v7539_v31 }
0x188a   :  { %7540 = vtanh.f32 %v7399_v32  ;;  %v5800_v33 = vmul.f32 -1.442695, %v7399_v32 }
0x188b   :  { %7542 = vrcp.f32 %v2807_v29 }
0x188c   :  { %7544 = vpow2.f32 %v5800_v33 }
0x1894   :  { %v7541_v20 = vpop.eup %7540 }
0x1895   :  { %v7543_v28 = vpop.eup %7542  ;;  %3083 = vrot.lane.b32.xlu0 %v7541_v20, %s7819_s15 }
0x1896   :  { %v2810_v15 = vmul.f32 %v7543_v28, %v2800_v63  ;;  %v7545_v34 = vpop.eup %7544  ;;  %v267_v63 = vcombine.high %v8480_v16, %v8480_v16 }
0x1897   :  { %v3077_v35 = vadd.f32 1.0, %v7545_v34 }
0x1898   :  { %6571 = vmatmul.mubr.msk.f32.vlgmr.msra.gmra.mrb[24].mxu0 %vm492_vm2, %v2810_v15 }
0x1899   :  { %7188 = vmatpush3.bf16.msra.mxu0 %v8031_v47  ;;  %6603 = vmatprep.mubr.msk.f32.mxu0 %vm7816_vm0, %v7817_v1  ;;  %7546 = vrcp.f32 %v3077_v35 }
0x189a   :  { %7189 = vmatprep.subr.bf16.mxu0 %v7815_v0 }
0x189d   :  { %7191 = vmatpush3.bf16.msra.mxu0 %v8037_v49 }
0x189e   :  { %7204 = vmatprep.subr.bf16.mxu0 %v7815_v0 }
0x18a3   :  { %v7547_v3 = vpop.eup %7546 }
0x18a4   :  { %v3081_v55 = vmul.f32 %v7547_v3, %v8442_v42 }
0x1907   :  { %v3084_v22 = vpop.permute.xlu0 %3083 }
0x1908   :  { %v3086_v37 = vmul.f32 %v7547_v3, %v3084_v22 }
0x190a   :  { %3088 = vrot.lane.b32.xlu0 %v3086_v37, %s7809_s18 }
0x196b   :  { %v2880_v41 = vpop.f32.mrb[24].mxu0 }
0x196c   :  { %v6572_v51 = vpop.f32.mrb[25].mxu0  ;;  %v2891_v42 = vrot.slane %v2880_v41, %v8000_v24 }
0x197c   :  { %v3089_v45 = vpop.permute.xlu0 %3088 }
0x197d   :  { %v8573_v58 = vadd.f32 %v3089_v45, %v3081_v55 }
0x197f   :  { %7548 = vtanh.f32 %v8573_v58 }
0x1989   :  { %v7549_v53 = vpop.eup %7548 }
0x198a   :  { %3094 = vrot.lane.b32.xlu0 %v7549_v53, %s7819_s15 }
0x19fc   :  { %v3095_v57 = vpop.permute.xlu0 %3094 }
0x19fd   :  { %v8577_v62 = vmul.f32 %v7547_v3, %v3095_v57 }
0x19ff   :  { %v8581_v43 = vadd.f32 %v8577_v62, %v8523_v59  ;;  %v3282_v59 = vpop.permute.xlu1 %3281 }
0x1a01   :  { %3100 = vrot.lane.b32.xlu0 %v8581_v43, %s7809_s18 }
0x1a05   :  { %2892 = vrot.lane.b32.xlu0 %v2891_v42, %s7820_s16 }
0x1a73   :  { %v3101_v11 = vpop.permute.xlu0 %3100 }
0x1a74   :  { %6604 = vmatmul.mubr.msk.f32.vlgmr.msra.gmra.mrb[26].mxu0 %vm153_vm1, %v3101_v11 }
0x1a75   :  { %7206 = vmatpush3.bf16.msra.mxu0 %v7964_v10  ;;  %6633 = vmatprep.mubr.msk.f32.mxu0 %vm7816_vm0, %v7817_v1 }
0x1a76   :  { %7207 = vmatprep.subr.bf16.mxu0 %v7815_v0 }
0x1a77   :  { %v2893_v25 = vpop.permute.xlu0 %2892 }
0x1a78   :  { %v2895_v31 = vadd.f32 %v2893_v25, %v8518_v54 }
0x1a79   :  { %7209 = vmatpush3.bf16.msra.mxu0 %v7979_v14 }
0x1a7a   :  { %7210 = vmatprep.subr.bf16.mxu0 %v7815_v0  ;;  %v2896_v32 = vadd.f32 %v2895_v31, %v8131_v44 }
0x1a7c   :  { %6634 = vmatmul.mubr.msk.f32.vlgmr.msra.gmra.mrb[28].mxu0 %vm153_vm1, %v3282_v59  ;;  %v2897_v20 = vmul.f32 %v2896_v32, %v2896_v32  ;;  %v145_v59 = vcombine.high %v8512_v50, %v8512_v50 }
0x1a7d   :  { %7212 = vmatpush3.bf16.msra.mxu0 %v8031_v47  ;;  %6644 = vmatprep.mubr.msk.f32.mxu0 %vm7816_vm0, %v7817_v1 }
0x1a7e   :  { %7213 = vmatprep.subr.bf16.mxu0 %v7815_v0  ;;  %v2905_v15 = vrot.slane %v2897_v20, %v8000_v24 }
0x1a81   :  { %7215 = vmatpush3.bf16.msra.mxu0 %v8037_v49 }
0x1a82   :  { %7228 = vmatprep.subr.bf16.mxu0 %v7815_v0 }
0x1b47   :  { %v3170_v17 = vpop.f32.mrb[26].mxu0 }
0x1b48   :  { %v3171_v18 = vadd.f32 %v8559_v21, %v3170_v17  ;;  %v6605_v19 = vpop.f32.mrb[27].mxu0 }
0x1b4a   :  { %v5802_v56 = vadd.f32 -1.0, %v3171_v18 }
0x1b4c   :  { %v5803_v13 = vmul.f32 -1.442695, %v5802_v56 }
0x1b4e   :  { %7550 = vpow2.f32 %v5803_v13 }
0x1b4f   :  { %v3351_v23 = vpop.f32.mrb[28].mxu0 }
0x1b50   :  { %v3355_v26 = vadd.f32 %v3351_v23, %v267_v63  ;;  %v6635_v30 = vpop.f32.mrb[29].mxu0 }
0x1b52   :  { %7552 = vtanh.f32 %v3355_v26  ;;  %v5806_v54 = vmul.f32 -1.442695, %v3355_v26 }
0x1b58   :  { %v7551_v39 = vpop.eup %7550 }
0x1b59   :  { %v3178_v29 = vadd.f32 1.0, %v7551_v39 }
0x1b5b   :  { %7554 = vrcp.f32 %v3178_v29 }
0x1b5c   :  { %v7553_v28 = vpop.eup %7552  ;;  %7556 = vpow2.f32 %v5806_v54 }
0x1b5d   :  { %3365 = vrot.lane.b32.xlu0 %v7553_v28, %s7819_s15 }
0x1b61   :  { %2906 = vrot.lane.b32.xlu0 %v2905_v15, %s7809_s18 }
0x1b65   :  { %v7555_v16 = vpop.eup %7554 }
0x1b66   :  { %v3181_v33 = vmul.f32 %v7555_v16, %v3171_v18  ;;  %v7557_v34 = vpop.eup %7556 }
0x1b67   :  { %v3359_v35 = vadd.f32 1.0, %v7557_v34 }
0x1b68   :  { %6623 = vmatmul.mubr.msk.f32.vlgmr.msra.gmra.mrb[26].mxu1 %vm492_vm2, %v3181_v33 }
0x1b69   :  { %7218 = vmatpush3.bf16.msra.mxu1 %v8070_v61  ;;  %6663 = vmatprep.mubr.msk.f32.mxu1 %vm7816_vm0, %v7817_v1  ;;  %7558 = vrcp.f32 %v3359_v35 }
0x1b6a   :  { %7219 = vmatprep.subr.bf16.mxu1 %v7815_v0 }
0x1b6d   :  { %7221 = vmatpush3.bf16.msra.mxu1 %v8080_v2 }
0x1b6e   :  { %7222 = vmatprep.subr.bf16.mxu1 %v7815_v0 }
0x1b71   :  { %7224 = vmatpush3.bf16.msra.mxu1 %v8090_v6 }
0x1b72   :  { %7225 = vmatprep.subr.bf16.mxu1 %v7815_v0 }
0x1b73   :  { %v7559_v3 = vpop.eup %7558 }
0x1b74   :  { %v3363_v53 = vmul.f32 %v7559_v3, %v8504_v40 }
0x1b75   :  { %7227 = vmatpush3.bf16.msra.mxu1 %v8100_v12 }
0x1b76   :  { %7240 = vmatprep.subr.bf16.mxu1 %v7815_v0 }
0x1bcf   :  { %v3366_v22 = vpop.permute.xlu0 %3365 }
0x1bd0   :  { %v3368_v37 = vmul.f32 %v7559_v3, %v3366_v22 }
0x1bd2   :  { %3370 = vrot.lane.b32.xlu0 %v3368_v37, %s7809_s18 }
0x1bd3   :  { %v2907_v41 = vpop.permute.xlu0 %2906 }
0x1bd4   :  { %v2909_v51 = vsel %vm606_vm3, %v2907_v41, 0.0 }
0x1bf1   :  { %2910 = vadd.xlane.f32.xlu0 %v2909_v51 }
0x1c3b   :  { %v8622_v55 = vpop.f32.mrb[26].mxu1 }
0x1c3c   :  { %v6624_v45 = vpop.f32.mrb[27].mxu1 }
0x1c44   :  { %v3371_v57 = vpop.permute.xlu0 %3370 }
0x1c45   :  { %v8625_v42 = vadd.f32 %v3371_v57, %v3363_v53 }
0x1c47   :  { %7560 = vtanh.f32 %v8625_v42 }
0x1c51   :  { %v7561_v11 = vpop.eup %7560 }
0x1c52   :  { %3376 = vrot.lane.b32.xlu1 %v7561_v11, %s7819_s15 }
0x1c56   :  { %3380 = vrot.lane.b32.xlu1 %v145_v59, %s7820_s16 }
0x1c7e   :  { %v2911_v17 = vpop.xlane.xlu0 %2910 }
0x1c7f   :  { %v2912_v18 = vmul.f32 0.03125, %v2911_v17 }
0x1c81   :  { %v2913_v19 = vadd.f32 %v2912_v18, %v8158_v7 }
0x1c83   :  { %7562 = vrsqrt.f32 %v2913_v19 }
0x1c8d   :  { %v7563_v13 = vpop.eup %7562 }
0x1c8e   :  { %v8640_v26 = vmul.f32 %v7563_v13, %v2896_v32 }
0x1c90   :  { %v3586_v50 = vrot.slane %v8640_v26, %v8000_v24 }
0x1cc4   :  { %v3377_v56 = vpop.permute.xlu1 %3376 }
0x1cc5   :  { %v8633_v40 = vmul.f32 %v7559_v3, %v3377_v56 }
0x1cc7   :  { %v3943_v13 = vrot.slane %v8633_v40, %v8000_v24 }
0x1cc8   :  { %v3381_v63 = vpop.permute.xlu1 %3380 }
0x1cc9   :  { %v8636_v23 = vadd.f32 %v3381_v63, %v8633_v40 }
0x1ccb   :  { %v3391_v25 = vrot.slane %v8636_v23, %v8000_v24 }
0x1ccd   :  { %3392 = vrot.lane.b32.xlu1 %v3391_v25, %s7809_s18 }
0x1cd1   :  { %3587 = vrot.lane.b32.xlu1 %v3586_v50, %s7809_s18 }
0x1cd5   :  { %3662 = vrot.lane.b32.xlu1 %v8577_v62, %s7809_s18 }
0x1d3f   :  { %v3393_v30 = vpop.permute.xlu1 %3392 }
0x1d40   :  { %6645 = vmatmul.mubr.msk.f32.vlgmr.msra.gmra.mrb[30].mxu0 %vm153_vm1, %v3393_v30 }
0x1d41   :  { %7230 = vmatpush3.bf16.msra.mxu0 %v7951_v5  ;;  %6674 = vmatprep.mubr.msk.f32.mxu0 %vm7816_vm0, %v7817_v1 }
0x1d42   :  { %7231 = vmatprep.subr.bf16.mxu0 %v7815_v0 }
0x1d43   :  { %v3588_v31 = vpop.permute.xlu1 %3587 }
0x1d45   :  { %7233 = vmatpush3.bf16.msra.mxu0 %v7962_v9 }
0x1d46   :  { %7234 = vmatprep.subr.bf16.mxu0 %v7815_v0 }
0x1d47   :  { %v3663_v62 = vpop.permute.xlu1 %3662 }
0x1d48   :  { %6675 = vmatmul.mubr.msk.f32.vlgmr.msra.gmra.mrb[32].mxu0 %vm153_vm1, %v3588_v31 }
0x1d49   :  { %7236 = vmatpush3.bf16.msra.mxu0 %v7964_v10  ;;  %6685 = vmatprep.mubr.msk.f32.mxu0 %vm7816_vm0, %v7817_v1 }
0x1d4a   :  { %7237 = vmatprep.subr.bf16.mxu0 %v7815_v0 }
0x1d4d   :  { %7239 = vmatpush3.bf16.msra.mxu0 %v7979_v14 }
0x1d4e   :  { %7246 = vmatprep.subr.bf16.mxu0 %v7815_v0 }
0x1d50   :  { %6686 = vmatmul.mubr.msk.f32.vlgmr.msra.gmra.mrb[32].mxu0 %vm153_vm1, %v3663_v62 }
0x1d51   :  { %7248 = vmatpush3.bf16.msra.mxu0 %v8070_v61  ;;  %6715 = vmatprep.mubr.msk.f32.mxu0 %vm7816_vm0, %v7817_v1 }
0x1d52   :  { %7249 = vmatprep.subr.bf16.mxu0 %v7815_v0 }
0x1d55   :  { %7251 = vmatpush3.bf16.msra.mxu0 %v8080_v2 }
0x1d56   :  { %7252 = vmatprep.subr.bf16.mxu0 %v7815_v0 }
0x1d59   :  { %7254 = vmatpush3.bf16.msra.mxu0 %v8090_v6 }
0x1d5a   :  { %7255 = vmatprep.subr.bf16.mxu0 %v7815_v0 }
0x1d5d   :  { %7257 = vmatpush3.bf16.msra.mxu0 %v8100_v12 }
0x1d5e   :  { %7270 = vmatprep.subr.bf16.mxu0 %v7815_v0 }
0x1e13   :  { %v3462_v32 = vpop.f32.mrb[30].mxu0 }
0x1e14   :  { %v3463_v39 = vadd.f32 %v8559_v21, %v3462_v32  ;;  %v6646_v29 = vpop.f32.mrb[31].mxu0  ;;  %v252_v32 = vcombine.high %v8476_v8, %v8476_v8 }
0x1e16   :  { %v5808_v20 = vadd.f32 -1.0, %v3463_v39 }
0x1e18   :  { %v5809_v28 = vmul.f32 -1.442695, %v5808_v20  ;;  %v8720_v20 = vrot.slane %v252_v32, %v8000_v24 }
0x1e1a   :  { %7564 = vpow2.f32 %v5809_v28 }
0x1e23   :  { %v3732_v15 = vpop.f32.mrb[32].mxu0 }
0x1e24   :  { %v7565_v16 = vpop.eup %7564  ;;  %v7400_v33 = vadd.f32 %v8429_v27, %v3732_v15  ;;  %v6687_v54 = vpop.f32.mrb[33].mxu0 }
0x1e25   :  { %v3470_v34 = vadd.f32 1.0, %v7565_v16 }
0x1e26   :  { %7566 = vtanh.f32 %v7400_v33  ;;  %v5813_v37 = vmul.f32 -1.442695, %v7400_v33 }
0x1e27   :  { %7568 = vrcp.f32 %v3470_v34 }
0x1e28   :  { %7570 = vpow2.f32 %v5813_v37 }
0x1e30   :  { %v7567_v35 = vpop.eup %7566 }
0x1e31   :  { %v7569_v3 = vpop.eup %7568  ;;  %3746 = vrot.lane.b32.xlu1 %v7567_v35, %s7819_s15 }
0x1e32   :  { %v3473_v22 = vmul.f32 %v7569_v3, %v3463_v39  ;;  %v7571_v41 = vpop.eup %7570 }
0x1e33   :  { %v3740_v51 = vadd.f32 1.0, %v7571_v41 }
0x1e34   :  { %6664 = vmatmul.mubr.msk.f32.vlgmr.msra.gmra.mrb[28].mxu1 %vm492_vm2, %v3473_v22 }
0x1e35   :  { %7242 = vmatpush3.bf16.msra.mxu1 %v8031_v47  ;;  %6696 = vmatprep.mubr.msk.f32.mxu1 %vm7816_vm0, %v7817_v1  ;;  %7572 = vrcp.f32 %v3740_v51 }
0x1e36   :  { %7243 = vmatprep.subr.bf16.mxu1 %v7815_v0 }
0x1e39   :  { %7245 = vmatpush3.bf16.msra.mxu1 %v8037_v49 }
0x1e3a   :  { %7258 = vmatprep.subr.bf16.mxu1 %v7815_v0 }
0x1e3f   :  { %v7573_v45 = vpop.eup %7572 }
0x1e40   :  { %v3744_v17 = vmul.f32 %v7573_v45, %v8573_v58 }
0x1ea3   :  { %v3747_v53 = vpop.permute.xlu1 %3746 }
0x1ea4   :  { %v3749_v57 = vmul.f32 %v7573_v45, %v3747_v53 }
0x1ea6   :  { %3751 = vrot.lane.b32.xlu1 %v3749_v57, %s7809_s18 }
0x1f07   :  { %v3543_v11 = vpop.f32.mrb[28].mxu1 }
0x1f08   :  { %v6665_v59 = vpop.f32.mrb[29].mxu1  ;;  %v3554_v63 = vrot.slane %v3543_v11, %v8000_v24 }
0x1f18   :  { %v3752_v18 = vpop.permute.xlu1 %3751 }
0x1f19   :  { %v8685_v19 = vadd.f32 %v3752_v18, %v3744_v17 }
0x1f1b   :  { %7574 = vtanh.f32 %v8685_v19 }
0x1f25   :  { %v7575_v56 = vpop.eup %7574 }
0x1f26   :  { %3757 = vrot.lane.b32.xlu1 %v7575_v56, %s7819_s15 }
0x1f2a   :  { %3944 = vrot.lane.b32.xlu1 %v3943_v13, %s7809_s18 }
0x1f2e   :  { %3555 = vrot.lane.b32.xlu1 %v3554_v63, %s7820_s16 }
0x1f98   :  { %v3758_v25 = vpop.permute.xlu1 %3757 }
0x1f99   :  { %v8694_v50 = vmul.f32 %v7573_v45, %v3758_v25 }
0x1f9b   :  { %v8698_v58 = vadd.f32 %v8694_v50, %v8640_v26 }
0x1f9c   :  { %v3945_v40 = vpop.permute.xlu1 %3944 }
0x1f9d   :  { %3763 = vrot.lane.b32.xlu0 %v8698_v58, %s7809_s18 }
0x1fa0   :  { %v3556_v15 = vpop.permute.xlu1 %3555 }
0x1fa1   :  { %v3558_v54 = vadd.f32 %v3556_v15, %v8636_v23 }
0x1fa3   :  { %v3559_v34 = vadd.f32 %v3558_v54, %v8131_v44 }
0x1fa5   :  { %v3560_v8 = vmul.f32 %v3559_v34, %v3559_v34 }
0x1fa7   :  { %v3568_v37 = vrot.slane %v3560_v8, %v8000_v24 }
0x200f   :  { %v3764_v30 = vpop.permute.xlu0 %3763 }
0x2010   :  { %6697 = vmatmul.mubr.msk.f32.vlgmr.msra.gmra.mrb[30].mxu1 %vm153_vm1, %v3764_v30 }
0x2011   :  { %7260 = vmatpush3.bf16.msra.mxu1 %v7964_v10  ;;  %6726 = vmatprep.mubr.msk.f32.mxu1 %vm7816_vm0, %v7817_v1 }
0x2012   :  { %7261 = vmatprep.subr.bf16.mxu1 %v7815_v0 }
0x2015   :  { %7263 = vmatpush3.bf16.msra.mxu1 %v7979_v14 }
0x2016   :  { %7264 = vmatprep.subr.bf16.mxu1 %v7815_v0 }
0x2018   :  { %6727 = vmatmul.mubr.msk.f32.vlgmr.msra.gmra.mrb[32].mxu1 %vm153_vm1, %v3945_v40  ;;  %v130_v40 = vcombine.high %v8508_v46, %v8508_v46 }
0x2019   :  { %7266 = vmatpush3.bf16.msra.mxu1 %v8031_v47  ;;  %6737 = vmatprep.mubr.msk.f32.mxu1 %vm7816_vm0, %v7817_v1 }
0x201a   :  { %7267 = vmatprep.subr.bf16.mxu1 %v7815_v0 }
0x201d   :  { %7269 = vmatpush3.bf16.msra.mxu1 %v8037_v49 }
0x201e   :  { %7282 = vmatprep.subr.bf16.mxu1 %v7815_v0 }
0x20e3   :  { %v3833_v26 = vpop.f32.mrb[30].mxu1 }
0x20e4   :  { %v3834_v31 = vadd.f32 %v8559_v21, %v3833_v26  ;;  %v6698_v62 = vpop.f32.mrb[31].mxu1 }
0x20e6   :  { %v5815_v39 = vadd.f32 -1.0, %v3834_v31 }
0x20e8   :  { %v5816_v29 = vmul.f32 -1.442695, %v5815_v39 }
0x20ea   :  { %7576 = vpow2.f32 %v5816_v29 }
0x20eb   :  { %v4014_v28 = vpop.f32.mrb[32].mxu1 }
0x20ec   :  { %v4018_v16 = vadd.f32 %v4014_v28, %v8720_v20  ;;  %v6728_v33 = vpop.f32.mrb[33].mxu1 }
0x20ee   :  { %7578 = vtanh.f32 %v4018_v16  ;;  %v5819_v23 = vmul.f32 -1.442695, %v4018_v16 }
0x20f4   :  { %v7577_v35 = vpop.eup %7576 }
0x20f5   :  { %v3841_v3 = vadd.f32 1.0, %v7577_v35 }
0x20f7   :  { %7580 = vrcp.f32 %v3841_v3 }
0x20f8   :  { %v7579_v22 = vpop.eup %7578  ;;  %7582 = vpow2.f32 %v5819_v23 }
0x20f9   :  { %4028 = vrot.lane.b32.xlu1 %v7579_v22, %s7819_s15 }
0x20fd   :  { %3569 = vrot.lane.b32.xlu1 %v3568_v37, %s7809_s18 }
0x2101   :  { %v7581_v41 = vpop.eup %7580 }
0x2102   :  { %v3844_v51 = vmul.f32 %v7581_v41, %v3834_v31  ;;  %v7583_v45 = vpop.eup %7582  ;;  %v8751_v31 = vrot.slane %v130_v40, %v8000_v24 }
0x2103   :  { %v4022_v53 = vadd.f32 1.0, %v7583_v45 }
0x2104   :  { %6716 = vmatmul.mubr.msk.f32.vlgmr.msra.gmra.mrb[34].mxu0 %vm492_vm2, %v3844_v51 }
0x2105   :  { %7272 = vmatpush3.bf16.msra.mxu0 %v8070_v61  ;;  %6756 = vmatprep.mubr.msk.f32.mxu0 %vm7816_vm0, %v7817_v1  ;;  %7584 = vrcp.f32 %v4022_v53 }
0x2106   :  { %7273 = vmatprep.subr.bf16.mxu0 %v7815_v0 }
0x2109   :  { %7275 = vmatpush3.bf16.msra.mxu0 %v8080_v2 }
0x210a   :  { %7276 = vmatprep.subr.bf16.mxu0 %v7815_v0 }
0x210d   :  { %7278 = vmatpush3.bf16.msra.mxu0 %v8090_v6 }
0x210e   :  { %7279 = vmatprep.subr.bf16.mxu0 %v7815_v0 }
0x210f   :  { %v7585_v57 = vpop.eup %7584 }
0x2110   :  { %v4026_v63 = vmul.f32 %v7585_v57, %v8625_v42 }
0x2111   :  { %7281 = vmatpush3.bf16.msra.mxu0 %v8100_v12 }
0x2112   :  { %7294 = vmatprep.subr.bf16.mxu0 %v7815_v0 }
0x216b   :  { %v4029_v11 = vpop.permute.xlu1 %4028 }
0x216c   :  { %v4031_v59 = vmul.f32 %v7585_v57, %v4029_v11 }
0x216e   :  { %4033 = vrot.lane.b32.xlu1 %v4031_v59, %s7809_s18 }
0x216f   :  { %v3570_v17 = vpop.permute.xlu1 %3569 }
0x2170   :  { %v3572_v18 = vsel %vm606_vm3, %v3570_v17, 0.0 }
0x2192   :  { %3573 = vadd.xlane.f32.xlu1 %v3572_v18 }
0x21d7   :  { %v8741_v56 = vpop.f32.mrb[34].mxu0 }
0x21d8   :  { %v6717_v13 = vpop.f32.mrb[35].mxu0 }
0x21e0   :  { %v4034_v25 = vpop.permute.xlu1 %4033 }
0x21e1   :  { %v8744_v30 = vadd.f32 %v4034_v25, %v4026_v63 }
0x21e3   :  { %7586 = vtanh.f32 %v8744_v30 }
0x21ed   :  { %v7587_v26 = vpop.eup %7586 }
0x21ee   :  { %4039 = vrot.lane.b32.xlu0 %v7587_v26, %s7819_s15 }
0x21f2   :  { %4043 = vrot.lane.b32.xlu0 %v8751_v31, %s7820_s16 }
0x221f   :  { %v3574_v62 = vpop.xlane.xlu1 %3573 }
0x2220   :  { %v3575_v32 = vmul.f32 0.03125, %v3574_v62 }
0x2222   :  { %v3576_v42 = vadd.f32 %v3575_v32, %v8158_v7 }
0x2224   :  { %7588 = vrsqrt.f32 %v3576_v42 }
0x222e   :  { %v7589_v15 = vpop.eup %7588 }
0x222f   :  { %v8762_v54 = vmul.f32 %v7589_v15, %v3559_v34 }
0x2231   :  { %v4249_v35 = vrot.slane %v8762_v54, %v8000_v24 }
0x2260   :  { %v4040_v39 = vpop.permute.xlu0 %4039 }
0x2261   :  { %v4042_v29 = vmul.f32 %v7585_v57, %v4040_v39 }
0x2263   :  { %v4606_v28 = vrot.slane %v4042_v29, %v8000_v24 }
0x2264   :  { %v4044_v46 = vpop.permute.xlu0 %4043 }
0x2265   :  { %v8757_v16 = vadd.f32 %v4044_v46, %v4042_v29  ;;  %4607 = vrot.lane.b32.xlu1 %v4606_v28, %s7809_s18 }
0x2267   :  { %v4054_v33 = vrot.slane %v8757_v16, %v8000_v24 }
0x2269   :  { %4055 = vrot.lane.b32.xlu0 %v4054_v33, %s7809_s18 }
0x226d   :  { %4250 = vrot.lane.b32.xlu0 %v4249_v35, %s7809_s18 }
0x2271   :  { %4325 = vrot.lane.b32.xlu0 %v8694_v50, %s7809_s18 }
0x22db   :  { %v4056_v3 = vpop.permute.xlu0 %4055 }
0x22dc   :  { %6738 = vmatmul.mubr.msk.f32.vlgmr.msra.gmra.mrb[34].mxu1 %vm153_vm1, %v4056_v3 }
0x22dd   :  { %7284 = vmatpush3.bf16.msra.mxu1 %v7951_v5  ;;  %6767 = vmatprep.mubr.msk.f32.mxu1 %vm7816_vm0, %v7817_v1 }
0x22de   :  { %7285 = vmatprep.subr.bf16.mxu1 %v7815_v0 }
0x22df   :  { %v4251_v34 = vpop.permute.xlu0 %4250 }
0x22e1   :  { %7287 = vmatpush3.bf16.msra.mxu1 %v7962_v9 }
0x22e2   :  { %7288 = vmatprep.subr.bf16.mxu1 %v7815_v0 }
0x22e3   :  { %v4326_v50 = vpop.permute.xlu0 %4325 }
0x22e4   :  { %6768 = vmatmul.mubr.msk.f32.vlgmr.msra.gmra.mrb[36].mxu1 %vm153_vm1, %v4251_v34 }
0x22e5   :  { %7290 = vmatpush3.bf16.msra.mxu1 %v7964_v10  ;;  %6778 = vmatprep.mubr.msk.f32.mxu1 %vm7816_vm0, %v7817_v1 }
0x22e6   :  { %7291 = vmatprep.subr.bf16.mxu1 %v7815_v0 }
0x22e9   :  { %7293 = vmatpush3.bf16.msra.mxu1 %v7979_v14 }
0x22ea   :  { %7300 = vmatprep.subr.bf16.mxu1 %v7815_v0 }
0x22ec   :  { %6779 = vmatmul.mubr.msk.f32.vlgmr.msra.gmra.mrb[36].mxu1 %vm153_vm1, %v4326_v50 }
0x22ed   :  { %7302 = vmatpush3.bf16.msra.mxu1 %v8070_v61  ;;  %6808 = vmatprep.mubr.msk.f32.mxu1 %vm7816_vm0, %v7817_v1 }
0x22ee   :  { %7303 = vmatprep.subr.bf16.mxu1 %v7815_v0 }
0x22f1   :  { %7305 = vmatpush3.bf16.msra.mxu1 %v8080_v2 }
0x22f2   :  { %7306 = vmatprep.subr.bf16.mxu1 %v7815_v0 }
0x22f5   :  { %7308 = vmatpush3.bf16.msra.mxu1 %v8090_v6 }
0x22f6   :  { %7309 = vmatprep.subr.bf16.mxu1 %v7815_v0 }
0x22f9   :  { %7311 = vmatpush3.bf16.msra.mxu1 %v8100_v12 }
0x22fa   :  { %7324 = vmatprep.subr.bf16.mxu1 %v7815_v0 }
0x23af   :  { %v4125_v8 = vpop.f32.mrb[34].mxu1 }
0x23b0   :  { %v4126_v22 = vadd.f32 %v8559_v21, %v4125_v8  ;;  %v6739_v37 = vpop.f32.mrb[35].mxu1 }
0x23b1   :  { %v268_v37 = vcombine.high %v8720_v20, %v8720_v20 }
0x23b2   :  { %v5821_v41 = vadd.f32 -1.0, %v4126_v22 }
0x23b4   :  { %v5822_v51 = vmul.f32 -1.442695, %v5821_v41 }
0x23b6   :  { %7590 = vpow2.f32 %v5822_v51 }
0x23bf   :  { %v4395_v23 = vpop.f32.mrb[36].mxu1 }
0x23c0   :  { %v7591_v45 = vpop.eup %7590  ;;  %v7401_v53 = vadd.f32 %v8429_v27, %v4395_v23  ;;  %v6780_v57 = vpop.f32.mrb[37].mxu1 }
0x23c1   :  { %v4133_v11 = vadd.f32 1.0, %v7591_v45 }
0x23c2   :  { %7592 = vtanh.f32 %v7401_v53  ;;  %v5826_v27 = vmul.f32 -1.442695, %v7401_v53 }
0x23c3   :  { %7594 = vrcp.f32 %v4133_v11 }
0x23c4   :  { %7596 = vpow2.f32 %v5826_v27 }
0x23cc   :  { %v7593_v59 = vpop.eup %7592 }
0x23cd   :  { %v7595_v17 = vpop.eup %7594  ;;  %4409 = vrot.lane.b32.xlu0 %v7593_v59, %s7819_s15 }
0x23ce   :  { %v4136_v18 = vmul.f32 %v7595_v17, %v4126_v22  ;;  %v7597_v13 = vpop.eup %7596 }
0x23cf   :  { %v4403_v63 = vadd.f32 1.0, %v7597_v13 }
0x23d0   :  { %6757 = vmatmul.mubr.msk.f32.vlgmr.msra.gmra.mrb[36].mxu0 %vm492_vm2, %v4136_v18 }
0x23d1   :  { %7296 = vmatpush3.bf16.msra.mxu0 %v8031_v47  ;;  %6789 = vmatprep.mubr.msk.f32.mxu0 %vm7816_vm0, %v7817_v1  ;;  %7598 = vrcp.f32 %v4403_v63 }
0x23d2   :  { %7297 = vmatprep.subr.bf16.mxu0 %v7815_v0 }
0x23d5   :  { %7299 = vmatpush3.bf16.msra.mxu0 %v8037_v49 }
0x23d6   :  { %7312 = vmatprep.subr.bf16.mxu0 %v7815_v0 }
0x23db   :  { %v7599_v25 = vpop.eup %7598 }
0x23dc   :  { %v4407_v39 = vmul.f32 %v7599_v25, %v8685_v19  ;;  %v4608_v19 = vpop.permute.xlu1 %4607 }
0x243f   :  { %v4410_v40 = vpop.permute.xlu0 %4409 }
0x2440   :  { %v4412_v26 = vmul.f32 %v7599_v25, %v4410_v40 }
0x2442   :  { %4414 = vrot.lane.b32.xlu0 %v4412_v26, %s7809_s18 }
0x24a3   :  { %v4206_v62 = vpop.f32.mrb[36].mxu0 }
0x24a4   :  { %v4217_v32 = vrot.slane %v4206_v62, %v8000_v24  ;;  %v6758_v42 = vpop.f32.mrb[37].mxu0 }
0x24a6   :  { %4218 = vrot.lane.b32.xlu1 %v4217_v32, %s7820_s16 }
0x24b4   :  { %v4415_v29 = vpop.permute.xlu0 %4414 }
0x24b5   :  { %v8809_v28 = vadd.f32 %v4415_v29, %v4407_v39  ;;  %v146_v39 = vcombine.high %v8751_v31, %v8751_v31 }
0x24b7   :  { %7600 = vtanh.f32 %v8809_v28 }
0x24c1   :  { %v7601_v15 = vpop.eup %7600 }
0x24c2   :  { %4420 = vrot.lane.b32.xlu0 %v7601_v15, %s7819_s15 }
0x2518   :  { %v4219_v29 = vpop.permute.xlu1 %4218 }
0x2519   :  { %v4221_v15 = vadd.f32 %v4219_v29, %v8757_v16 }
0x2534   :  { %v4421_v46 = vpop.permute.xlu0 %4420 }
0x2535   :  { %v8813_v33 = vmul.f32 %v7599_v25, %v4421_v46 }
0x2537   :  { %v8817_v35 = vadd.f32 %v8813_v33, %v8762_v54 }
0x2539   :  { %4426 = vrot.lane.b32.xlu0 %v8817_v35, %s7809_s18 }
0x25ab   :  { %v4427_v3 = vpop.permute.xlu0 %4426 }
0x25ac   :  { %6790 = vmatmul.mubr.msk.f32.vlgmr.msra.gmra.mrb[38].mxu0 %vm153_vm1, %v4427_v3  ;;  %v4222_v3 = vadd.f32 %v4221_v15, %v8131_v44 }
0x25ad   :  { %7314 = vmatpush3.bf16.msra.mxu0 %v7964_v10  ;;  %6819 = vmatprep.mubr.msk.f32.mxu0 %vm7816_vm0, %v7817_v1 }
0x25ae   :  { %7315 = vmatprep.subr.bf16.mxu0 %v7815_v0 }
0x25b1   :  { %7317 = vmatpush3.bf16.msra.mxu0 %v7979_v14 }
0x25b2   :  { %7318 = vmatprep.subr.bf16.mxu0 %v7815_v0 }
0x25b4   :  { %6820 = vmatmul.mubr.msk.f32.vlgmr.msra.gmra.mrb[40].mxu0 %vm153_vm1, %v4608_v19 }
0x25b5   :  { %7320 = vmatpush3.bf16.msra.mxu0 %v8031_v47  ;;  %6830 = vmatprep.mubr.msk.f32.mxu0 %vm7816_vm0, %v7817_v1 }
0x25b6   :  { %7321 = vmatprep.subr.bf16.mxu0 %v7815_v0 }
0x25b9   :  { %7323 = vmatpush3.bf16.msra.mxu0 %v8037_v49 }
0x25ba   :  { %7336 = vmatprep.subr.bf16.mxu0 %v7815_v0 }
0x267f   :  { %v4496_v54 = vpop.f32.mrb[38].mxu0 }
0x2680   :  { %v4497_v34 = vadd.f32 %v8559_v21, %v4496_v54  ;;  %v6791_v50 = vpop.f32.mrb[39].mxu0 }
0x2682   :  { %v5828_v8 = vadd.f32 -1.0, %v4497_v34 }
0x2684   :  { %v5829_v22 = vmul.f32 -1.442695, %v5828_v8 }
0x2686   :  { %7602 = vpow2.f32 %v5829_v22 }
0x2687   :  { %v4677_v41 = vpop.f32.mrb[40].mxu0 }
0x2688   :  { %v4681_v51 = vadd.f32 %v4677_v41, %v268_v37  ;;  %v6821_v23 = vpop.f32.mrb[41].mxu0 }
0x268a   :  { %7604 = vtanh.f32 %v4681_v51  ;;  %v5832_v20 = vmul.f32 -1.442695, %v4681_v51 }
0x2690   :  { %v7603_v45 = vpop.eup %7602 }
0x2691   :  { %v4504_v53 = vadd.f32 1.0, %v7603_v45 }
0x2693   :  { %7606 = vrcp.f32 %v4504_v53 }
0x2694   :  { %v7605_v57 = vpop.eup %7604  ;;  %7608 = vpow2.f32 %v5832_v20 }
0x2695   :  { %4691 = vrot.lane.b32.xlu0 %v7605_v57, %s7819_s15 }
0x269d   :  { %v7607_v11 = vpop.eup %7606 }
0x269e   :  { %v4507_v59 = vmul.f32 %v7607_v11, %v4497_v34  ;;  %v7609_v17 = vpop.eup %7608  ;;  %v4223_v34 = vmul.f32 %v4222_v3, %v4222_v3 }
0x269f   :  { %v4685_v18 = vadd.f32 1.0, %v7609_v17 }
0x26a0   :  { %6809 = vmatmul.mubr.msk.f32.vlgmr.msra.gmra.mrb[38].mxu1 %vm492_vm2, %v4507_v59  ;;  %v4231_v50 = vrot.slane %v4223_v34, %v8000_v24 }
0x26a1   :  { %7326 = vmatpush3.bf16.msra.mxu1 %v8070_v61  ;;  %6849 = vmatprep.mubr.msk.f32.mxu1 %vm7816_vm0, %v7817_v1  ;;  %7610 = vrcp.f32 %v4685_v18 }
0x26a2   :  { %7327 = vmatprep.subr.bf16.mxu1 %v7815_v0 }
0x26a5   :  { %7329 = vmatpush3.bf16.msra.mxu1 %v8080_v2 }
0x26a6   :  { %7330 = vmatprep.subr.bf16.mxu1 %v7815_v0 }
0x26a9   :  { %7332 = vmatpush3.bf16.msra.mxu1 %v8090_v6 }
0x26aa   :  { %7333 = vmatprep.subr.bf16.mxu1 %v7815_v0 }
0x26ab   :  { %v7611_v27 = vpop.eup %7610 }
0x26ac   :  { %v4689_v26 = vmul.f32 %v7611_v27, %v8744_v30 }
0x26ad   :  { %7335 = vmatpush3.bf16.msra.mxu1 %v8100_v12 }
0x26ae   :  { %7348 = vmatprep.subr.bf16.mxu1 %v7815_v0 }
0x2707   :  { %v4692_v13 = vpop.permute.xlu0 %4691 }
0x2708   :  { %v4694_v63 = vmul.f32 %v7611_v27, %v4692_v13 }
0x270a   :  { %4696 = vrot.lane.b32.xlu0 %v4694_v63, %s7809_s18 }
0x2773   :  { %v8851_v25 = vpop.f32.mrb[38].mxu1 }
0x2774   :  { %v6810_v40 = vpop.f32.mrb[39].mxu1 }
0x277c   :  { %v4697_v62 = vpop.permute.xlu0 %4696 }
0x277d   :  { %v8854_v32 = vadd.f32 %v4697_v62, %v4689_v26 }
0x277f   :  { %7612 = vtanh.f32 %v8854_v32 }
0x2789   :  { %v7613_v42 = vpop.eup %7612 }
0x278a   :  { %4702 = vrot.lane.b32.xlu0 %v7613_v42, %s7819_s15 }
0x278e   :  { %4706 = vrot.lane.b32.xlu0 %v146_v39, %s7820_s16  ;;  %v8920_v39 = vld [vmem:[%s9183_s5] ss:$0 sm:$0xff] }
0x27fc   :  { %v4703_v46 = vpop.permute.xlu0 %4702 }
0x27fd   :  { %v8863_v30 = vmul.f32 %v7611_v27, %v4703_v46 }
0x2800   :  { %v4707_v19 = vpop.permute.xlu0 %4706 }
0x2801   :  { %v8866_v54 = vadd.f32 %v4707_v19, %v8863_v30 }
0x2803   :  { %v4717_v31 = vrot.slane %v8866_v54, %v8000_v24 }
0x2805   :  { %4718 = vrot.lane.b32.xlu0 %v4717_v31, %s7809_s18 }
0x2809   :  { %4232 = vrot.lane.b32.xlu0 %v4231_v50, %s7809_s18 }
0x2877   :  { %v4719_v16 = vpop.permute.xlu0 %4718 }
0x2878   :  { %6831 = vmatmul.mubr.msk.f32.vlgmr.msra.gmra.mrb[42].mxu0 %vm153_vm1, %v4719_v16 }
0x2879   :  { %7338 = vmatpush3.bf16.msra.mxu0 %v7951_v5  ;;  %6860 = vmatprep.mubr.msk.f32.mxu0 %vm7816_vm0, %v7817_v1 }
0x287a   :  { %7339 = vmatprep.subr.bf16.mxu0 %v7815_v0 }
0x287b   :  { %v4233_v8 = vpop.permute.xlu0 %4232 }
0x287c   :  { %v4235_v22 = vsel %vm606_vm3, %v4233_v8, 0.0 }
0x287d   :  { %4236 = vadd.xlane.f32.xlu1 %v4235_v22  ;;  %7341 = vmatpush3.bf16.msra.mxu0 %v7962_v9 }
0x287e   :  { %7342 = vmatprep.subr.bf16.mxu0 %v7815_v0 }
0x290a   :  { %v4237_v37 = vpop.xlane.xlu1 %4236 }
0x290b   :  { %v4238_v41 = vmul.f32 0.03125, %v4237_v37 }
0x290d   :  { %v4239_v51 = vadd.f32 %v4238_v41, %v8158_v7 }
0x290f   :  { %7614 = vrsqrt.f32 %v4239_v51 }
0x2919   :  { %v7615_v23 = vpop.eup %7614 }
0x291a   :  { %v8882_v45 = vmul.f32 %v7615_v23, %v4222_v3 }
0x291c   :  { %v4912_v53 = vrot.slane %v8882_v45, %v8000_v24 }
0x291e   :  { %4913 = vrot.lane.b32.xlu0 %v4912_v53, %s7809_s18 }
0x2922   :  { %4988 = vrot.lane.b32.xlu0 %v8813_v33, %s7809_s18 }
0x294b   :  { %v4788_v57 = vpop.f32.mrb[42].mxu0 }
0x294c   :  { %v4789_v11 = vadd.f32 %v8559_v21, %v4788_v57  ;;  %v6832_v59 = vpop.f32.mrb[43].mxu0 }
0x294e   :  { %v5834_v20 = vadd.f32 -1.0, %v4789_v11 }
0x2950   :  { %v5835_v17 = vmul.f32 -1.442695, %v5834_v20 }
0x2952   :  { %7616 = vpow2.f32 %v5835_v17 }
0x295c   :  { %v7617_v18 = vpop.eup %7616 }
0x295d   :  { %v4796_v27 = vadd.f32 1.0, %v7617_v18 }
0x295f   :  { %7618 = vrcp.f32 %v4796_v27 }
0x2969   :  { %v7619_v13 = vpop.eup %7618 }
0x296a   :  { %v4799_v63 = vmul.f32 %v7619_v13, %v4789_v11 }
0x296c   :  { %6850 = vmatmul.mubr.msk.f32.vlgmr.msra.gmra.mrb[40].mxu1 %vm492_vm2, %v4799_v63 }
0x296d   :  { %7350 = vmatpush3.bf16.msra.mxu1 %v8031_v47  ;;  %6882 = vmatprep.mubr.msk.f32.mxu1 %vm7816_vm0, %v7817_v1 }
0x296e   :  { %7351 = vmatprep.subr.bf16.mxu1 %v7815_v0 }
0x2971   :  { %7353 = vmatpush3.bf16.msra.mxu1 %v8037_v49 }
0x2972   :  { %7366 = vmatprep.subr.bf16.mxu1 %v7815_v0 }
0x2990   :  { %v4914_v21 = vpop.permute.xlu0 %4913 }
0x2991   :  { %6861 = vmatmul.mubr.msk.f32.vlgmr.msra.gmra.mrb[44].mxu0 %vm153_vm1, %v4914_v21 }
0x2992   :  { %7344 = vmatpush3.bf16.msra.mxu0 %v7964_v10  ;;  %6871 = vmatprep.mubr.msk.f32.mxu0 %vm7816_vm0, %v7817_v1 }
0x2993   :  { %7345 = vmatprep.subr.bf16.mxu0 %v7815_v0 }
0x2994   :  { %v4989_v33 = vpop.permute.xlu0 %4988 }
0x2996   :  { %7347 = vmatpush3.bf16.msra.mxu0 %v7979_v14 }
0x2997   :  { %7354 = vmatprep.subr.bf16.mxu0 %v7815_v0 }
0x2999   :  { %6872 = vmatmul.mubr.msk.f32.vlgmr.msra.gmra.mrb[44].mxu0 %vm153_vm1, %v4989_v33 }
0x299a   :  { %7356 = vmatpush3.bf16.msra.mxu0 %v8070_v61  ;;  %6901 = vmatprep.mubr.msk.f32.mxu0 %vm7816_vm0, %v7817_v1 }
0x299b   :  { %7357 = vmatprep.subr.bf16.mxu0 %v7815_v0 }
0x299e   :  { %7359 = vmatpush3.bf16.msra.mxu0 %v8080_v2 }
0x299f   :  { %7360 = vmatprep.subr.bf16.mxu0 %v7815_v0 }
0x29a2   :  { %7362 = vmatpush3.bf16.msra.mxu0 %v8090_v6 }
0x29a3   :  { %7363 = vmatprep.subr.bf16.mxu0 %v7815_v0 }
0x29a6   :  { %7365 = vmatpush3.bf16.msra.mxu0 %v8100_v12 }
0x29a7   :  { %7378 = vmatprep.subr.bf16.mxu0 %v7815_v0 }
0x2a3f   :  { %v4869_v40 = vpop.f32.mrb[40].mxu1 }
0x2a40   :  { %v4880_v26 = vrot.slane %v4869_v40, %v8000_v24  ;;  %v6851_v62 = vpop.f32.mrb[41].mxu1 }
0x2a42   :  { %4881 = vrot.lane.b32.xlu0 %v4880_v26, %s7820_s16 }
0x2a6c   :  { %v5058_v42 = vpop.f32.mrb[44].mxu0 }
0x2a6d   :  { %v7402_v29 = vadd.f32 %v8920_v39, %v5058_v42  ;;  %v6873_v15 = vpop.f32.mrb[45].mxu0 }
0x2a6f   :  { %7620 = vtanh.f32 %v7402_v29  ;;  %v5839_v16 = vmul.f32 -1.442695, %v7402_v29 }
0x2a71   :  { %7622 = vpow2.f32 %v5839_v16 }
0x2a79   :  { %v7621_v46 = vpop.eup %7620 }
0x2a7a   :  { %5072 = vrot.lane.b32.xlu0 %v7621_v46, %s7819_s15 }
0x2a7b   :  { %v7623_v8 = vpop.eup %7622 }
0x2a7c   :  { %v5066_v22 = vadd.f32 1.0, %v7623_v8 }
0x2a7e   :  { %7624 = vrcp.f32 %v5066_v22 }
0x2a88   :  { %v7625_v37 = vpop.eup %7624 }
0x2ab4   :  { %v4882_v3 = vpop.permute.xlu0 %4881 }
0x2ab5   :  { %v4884_v19 = vadd.f32 %v4882_v3, %v8866_v54 }
0x2ab7   :  { %v4885_v34 = vadd.f32 %v4884_v19, %v8131_v44  ;;  %v5070_v44 = vmul.f32 %v7625_v37, %v8809_v28 }
0x2ab9   :  { %v4886_v31 = vmul.f32 %v4885_v34, %v4885_v34 }
0x2abb   :  { %v4894_v50 = vrot.slane %v4886_v31, %v8000_v24 }
0x2abd   :  { %4895 = vrot.lane.b32.xlu0 %v4894_v50, %s7809_s18 }
0x2aec   :  { %v5073_v41 = vpop.permute.xlu0 %5072 }
0x2aed   :  { %v5075_v51 = vmul.f32 %v7625_v37, %v5073_v41 }
0x2aef   :  { %5077 = vrot.lane.b32.xlu0 %v5075_v51, %s7809_s18 }
0x2b2f   :  { %v4896_v23 = vpop.permute.xlu0 %4895 }
0x2b30   :  { %v4898_v54 = vsel %vm606_vm3, %v4896_v23, 0.0 }
0x2b31   :  { %4899 = vadd.xlane.f32.xlu0 %v4898_v54 }
0x2b61   :  { %v5078_v53 = vpop.permute.xlu0 %5077 }
0x2b62   :  { %v8931_v57 = vadd.f32 %v5078_v53, %v5070_v44 }
0x2b64   :  { %7626 = vtanh.f32 %v8931_v57 }
0x2b6e   :  { %v7627_v11 = vpop.eup %7626 }
0x2b6f   :  { %5083 = vrot.lane.b32.xlu1 %v7627_v11, %s7819_s15 }
0x2bbe   :  { %v4900_v59 = vpop.xlane.xlu0 %4899 }
0x2bbf   :  { %v4901_v20 = vmul.f32 0.03125, %v4900_v59 }
0x2bc1   :  { %v4902_v17 = vadd.f32 %v4901_v20, %v8158_v7 }
0x2bc3   :  { %7628 = vrsqrt.f32 %v4902_v17 }
0x2bcd   :  { %v7629_v18 = vpop.eup %7628 }
0x2bce   :  { %v8940_v28 = vmul.f32 %v7629_v18, %v4885_v34 }
0x2bd0   :  { %v5269_v21 = vrot.slane %v8940_v28, %v8000_v24 }
0x2be1   :  { %v5084_v27 = vpop.permute.xlu1 %5083 }
0x2be2   :  { %v5086_v13 = vmul.f32 %v7625_v37, %v5084_v27 }
0x2be4   :  { %v8937_v63 = vadd.f32 %v5086_v13, %v8882_v45  ;;  %5345 = vrot.lane.b32.xlu0 %v5086_v13, %s7809_s18 }
0x2be6   :  { %5089 = vrot.lane.b32.xlu1 %v8937_v63, %s7809_s18 }
0x2be8   :  { %4582 = vrot.lane.b32.xlu0 %v8851_v25, %s7820_s16 }
0x2bea   :  { %5270 = vrot.lane.b32.xlu1 %v5269_v21, %s7809_s18 }
0x2c58   :  { %v5090_v33 = vpop.permute.xlu1 %5089 }
0x2c59   :  { %6883 = vmatmul.mubr.msk.f32.vlgmr.msra.gmra.mrb[42].mxu1 %vm153_vm1, %v5090_v33 }
0x2c5a   :  { %7368 = vmatpush3.bf16.msra.mxu1 %v7951_v5  ;;  %6912 = vmatprep.mubr.msk.f32.mxu1 %vm7816_vm0, %v7817_v1  ;;  %v5346_v5 = vpop.permute.xlu0 %5345 }
0x2c5b   :  { %7369 = vmatprep.subr.bf16.mxu1 %v7815_v0 }
0x2c5c   :  { %v5271_v25 = vpop.permute.xlu1 %5270 }
0x2c5e   :  { %7371 = vmatpush3.bf16.msra.mxu1 %v7962_v9  ;;  %v4583_v51 = vpop.permute.xlu0 %4582 }
0x2c5f   :  { %7372 = vmatprep.subr.bf16.mxu1 %v7815_v0  ;;  %v4585_v59 = vadd.f32 %v4583_v51, %v8817_v35 }
0x2c61   :  { %6913 = vmatmul.mubr.msk.f32.vlgmr.msra.gmra.mrb[44].mxu1 %vm153_vm1, %v5271_v25 }
0x2c62   :  { %7374 = vmatpush3.bf16.msra.mxu1 %v7964_v10  ;;  %6923 = vmatprep.mubr.msk.f32.mxu1 %vm7816_vm0, %v7817_v1  ;;  %v8976_v10 = vld [vmem:[%s9185_s7] ss:$0 sm:$0xff] }
0x2c63   :  { %7375 = vmatprep.subr.bf16.mxu1 %v7815_v0 }
0x2c66   :  { %7377 = vmatpush3.bf16.msra.mxu1 %v7979_v14 }
0x2c67   :  { %7384 = vmatprep.subr.bf16.mxu1 %v7815_v0 }
0x2c69   :  { %6924 = vmatmul.mubr.msk.f32.vlgmr.msra.gmra.mrb[44].mxu1 %vm153_vm1, %v5346_v5 }
0x2c6a   :  { %7386 = vmatpush3.bf16.msra.mxu1 %v8070_v61  ;;  %6953 = vmatprep.mubr.msk.f32.mxu1 %vm7816_vm0, %v7817_v1 }
0x2c6b   :  { %7387 = vmatprep.subr.bf16.mxu1 %v7815_v0 }
0x2c6e   :  { %7389 = vmatpush3.bf16.msra.mxu1 %v8080_v2 }
0x2c6f   :  { %7390 = vmatprep.subr.bf16.mxu1 %v7815_v0 }
0x2c72   :  { %7392 = vmatpush3.bf16.msra.mxu1 %v8090_v6 }
0x2c73   :  { %7393 = vmatprep.subr.bf16.mxu1 %v7815_v0 }
0x2c76   :  { %7395 = vmatpush3.bf16.msra.mxu1 %v8100_v12 }
0x2d2c   :  { %v5159_v9 = vpop.f32.mrb[42].mxu1 }
0x2d2d   :  { %v5160_v14 = vadd.f32 %v8976_v10, %v5159_v9  ;;  %v6884_v61 = vpop.f32.mrb[43].mxu1 }
0x2d2f   :  { %v5841_v45 = vadd.f32 -1.0, %v5160_v14 }
0x2d31   :  { %v5842_v40 = vmul.f32 -1.442695, %v5841_v45 }
0x2d33   :  { %7630 = vpow2.f32 %v5842_v40 }
0x2d3c   :  { %v5415_v2 = vpop.f32.mrb[44].mxu1 }
0x2d3d   :  { %v7631_v26 = vpop.eup %7630  ;;  %v7403_v6 = vadd.f32 %v8920_v39, %v5415_v2  ;;  %v6925_v62 = vpop.f32.mrb[45].mxu1 }
0x2d3e   :  { %v5167_v42 = vadd.f32 1.0, %v7631_v26 }
0x2d3f   :  { %7632 = vtanh.f32 %v7403_v6  ;;  %v5846_v39 = vmul.f32 -1.442695, %v7403_v6 }
0x2d40   :  { %7634 = vrcp.f32 %v5167_v42 }
0x2d41   :  { %7636 = vpow2.f32 %v5846_v39 }
0x2d49   :  { %v7633_v12 = vpop.eup %7632 }
0x2d4a   :  { %v7635_v29 = vpop.eup %7634  ;;  %5429 = vrot.lane.b32.xlu1 %v7633_v12, %s7819_s15 }
0x2d4b   :  { %v5170_v15 = vmul.f32 %v7635_v29, %v5160_v14  ;;  %v7637_v46 = vpop.eup %7636 }
0x2d4c   :  { %v5423_v3 = vadd.f32 1.0, %v7637_v46 }
0x2d4d   :  { %6902 = vmatmul.mubr.msk.f32.vlgmr.msra.gmra.mrb[46].mxu0 %vm492_vm2, %v5170_v15 }
0x2d4e   :  { %7380 = vmatpush3.bf16.msra.mxu0 %v8031_v47  ;;  %6934 = vmatprep.mubr.msk.f32.mxu0 %vm7816_vm0, %v7817_v1  ;;  %7638 = vrcp.f32 %v5423_v3 }
0x2d4f   :  { %7381 = vmatprep.subr.bf16.mxu0 %v7815_v0  ;;  %v7667_v0 = vld [vmem:[%s9187_s9] ss:$0 sm:$0xff]  ;;  %s7821_s9 = smov [#allocation9]  }
0x2d52   :  { %7383 = vmatpush3.bf16.msra.mxu0 %v8037_v49 }
0x2d58   :  { %v7639_v19 = vpop.eup %7638 }
0x2d59   :  { %v5427_v1 = vmul.f32 %v7639_v19, %v8931_v57 }
0x2dbc   :  { %v5430_v34 = vpop.permute.xlu1 %5429 }
0x2dbd   :  { %v5432_v31 = vmul.f32 %v7639_v19, %v5430_v34 }
0x2dbf   :  { %5434 = vrot.lane.b32.xlu1 %v5432_v31, %s7809_s18 }
0x2e20   :  { %v5240_v50 = vpop.f32.mrb[46].mxu0 }
0x2e21   :  { %5245 = vrot.lane.b32.xlu0 %v5240_v50, %s7820_s16  ;;  %v6903_v47 = vpop.f32.mrb[47].mxu0 }
0x2e25   :  { %1268 = vrot.lane.b32.xlu0 %v7667_v0, %s7820_s16 }
0x2e29   :  { %3919 = vrot.lane.b32.xlu0 %v8741_v56, %s7820_s16 }
0x2e31   :  { %v5435_v49 = vpop.permute.xlu1 %5434 }
0x2e32   :  { %v8996_v16 = vadd.f32 %v5435_v49, %v5427_v1 }
0x2e34   :  { %7640 = vtanh.f32 %v8996_v16 }
0x2e3e   :  { %v7641_v8 = vpop.eup %7640 }
0x2e3f   :  { %5440 = vrot.lane.b32.xlu1 %v7641_v8, %s7819_s15  ;;  %s5697_s15 = sshll.u32 %s7821_s9, 4  ;;  %s5698_s15 = int_to_ptr.vmem [resolvable:$true] %s5697_s15 }
0x2e40   :  { %s7734_s24 = scalar_lea.vmem %s5698_s15, 256  ;;  %p7739_p11 = scmp.lt.s32.totalorder %s5698_s15, %s5698_s15 }
0x2e41   :  { %p7735_p10 = scmp.ne.s32.totalorder %s5698_s15, %s7734_s24  ;;  %p7740_p12 = scmp.lt.s32.totalorder %s7734_s24, %s7734_s24 }
0x2e43   :  { %p7741_p13 = por %p7740_p12, %p7739_p11 }
0x2e45   :  { %p7742_p0 = pnand %p7741_p13, %p7735_p10 }
0x2e93   :  { %v5246_v54 = vpop.permute.xlu0 %5245 }
0x2e94   :  { %v5248_v35 = vadd.f32 %v5246_v54, %v8937_v63 }
0x2e97   :  { %v9019_v11 = vpop.permute.xlu0 %1268 }
0x2e9b   :  { %v3920_v21 = vpop.permute.xlu0 %3919 }
0x2e9c   :  { %v3922_v33 = vadd.f32 %v3920_v21, %v8698_v58 }
0x2eb1   :  { %v5441_v22 = vpop.permute.xlu1 %5440 }
0x2eb2   :  { %v9000_v37 = vmul.f32 %v7639_v19, %v5441_v22 }
0x2eb4   :  { %v9004_v41 = vadd.f32 %v9000_v37, %v8940_v28  ;;  %v9049_v28 = vadd.f32 %v5248_v35, %v9019_v11 }
0x2eb6   :  { %5446 = vrot.lane.b32.xlu1 %v9004_v41, %s7809_s18  ;;  %v5250_v63 = vmul.f32 %v9049_v28, %v9049_v28 }
0x2eba   :  { %1930 = vrot.lane.b32.xlu1 %v8374_v38, %s7820_s16 }
0x2ebe   :  { %2593 = vrot.lane.b32.xlu1 %v8501_v36, %s7820_s16 }
0x2ec2   :  { %1264 = vrot.lane.b32.xlu1 %v8259_v48, %s7820_s16 }
0x2ec6   :  { %3256 = vrot.lane.b32.xlu1 %v8622_v55, %s7820_s16 }
0x2f28   :  { %v5447_v56 = vpop.permute.xlu1 %5446 }
0x2f29   :  { %6935 = vmatmul.mubr.msk.f32.vlgmr.msra.gmra.mrb[48].mxu0 %vm153_vm1, %v5447_v56 }
0x2f2c   :  { %v1931_v23 = vpop.permute.xlu1 %1930 }
0x2f2d   :  { %v1933_v57 = vadd.f32 %v1931_v23, %v8333_v60  ;;  %v9035_v60 = vadd.f32 %v4585_v59, %v9019_v11 }
0x2f2f   :  { %v9025_v48 = vadd.f32 %v1933_v57, %v9019_v11  ;;  %v4587_v18 = vmul.f32 %v9035_v60, %v9035_v60 }
0x2f30   :  { %v2594_v44 = vpop.permute.xlu1 %2593 }
0x2f31   :  { %v2596_v20 = vadd.f32 %v2594_v44, %v8455_v52 }
0x2f33   :  { %v9039_v17 = vadd.f32 %v2596_v20, %v9019_v11 }
0x2f34   :  { %v1265_v53 = vpop.permute.xlu1 %1264 }
0x2f35   :  { %v1267_v38 = vadd.f32 %v1265_v53, %v8216_v4  ;;  %v1935_v4 = vmul.f32 %v9025_v48, %v9025_v48  ;;  %v2598_v13 = vmul.f32 %v9039_v17, %v9039_v17 }
0x2f37   :  { %v9022_v36 = vadd.f32 %v9019_v11, %v1267_v38 }
0x2f38   :  { %v3257_v27 = vpop.permute.xlu1 %3256 }
0x2f39   :  { %v1272_v55 = vmul.f32 %v9022_v36, %v9022_v36  ;;  %v3259_v52 = vadd.f32 %v3257_v27, %v8581_v43  ;;  %v9060_v43 = vadd.f32 %v3922_v33, %v9019_v11 }
0x2f3b   :  { %1274 = vrot.lane.b32.xlu0 %v1272_v55, %s7809_s18  ;;  %v9054_v25 = vadd.f32 %v3259_v52, %v9019_v11  ;;  %v3924_v9 = vmul.f32 %v9060_v43, %v9060_v43 }
0x2f3d   :  { %v3261_v5 = vmul.f32 %v9054_v25, %v9054_v25 }
0x2f3f   :  { %1937 = vrot.lane.b32.xlu0 %v1935_v4, %s7809_s18 }
0x2f43   :  { %4589 = vrot.lane.b32.xlu0 %v4587_v18, %s7809_s18 }
0x2f47   :  { %2600 = vrot.lane.b32.xlu0 %v2598_v13, %s7809_s18 }
0x2f4b   :  { %5252 = vrot.lane.b32.xlu0 %v5250_v63, %s7809_s18 }
0x2f4f   :  { %3263 = vrot.lane.b32.xlu0 %v3261_v5, %s7809_s18 }
0x2f53   :  { %3926 = vrot.lane.b32.xlu0 %v3924_v9, %s7809_s18 }
0x2fad   :  { %v1275_v29 = vpop.permute.xlu0 %1274 }
0x2fae   :  { %v1277_v3 = vsel %vm606_vm3, %v1275_v29, 0.0 }
0x2fb1   :  { %v1938_v15 = vpop.permute.xlu0 %1937 }
0x2fb2   :  { %v1940_v51 = vsel %vm606_vm3, %v1938_v15, 0.0 }
0x2fb5   :  { %v4590_v39 = vpop.permute.xlu0 %4589 }
0x2fb6   :  { %v4592_v0 = vsel %vm606_vm3, %v4590_v39, 0.0 }
0x2fb9   :  { %v2601_v46 = vpop.permute.xlu0 %2600 }
0x2fba   :  { %v2603_v34 = vsel %vm606_vm3, %v2601_v46, 0.0 }
0x2ffc   :  { %v5516_v58 = vpop.f32.mrb[48].mxu0 }
0x2ffd   :  { %v5517_v14 = vadd.f32 %v8976_v10, %v5516_v58  ;;  %v6936_v61 = vpop.f32.mrb[49].mxu0  ;;  %v5253_v10 = vpop.permute.xlu0 %5252 }
0x2ffe   :  { %v5255_v1 = vsel %vm606_vm3, %v5253_v10, 0.0 }
0x2fff   :  { %v5848_v45 = vadd.f32 -1.0, %v5517_v14 }
0x3001   :  { %v5849_v40 = vmul.f32 -1.442695, %v5848_v45  ;;  %v3264_v19 = vpop.permute.xlu0 %3263 }
0x3002   :  { %v3266_v31 = vsel %vm606_vm3, %v3264_v19, 0.0 }
0x3003   :  { %7642 = vpow2.f32 %v5849_v40 }
0x3005   :  { %v3927_v50 = vpop.permute.xlu0 %3926 }
0x3006   :  { %v3929_v47 = vsel %vm606_vm3, %v3927_v50, 0.0 }
0x300d   :  { %v7643_v2 = vpop.eup %7642 }
0x300e   :  { %v5524_v26 = vadd.f32 1.0, %v7643_v2 }
0x3010   :  { %7644 = vrcp.f32 %v5524_v26 }
0x301a   :  { %v7645_v6 = vpop.eup %7644 }
0x301b   :  { %v5527_v62 = vmul.f32 %v7645_v6, %v5517_v14 }
0x301d   :  { %6954 = vmatmul.mubr.msk.f32.vlgmr.msra.gmra.mrb[46].mxu1 %vm492_vm2, %v5527_v62 }
0x30f0   :  { %v5597_v42 = vpop.f32.mrb[46].mxu1 }
0x30f1   :  { %5602 = vrot.lane.b32.xlu1 %v5597_v42, %s7820_s16  ;;  %v6955_v12 = vpop.f32.mrb[47].mxu1 }
0x3115   :  { %1278 = vadd.xlane.f32.xlu1 %v1277_v3 }
0x3119   :  { %2604 = vadd.xlane.f32.xlu1 %v2603_v34 }
0x311d   :  { %3267 = vadd.xlane.f32.xlu1 %v3266_v31 }
0x3121   :  { %3930 = vadd.xlane.f32.xlu1 %v3929_v47 }
0x3125   :  { %4593 = vadd.xlane.f32.xlu1 %v4592_v0 }
0x3129   :  { %5256 = vadd.xlane.f32.xlu1 %v5255_v1 }
0x3163   :  { %v5603_v49 = vpop.permute.xlu1 %5602 }
0x3164   :  { %v5605_v8 = vadd.f32 %v5603_v49, %v9004_v41 }
0x3166   :  { %v9079_v22 = vadd.f32 %v5605_v8, %v9019_v11 }
0x3168   :  { %v5607_v56 = vmul.f32 %v9079_v22, %v9079_v22 }
0x316a   :  { %5609 = vrot.lane.b32.xlu0 %v5607_v56, %s7809_s18 }
0x3189   :  { %1941 = vadd.xlane.f32.xlu0 %v1940_v51 }
0x31a2   :  { %v1279_v44 = vpop.xlane.xlu1 %1278 }
0x31a3   :  { %v1280_v55 = vmul.f32 0.03125, %v1279_v44 }
0x31a5   :  { %v1281_v20 = vadd.f32 %v1280_v55, %v8158_v7 }
0x31a6   :  { %v2605_v53 = vpop.xlane.xlu1 %2604 }
0x31a7   :  { %v2606_v38 = vmul.f32 0.03125, %v2605_v53 }
0x31a9   :  { %v2607_v11 = vadd.f32 %v2606_v38, %v8158_v7 }
0x31aa   :  { %v3268_v57 = vpop.xlane.xlu1 %3267 }
0x31ab   :  { %v3269_v41 = vmul.f32 0.03125, %v3268_v57  ;;  %7646 = vrsqrt.f32 %v2607_v11 }
0x31ad   :  { %v3270_v59 = vadd.f32 %v3269_v41, %v8158_v7 }
0x31af   :  { %7648 = vrsqrt.f32 %v3270_v59 }
0x31b0   :  { %7650 = vrsqrt.f32 %v1281_v20 }
0x31b5   :  { %v7647_v35 = vpop.eup %7646 }
0x31b6   :  { %v2609_v33 = vmul.f32 %v7647_v35, %v9039_v17  ;;  %v3931_v17 = vpop.xlane.xlu1 %3930 }
0x31b8   :  { %v5623_v14 = vrot.slane %v2609_v33, 4 }
0x31b9   :  { %v7649_v52 = vpop.eup %7648 }
0x31ba   :  { %v7651_v13 = vpop.eup %7650  ;;  %v3272_v5 = vmul.f32 %v7649_v52, %v9054_v25  ;;  %v4594_v25 = vpop.xlane.xlu1 %4593 }
0x31bb   :  { %v1283_v9 = vmul.f32 %v7651_v13, %v9022_v36  ;;  %v5675_v36 = vrot.slane %v8854_v32, %v8000_v24  ;;  %v4595_v6 = vmul.f32 0.03125, %v4594_v25 }
0x31bc   :  { %v5626_v61 = vrot.slane %v3272_v5, 2 }
0x31bd   :  { %v4596_v42 = vadd.f32 %v4595_v6, %v8158_v7 }
0x31be   :  { %v5257_v26 = vpop.xlane.xlu1 %5256 }
0x31bf   :  { %v5258_v62 = vmul.f32 0.03125, %v5257_v26 }
0x31c1   :  { %v5259_v12 = vadd.f32 %v5258_v62, %v8158_v7 }
0x31dc   :  { %v5610_v23 = vpop.permute.xlu0 %5609 }
0x31dd   :  { %v5612_v54 = vsel %vm606_vm3, %v5610_v23, 0.0 }
0x31de   :  { %5613 = vadd.xlane.f32.xlu1 %v5612_v54 }
0x3216   :  { %v1942_v4 = vpop.xlane.xlu0 %1941 }
0x3217   :  { %v1943_v18 = vmul.f32 0.03125, %v1942_v4 }
0x3219   :  { %v1944_v27 = vadd.f32 %v1943_v18, %v8158_v7 }
0x321b   :  { %7652 = vrsqrt.f32 %v1944_v27 }
0x321c   :  { %7654 = vrsqrt.f32 %v4596_v42 }
0x321d   :  { %7656 = vrsqrt.f32 %v5259_v12 }
0x3225   :  { %v7653_v21 = vpop.eup %7652 }
0x3226   :  { %v1946_v63 = vmul.f32 %v7653_v21, %v9025_v48  ;;  %v5663_v48 = vrot.slane %v8863_v30, %v8000_v24  ;;  %v3932_v30 = vmul.f32 0.03125, %v3931_v17 }
0x3228   :  { %v5620_v58 = vrot.slane %v1946_v63, 6  ;;  %v3933_v29 = vadd.f32 %v3932_v30, %v8158_v7 }
0x322a   :  { %v5638_v45 = vsel %vm5637_vm4, %v1283_v9, %v5620_v58  ;;  %7658 = vrsqrt.f32 %v3933_v29 }
0x322b   :  { %v5640_v40 = vsel %vm5639_vm6, %v5638_v45, %v5623_v14 }
0x322c   :  { %v5642_v2 = vsel %vm5641_vm5, %v5640_v40, %v5626_v61 }
0x322d   :  { %5648 = vrot.lane.b32.xlu1 %v5642_v2, %s7809_s18 }
0x3231   :  { %5664 = vrot.lane.b32.xlu1 %v5663_v48, %s7809_s18 }
0x3235   :  { %5676 = vrot.lane.b32.xlu1 %v5675_v36, %s7820_s16 }
0x3239   :  { %5687 = vrot.lane.b32.xlu1 %v8996_v16, %s7820_s16  ;;  %v7655_v16 = vpop.eup %7654  ;;  %s7822_s16 = smov [#allocation10]  }
0x323a   :  { %v7657_v39 = vpop.eup %7656  ;;  %v4598_v46 = vmul.f32 %v7655_v16, %v9035_v60  ;;  %s5709_s2 = sshll.u32 %s7822_s16, 4  ;;  %s5710_s2 = int_to_ptr.vmem [resolvable:$true] %s5709_s2 }
0x323b   :  { %v5261_v10 = vmul.f32 %v7657_v39, %v9049_v28  ;;  %v7659_v3 = vpop.eup %7658 }
0x323c   :  { %v5629_v19 = vrot.slane %v4598_v46, 6  ;;  %v3935_v50 = vmul.f32 %v7659_v3, %v9060_v43 }
0x323d   :  { %v5632_v31 = vrot.slane %v5261_v10, 4 }
0x323e   :  { %v5643_v1 = vsel %vm5637_vm4, %v3935_v50, %v5629_v19 }
0x326b   :  { %v5614_v24 = vpop.xlane.xlu1 %5613 }
0x326c   :  { %v5615_v32 = vmul.f32 0.03125, %v5614_v24 }
0x326e   :  { %v5616_v15 = vadd.f32 %v5615_v32, %v8158_v7  ;;  %v5644_v7 = vsel %vm5639_vm6, %v5643_v1, %v5632_v31 }
0x3270   :  { %7660 = vrsqrt.f32 %v5616_v15 }
0x327a   :  { %v7661_v34 = vpop.eup %7660 }
0x327b   :  { %v5618_v47 = vmul.f32 %v7661_v34, %v9079_v22 }
0x327d   :  { %v5635_v0 = vrot.slane %v5618_v47, 2 }
0x327f   :  { %v5645_v49 = vsel %vm5641_vm5, %v5644_v7, %v5635_v0 }
0x3280   :  { %5650 = vrot.lane.b32.xlu0 %v5645_v49, %s7809_s18 }
0x3284   :  { %5681 = vrot.lane.b32.xlu0 %v9000_v37, %s7809_s18 }
0x329f   :  { %v5649_v60 = vpop.permute.xlu1 %5648 }
0x32a0   :  { %5654 = vst.msk [vmem:[#allocation9] sm:$0xff] %vm153_vm1, %v5649_v60 }
0x32a3   :  { %v5665_v28 = vpop.permute.xlu1 %5664 }
0x32a4   :  { %5667 = vst.msk [vmem:[#allocation10] sm:$0x3] %vm606_vm3, %v5665_v28 }
0x32a7   :  { %v5677_v43 = vpop.permute.xlu1 %5676 }
0x32a8   :  { %5679 = vst.msk [vmem:[#allocation12] sm:$0x3] %vm606_vm3, %v5677_v43 }
0x32ab   :  { %v5688_v8 = vpop.permute.xlu1 %5687 }
0x32ac   :  { %5691 = vst.msk [vmem:[#allocation12 + $0x2] sm:$0x3] %vm606_vm3, %v5688_v8 }
0x32f2   :  { %v5651_v22 = vpop.permute.xlu0 %5650 }
0x32f3   :  { %5655 = vst.msk [vmem:[#allocation9 + $0x8] sm:$0xff] %vm153_vm1, %v5651_v22 }
0x32f4   :  { %7745 = shalt.err (!%p7742_p0)
}
0x32f5   :  { %s7746_s6 = scalar_lea.hbm %s9189_s11, 256 }
0x32f6   :  { %p7747_p1 = scmp.ne.s32.totalorder %s9189_s11, %s7746_s6  ;;  %p7750_p2 = scmp.lt.u32.totalorder %s7746_s6, %s9189_s11 }
0x32f8   :  { %p7752_p3 = pnand %p7750_p2, %p7747_p1 }
0x32fa   :  { %7755 = shalt.err (!%p7752_p3)
}
0x32fb   :  { %5703 = dma.vmem_to_hbm [thread:$0]  %s5698_s15, 256, %s9189_s11, [#allocation5], %s7812_s1, %s7812_s1, %s7813_s26   ;;  %v5682_v37 = vpop.permute.xlu0 %5681 }
0x32fc   :  { %5685 = vst.msk [vmem:[#allocation10 + $0x2] sm:$0x3] %vm606_vm3, %v5682_v37  ;;  %s7756_s3 = scalar_lea.vmem %s5710_s2, 64  ;;  %p7761_p5 = scmp.lt.s32.totalorder %s5710_s2, %s5710_s2 }
0x32fd   :  { %p7757_p4 = scmp.ne.s32.totalorder %s5710_s2, %s7756_s3  ;;  %p7762_p6 = scmp.lt.s32.totalorder %s7756_s3, %s7756_s3 }
0x32ff   :  { %p7763_p7 = por %p7762_p6, %p7761_p5 }
0x3301   :  { %p7764_p8 = pnand %p7763_p7, %p7757_p4 }
0x3303   :  { %7767 = shalt.err (!%p7764_p8)
}
0x3304   :  { %s7768_s23 = scalar_lea.hbm %s9190_s12, 64 }
0x3305   :  { %p7769_p9 = scmp.ne.s32.totalorder %s9190_s12, %s7768_s23  ;;  %p7772_p10 = scmp.lt.u32.totalorder %s7768_s23, %s9190_s12 }
0x3307   :  { %p7774_p11 = pnand %p7772_p10, %p7769_p9 }
0x3309   :  { %7777 = shalt.err (!%p7774_p11)
}
0x330a   :  { %5715 = dma.vmem_to_hbm [thread:$0]  %s5710_s2, 64, %s9190_s12, [#allocation11], %s7809_s18, %s7809_s18, %s7810_s19  }
0x330b   :  { %s7778_s20 = scalar_lea.vmem %s9140_s22, 64  ;;  %p7783_p13 = scmp.lt.s32.totalorder %s9140_s22, %s9140_s22 }
0x330c   :  { %p7779_p12 = scmp.ne.s32.totalorder %s9140_s22, %s7778_s20  ;;  %p7784_p0 = scmp.lt.s32.totalorder %s7778_s20, %s7778_s20 }
0x330e   :  { %p7785_p1 = por %p7784_p0, %p7783_p13 }
0x3310   :  { %p7786_p2 = pnand %p7785_p1, %p7779_p12 }
0x3312   :  { %7789 = shalt.err (!%p7786_p2)
}
0x3313   :  { %s7790_s16 = scalar_lea.hbm %s9191_s13, 64 }
0x3314   :  { %p7791_p3 = scmp.ne.s32.totalorder %s9191_s13, %s7790_s16  ;;  %p7794_p4 = scmp.lt.u32.totalorder %s7790_s16, %s9191_s13 }
0x3316   :  { %p7796_p5 = pnand %p7794_p4, %p7791_p3 }
0x3318   :  { %7799 = shalt.err (!%p7796_p5)
}
0x3319   :  { %5727 = dma.vmem_to_hbm [thread:$0]  %s9140_s22, 64, %s9191_s13, [#allocation11], %s7809_s18, %s7809_s18, %s7810_s19  }
0x331a   :  { %7804 = dma.done.wait [#allocation5], 256  }
0x331b   :  { %7805 = vsyncadd [#allocation5], 4294967040 }
0x331c   :  { %7806 = dma.done.wait [#allocation11], 128  }
0x331d   :  { %7807 = vsyncadd [#allocation11], 4294967168 }
0x331e   :  { %5737 = vsyncpa [#allocation4], 1 }
0x331f   :  { %5738 = vsyncpa [#allocation7], 1 }
0x3320   :  { %5739 = vsyncpa [#allocation5], 1 }
0x3321   :  { %5740 = vsyncpa [#allocation11], 1 }

</bundles_post_ra>
